<compile_context>
chip_gen: v7x
topology: tpu7x:2x2x1
jax: 0.10.0
libtpu: 0.0.40
codegen_flags: <defaults>
</compile_context>

<pallas_src>
import functools

import jax
import jax.numpy as jnp
from jax.experimental import pallas as pl
from jax.experimental.pallas import tpu as pltpu

N_SITE = 8
SPINOR = 2
NVEC = N_SITE * N_SITE * SPINOR          # 128
NUM_ENTRIES = NVEC * (NVEC + 1) // 2     # 8256 lower-triangular entries
KAPPA = 0.276
MAXITER = 20


# ----------------------------------------------------------------------------
# Glue: synthetic DDOpt (U(1) lattice operator), its dense matrix, and L / M
# ----------------------------------------------------------------------------
def _dd_opt_single(x, u1, kappa):
    """Synthetic SPD Wilson-like operator on one (8, 8, 2) field."""
    w = jnp.cos(u1)            # real link weights from U(1) angles
    w0 = w[..., 0]             # links along lattice axis 0
    w1 = w[..., 1]             # links along lattice axis 1
    hop = (w0[..., None] * jnp.roll(x, -1, axis=0)
           + jnp.roll(w0, 1, axis=0)[..., None] * jnp.roll(x, 1, axis=0)
           + w1[..., None] * jnp.roll(x, -1, axis=1)
           + jnp.roll(w1, 1, axis=1)[..., None] * jnp.roll(x, 1, axis=1))
    return (1.0 + 4.0 * kappa) * x - kappa * hop


def build_dense_ddopt_T(U1, kappa):
    """Densify DDOpt as AT of shape (B, 128, 128) with AT[:, j, i] = A[:, i, j].

    Stored transposed so the kernel matvec A @ v becomes the row-vector
    product v @ AT: a standard NN matmul on the MXU, no in-kernel transpose.
    """
    eye = jnp.eye(NVEC, dtype=jnp.float32).reshape(NVEC, N_SITE, N_SITE, SPINOR)

    def one_batch(u1b):
        # row k = A @ e_k, i.e. the result is A^T
        return jax.vmap(
            lambda e: _dd_opt_single(e, u1b, kappa).reshape(NVEC))(eye)

    return jax.vmap(one_batch)(U1)


def build_L(net_out):
    """Scatter net_out (B, 8256) into a lower-triangular (B, 128, 128) matrix.

    Same row-major tril ordering as torch.tril_indices (the ordering assumed
    by upper_tri_mat / lower_tri_matvect in the reference).
    """
    bsz, num_entries = net_out.shape
    n = int(round((((8 * num_entries + 1) ** 0.5) - 1) / 2))
    ii, jj = jnp.tril_indices(n)
    L = jnp.zeros((bsz, n, n), net_out.dtype)
    return L.at[:, ii, jj].set(net_out)


# ----------------------------------------------------------------------------
# Pallas kernel: full preconditioned CG + true residual norm (one batch / step)
# ----------------------------------------------------------------------------
def _cg_loss_kernel(M_ref, AT_ref, b_ref, out_ref, *, maxiter):
    M = M_ref[0]          # (n, n) = L @ L^T (symmetric) preconditioner
    AT = AT_ref[0]        # (n, n) = A^T, dense DDOpt stored transposed
    b = b_ref[0]          # (1, n) RHS, row vector

    def a_mv(v):
        # (A v) as a row vector: v @ A^T, single MXU matmul, f32 accumulate.
        return jnp.dot(v, AT, preferred_element_type=jnp.float32)

    def m_mv(v):
        # M = L L^T is symmetric, so v @ M == (M v)^T; one MXU matmul instead
        # of two serially dependent triangular matvecs.
        return jnp.dot(v, M, preferred_element_type=jnp.float32)

    def vdot(u, v):
        return jnp.sum(u * v, axis=1, keepdims=True)     # (1, 1)

    # x0 = M(b), as in cg_batch's default initial guess
    x = m_mv(b)
    r = b - a_mv(x)
    z = m_mv(r)
    p = z
    rz = vdot(r, z)

    def body(_, carry):
        x, r, p, rz = carry
        Ap = a_mv(p)
        pAp = vdot(p, Ap)
        # EUP approx reciprocal instead of a full-precision divide sequence.
        alpha = rz * pl.reciprocal(jnp.where(pAp == 0.0, 1e-8, pAp), approx=True)
        x = x + alpha * p
        r = r - alpha * Ap
        z = m_mv(r)
        rz_new = vdot(r, z)
        beta = rz_new * pl.reciprocal(jnp.where(rz == 0.0, 1e-8, rz), approx=True)
        p = z + beta * p
        return x, r, p, rz_new

    # Fixed, short trip count: fully unroll so the scheduler can overlap
    # MXU/XLU/EUP latencies across iteration boundaries.
    x, r, p, rz = jax.lax.fori_loop(0, maxiter, body, (x, r, p, rz),
                                    unroll=True)

    # True residual DDOpt(x) - b, as in the torch reference (not the
    # recurrence residual -r), computed with one more MXU matvec.
    res = a_mv(x) - b
    out_ref[...] = jnp.sqrt(vdot(res, res)).reshape(1, 1, 1)


@functools.partial(jax.jit, static_argnames=("kappa", "maxiter"))
def cg_loss(net_out, U1, b_field, kappa=KAPPA, maxiter=MAXITER):
    """Forward pass of CG_loss. Returns the scalar mean residual norm."""
    bsz = net_out.shape[0]
    L = build_L(net_out.astype(jnp.float32))
    # Pre-fold the preconditioner L(L^H v) into a single matrix M = L L^T
    # (real arithmetic => conj() is a no-op); halves the per-iteration
    # preconditioner dependence chain inside the kernel.
    M = jnp.einsum('bik,bjk->bij', L, L)
    AT = build_dense_ddopt_T(U1, kappa).astype(jnp.float32)
    b = b_field.reshape(bsz, 1, NVEC).astype(jnp.float32)     # (B, 1, 128)

    kernel = functools.partial(_cg_loss_kernel, maxiter=maxiter)
    norms = pl.pallas_call(
        kernel,
        out_shape=jax.ShapeDtypeStruct((bsz, 1, 1), jnp.float32),
        grid=(bsz,),
        in_specs=[
            pl.BlockSpec((1, NVEC, NVEC), lambda i: (i, 0, 0)),   # M
            pl.BlockSpec((1, NVEC, NVEC), lambda i: (i, 0, 0)),   # AT
            pl.BlockSpec((1, 1, NVEC), lambda i: (i, 0, 0)),      # b
        ],
        out_specs=pl.BlockSpec((1, 1, 1), lambda i: (i, 0, 0)),
        compiler_params=pltpu.CompilerParams(
            dimension_semantics=("parallel",)),
    )(M, AT, b)
    # residual_norm = mean over batch of || DDOpt(x) - b ||_2
    return jnp.mean(norms)


# ----------------------------------------------------------------------------
# Driver
# ----------------------------------------------------------------------------
if __name__ == "__main__":
    key = jax.random.PRNGKey(0)
    k1, k2, k3 = jax.random.split(key, 3)
    B = 2

    # net_out: (B, 8256) lower-triangular entries of the learned 128x128 factor.
    net_out = 0.05 * jax.random.normal(k1, (B, NUM_ENTRIES), jnp.float32)
    diag_pos = jnp.array([i * (i + 1) // 2 + i for i in range(NVEC)])
    net_out = net_out.at[:, diag_pos].add(1.0)  # keep preconditioner well-conditioned

    # U1: synthetic U(1) gauge angles, two link directions per site.
    U1 = jax.random.uniform(k2, (B, N_SITE, N_SITE, SPINOR), jnp.float32,
                            minval=-jnp.pi, maxval=jnp.pi)

    # b = torch.rand(B, 8, 8, 2).cdouble(): uniform [0,1), zero imaginary part.
    b_field = jax.random.uniform(k3, (B, N_SITE, N_SITE, SPINOR), jnp.float32)

    loss = cg_loss(net_out, U1, b_field)
    jax.block_until_ready(loss)
    print("KERNEL_OK")
</pallas_src>

<mosaic_0001>
module attributes {stable_mosaic.version = 11 : i64} {
  func.func private @main(%arg0: i32) attributes {dimension_semantics = [#tpu.dimension_semantics<core_parallel>], iteration_bounds = array<i64: 2>, tpu.core_type = #tpu.core_type<sc_scalar_subcore>, window_params = []} {
    return
  }
}

module attributes {stable_mosaic.version = 11 : i64} {
  func.func private @main(%arg0: i32) attributes {dimension_semantics = [#tpu.dimension_semantics<core_parallel>], iteration_bounds = array<i64: 2>, tpu.core_type = #tpu.core_type<sc_scalar_subcore>, window_params = []} {
    return
  }
}

module attributes {stable_mosaic.version = 11 : i64} {
  func.func @_cg_loss_kernel(%arg0: i32, %arg1: memref<1x128x128xf32, #tpu.memory_space<vmem>>, %arg2: memref<1x128x128xf32, #tpu.memory_space<vmem>>, %arg3: memref<1x1x128xf32, #tpu.memory_space<vmem>>, %arg4: memref<1x1x1xf32, #tpu.memory_space<vmem>>) attributes {dimension_semantics = [#tpu.dimension_semantics<parallel>], iteration_bounds = array<i64: 2>, scalar_prefetch = 0 : i64, scratch_operands = 0 : i64, tpu.core_type = #tpu.core_type<tc>, window_params = [{transform_indices = @transform_0, window_bounds = array<i64: 1, 128, 128>}, {transform_indices = @transform_1, window_bounds = array<i64: 1, 128, 128>}, {transform_indices = @transform_2, window_bounds = array<i64: 1, 1, 128>}, {transform_indices = @transform_3, window_bounds = array<i64: 1, 1, 1>}]} {
    %c0 = arith.constant 0 : index
    %c0_0 = arith.constant 0 : index
    %c0_1 = arith.constant 0 : index
    %0 = vector.load %arg1[%c0, %c0_0, %c0_1] : memref<1x128x128xf32, #tpu.memory_space<vmem>>, vector<1x128x128xf32>
    %1 = vector.shape_cast %0 : vector<1x128x128xf32> to vector<128x128xf32>
    %c0_2 = arith.constant 0 : index
    %c0_3 = arith.constant 0 : index
    %c0_4 = arith.constant 0 : index
    %2 = vector.load %arg2[%c0_2, %c0_3, %c0_4] : memref<1x128x128xf32, #tpu.memory_space<vmem>>, vector<1x128x128xf32>
    %3 = vector.shape_cast %2 : vector<1x128x128xf32> to vector<128x128xf32>
    %c0_5 = arith.constant 0 : index
    %c0_6 = arith.constant 0 : index
    %c0_7 = arith.constant 0 : index
    %4 = vector.load %arg3[%c0_5, %c0_6, %c0_7] : memref<1x1x128xf32, #tpu.memory_space<vmem>>, vector<1x1x128xf32>
    %5 = vector.shape_cast %4 : vector<1x1x128xf32> to vector<1x128xf32>
    %cst = arith.constant dense<0.000000e+00> : vector<1x128xf32>
    %6 = tpu.matmul %5, %1, %cst {dimension_numbers = #tpu.dot_dimension_numbers<[1], [0], [0], [1], [0, 0, 1, 1], [], []>} : vector<1x128xf32>, vector<128x128xf32>, vector<1x128xf32> -> vector<1x128xf32>
    %cst_8 = arith.constant dense<0.000000e+00> : vector<1x128xf32>
    %7 = tpu.matmul %6, %3, %cst_8 {dimension_numbers = #tpu.dot_dimension_numbers<[1], [0], [0], [1], [0, 0, 1, 1], [], []>} : vector<1x128xf32>, vector<128x128xf32>, vector<1x128xf32> -> vector<1x128xf32>
    %8 = arith.subf %5, %7 : vector<1x128xf32>
    %cst_9 = arith.constant dense<0.000000e+00> : vector<1x128xf32>
    %9 = tpu.matmul %8, %1, %cst_9 {dimension_numbers = #tpu.dot_dimension_numbers<[1], [0], [0], [1], [0, 0, 1, 1], [], []>} : vector<1x128xf32>, vector<128x128xf32>, vector<1x128xf32> -> vector<1x128xf32>
    %10 = arith.mulf %8, %9 : vector<1x128xf32>
    %cst_10 = arith.constant dense<0.000000e+00> : vector<1xf32>
    %11 = vector.multi_reduction <add>, %10, %cst_10 [1] : vector<1x128xf32> to vector<1xf32>
    %12 = vector.shape_cast %11 : vector<1xf32> to vector<1x1xf32>
    %c0_i32 = arith.constant 0 : i32
    %cst_11 = arith.constant dense<0.000000e+00> : vector<1x128xf32>
    %13 = tpu.matmul %9, %3, %cst_11 {dimension_numbers = #tpu.dot_dimension_numbers<[1], [0], [0], [1], [0, 0, 1, 1], [], []>} : vector<1x128xf32>, vector<128x128xf32>, vector<1x128xf32> -> vector<1x128xf32>
    %14 = arith.mulf %9, %13 : vector<1x128xf32>
    %cst_12 = arith.constant dense<0.000000e+00> : vector<1xf32>
    %15 = vector.multi_reduction <add>, %14, %cst_12 [1] : vector<1x128xf32> to vector<1xf32>
    %16 = vector.shape_cast %15 : vector<1xf32> to vector<1x1xf32>
    %cst_13 = arith.constant 0.000000e+00 : f32
    %17 = vector.broadcast %cst_13 : f32 to vector<1x1xf32>
    %18 = arith.cmpf oeq, %16, %17 : vector<1x1xf32>
    %cst_14 = arith.constant 9.99999993E-9 : f32
    %19 = vector.broadcast %cst_14 : f32 to vector<1x1xf32>
    %20 = arith.select %18, %19, %16 : vector<1x1xi1>, vector<1x1xf32>
    %21 = tpu.reciprocal %20 {approx = true} : vector<1x1xf32> -> vector<1x1xf32>
    %22 = arith.mulf %12, %21 : vector<1x1xf32>
    %23 = vector.broadcast %22 : vector<1x1xf32> to vector<1x128xf32>
    %24 = arith.mulf %23, %9 : vector<1x128xf32>
    %25 = arith.addf %6, %24 : vector<1x128xf32>
    %26 = vector.broadcast %22 : vector<1x1xf32> to vector<1x128xf32>
    %27 = arith.mulf %26, %13 : vector<1x128xf32>
    %28 = arith.subf %8, %27 : vector<1x128xf32>
    %cst_15 = arith.constant dense<0.000000e+00> : vector<1x128xf32>
    %29 = tpu.matmul %28, %1, %cst_15 {dimension_numbers = #tpu.dot_dimension_numbers<[1], [0], [0], [1], [0, 0, 1, 1], [], []>} : vector<1x128xf32>, vector<128x128xf32>, vector<1x128xf32> -> vector<1x128xf32>
    %30 = arith.mulf %28, %29 : vector<1x128xf32>
    %cst_16 = arith.constant dense<0.000000e+00> : vector<1xf32>
    %31 = vector.multi_reduction <add>, %30, %cst_16 [1] : vector<1x128xf32> to vector<1xf32>
    %32 = vector.shape_cast %31 : vector<1xf32> to vector<1x1xf32>
    %cst_17 = arith.constant 0.000000e+00 : f32
    %33 = vector.broadcast %cst_17 : f32 to vector<1x1xf32>
    %34 = arith.cmpf oeq, %12, %33 : vector<1x1xf32>
    %cst_18 = arith.constant 9.99999993E-9 : f32
    %35 = vector.broadcast %cst_18 : f32 to vector<1x1xf32>
    %36 = arith.select %34, %35, %12 : vector<1x1xi1>, vector<1x1xf32>
    %37 = tpu.reciprocal %36 {approx = true} : vector<1x1xf32> -> vector<1x1xf32>
    %38 = arith.mulf %32, %37 : vector<1x1xf32>
    %39 = vector.broadcast %38 : vector<1x1xf32> to vector<1x128xf32>
    %40 = arith.mulf %39, %9 : vector<1x128xf32>
    %41 = arith.addf %29, %40 : vector<1x128xf32>
    %c1_i32 = arith.constant 1 : i32
    %cst_19 = arith.constant dense<0.000000e+00> : vector<1x128xf32>
    %42 = tpu.matmul %41, %3, %cst_19 {dimension_numbers = #tpu.dot_dimension_numbers<[1], [0], [0], [1], [0, 0, 1, 1], [], []>} : vector<1x128xf32>, vector<128x128xf32>, vector<1x128xf32> -> vector<1x128xf32>
    %43 = arith.mulf %41, %42 : vector<1x128xf32>
    %cst_20 = arith.constant dense<0.000000e+00> : vector<1xf32>
    %44 = vector.multi_reduction <add>, %43, %cst_20 [1] : vector<1x128xf32> to vector<1xf32>
    %45 = vector.shape_cast %44 : vector<1xf32> to vector<1x1xf32>
    %cst_21 = arith.constant 0.000000e+00 : f32
    %46 = vector.broadcast %cst_21 : f32 to vector<1x1xf32>
    %47 = arith.cmpf oeq, %45, %46 : vector<1x1xf32>
    %cst_22 = arith.constant 9.99999993E-9 : f32
    %48 = vector.broadcast %cst_22 : f32 to vector<1x1xf32>
    %49 = arith.select %47, %48, %45 : vector<1x1xi1>, vector<1x1xf32>
    %50 = tpu.reciprocal %49 {approx = true} : vector<1x1xf32> -> vector<1x1xf32>
    %51 = arith.mulf %32, %50 : vector<1x1xf32>
    %52 = vector.broadcast %51 : vector<1x1xf32> to vector<1x128xf32>
    %53 = arith.mulf %52, %41 : vector<1x128xf32>
    %54 = arith.addf %25, %53 : vector<1x128xf32>
    %55 = vector.broadcast %51 : vector<1x1xf32> to vector<1x128xf32>
    %56 = arith.mulf %55, %42 : vector<1x128xf32>
    %57 = arith.subf %28, %56 : vector<1x128xf32>
    %cst_23 = arith.constant dense<0.000000e+00> : vector<1x128xf32>
    %58 = tpu.matmul %57, %1, %cst_23 {dimension_numbers = #tpu.dot_dimension_numbers<[1], [0], [0], [1], [0, 0, 1, 1], [], []>} : vector<1x128xf32>, vector<128x128xf32>, vector<1x128xf32> -> vector<1x128xf32>
    %59 = arith.mulf %57, %58 : vector<1x128xf32>
    %cst_24 = arith.constant dense<0.000000e+00> : vector<1xf32>
    %60 = vector.multi_reduction <add>, %59, %cst_24 [1] : vector<1x128xf32> to vector<1xf32>
    %61 = vector.shape_cast %60 : vector<1xf32> to vector<1x1xf32>
    %cst_25 = arith.constant 0.000000e+00 : f32
    %62 = vector.broadcast %cst_25 : f32 to vector<1x1xf32>
    %63 = arith.cmpf oeq, %32, %62 : vector<1x1xf32>
    %cst_26 = arith.constant 9.99999993E-9 : f32
    %64 = vector.broadcast %cst_26 : f32 to vector<1x1xf32>
    %65 = arith.select %63, %64, %32 : vector<1x1xi1>, vector<1x1xf32>
    %66 = tpu.reciprocal %65 {approx = true} : vector<1x1xf32> -> vector<1x1xf32>
    %67 = arith.mulf %61, %66 : vector<1x1xf32>
    %68 = vector.broadcast %67 : vector<1x1xf32> to vector<1x128xf32>
    %69 = arith.mulf %68, %41 : vector<1x128xf32>
    %70 = arith.addf %58, %69 : vector<1x128xf32>
    %c2_i32 = arith.constant 2 : i32
    %cst_27 = arith.constant dense<0.000000e+00> : vector<1x128xf32>
    %71 = tpu.matmul %70, %3, %cst_27 {dimension_numbers = #tpu.dot_dimension_numbers<[1], [0], [0], [1], [0, 0, 1, 1], [], []>} : vector<1x128xf32>, vector<128x128xf32>, vector<1x128xf32> -> vector<1x128xf32>
    %72 = arith.mulf %70, %71 : vector<1x128xf32>
    %cst_28 = arith.constant dense<0.000000e+00> : vector<1xf32>
    %73 = vector.multi_reduction <add>, %72, %cst_28 [1] : vector<1x128xf32> to vector<1xf32>
    %74 = vector.shape_cast %73 : vector<1xf32> to vector<1x1xf32>
    %cst_29 = arith.constant 0.000000e+00 : f32
    %75 = vector.broadcast %cst_29 : f32 to vector<1x1xf32>
    %76 = arith.cmpf oeq, %74, %75 : vector<1x1xf32>
    %cst_30 = arith.constant 9.99999993E-9 : f32
    %77 = vector.broadcast %cst_30 : f32 to vector<1x1xf32>
    %78 = arith.select %76, %77, %74 : vector<1x1xi1>, vector<1x1xf32>
    %79 = tpu.reciprocal %78 {approx = true} : vector<1x1xf32> -> vector<1x1xf32>
    %80 = arith.mulf %61, %79 : vector<1x1xf32>
    %81 = vector.broadcast %80 : vector<1x1xf32> to vector<1x128xf32>
    %82 = arith.mulf %81, %70 : vector<1x128xf32>
    %83 = arith.addf %54, %82 : vector<1x128xf32>
    %84 = vector.broadcast %80 : vector<1x1xf32> to vector<1x128xf32>
    %85 = arith.mulf %84, %71 : vector<1x128xf32>
    %86 = arith.subf %57, %85 : vector<1x128xf32>
    %cst_31 = arith.constant dense<0.000000e+00> : vector<1x128xf32>
    %87 = tpu.matmul %86, %1, %cst_31 {dimension_numbers = #tpu.dot_dimension_numbers<[1], [0], [0], [1], [0, 0, 1, 1], [], []>} : vector<1x128xf32>, vector<128x128xf32>, vector<1x128xf32> -> vector<1x128xf32>
    %88 = arith.mulf %86, %87 : vector<1x128xf32>
    %cst_32 = arith.constant dense<0.000000e+00> : vector<1xf32>
    %89 = vector.multi_reduction <add>, %88, %cst_32 [1] : vector<1x128xf32> to vector<1xf32>
    %90 = vector.shape_cast %89 : vector<1xf32> to vector<1x1xf32>
    %cst_33 = arith.constant 0.000000e+00 : f32
    %91 = vector.broadcast %cst_33 : f32 to vector<1x1xf32>
    %92 = arith.cmpf oeq, %61, %91 : vector<1x1xf32>
    %cst_34 = arith.constant 9.99999993E-9 : f32
    %93 = vector.broadcast %cst_34 : f32 to vector<1x1xf32>
    %94 = arith.select %92, %93, %61 : vector<1x1xi1>, vector<1x1xf32>
    %95 = tpu.reciprocal %94 {approx = true} : vector<1x1xf32> -> vector<1x1xf32>
    %96 = arith.mulf %90, %95 : vector<1x1xf32>
    %97 = vector.broadcast %96 : vector<1x1xf32> to vector<1x128xf32>
    %98 = arith.mulf %97, %70 : vector<1x128xf32>
    %99 = arith.addf %87, %98 : vector<1x128xf32>
    %c3_i32 = arith.constant 3 : i32
    %cst_35 = arith.constant dense<0.000000e+00> : vector<1x128xf32>
    %100 = tpu.matmul %99, %3, %cst_35 {dimension_numbers = #tpu.dot_dimension_numbers<[1], [0], [0], [1], [0, 0, 1, 1], [], []>} : vector<1x128xf32>, vector<128x128xf32>, vector<1x128xf32> -> vector<1x128xf32>
    %101 = arith.mulf %99, %100 : vector<1x128xf32>
    %cst_36 = arith.constant dense<0.000000e+00> : vector<1xf32>
    %102 = vector.multi_reduction <add>, %101, %cst_36 [1] : vector<1x128xf32> to vector<1xf32>
    %103 = vector.shape_cast %102 : vector<1xf32> to vector<1x1xf32>
    %cst_37 = arith.constant 0.000000e+00 : f32
    %104 = vector.broadcast %cst_37 : f32 to vector<1x1xf32>
    %105 = arith.cmpf oeq, %103, %104 : vector<1x1xf32>
    %cst_38 = arith.constant 9.99999993E-9 : f32
    %106 = vector.broadcast %cst_38 : f32 to vector<1x1xf32>
    %107 = arith.select %105, %106, %103 : vector<1x1xi1>, vector<1x1xf32>
    %108 = tpu.reciprocal %107 {approx = true} : vector<1x1xf32> -> vector<1x1xf32>
    %109 = arith.mulf %90, %108 : vector<1x1xf32>
    %110 = vector.broadcast %109 : vector<1x1xf32> to vector<1x128xf32>
    %111 = arith.mulf %110, %99 : vector<1x128xf32>
    %112 = arith.addf %83, %111 : vector<1x128xf32>
    %113 = vector.broadcast %109 : vector<1x1xf32> to vector<1x128xf32>
    %114 = arith.mulf %113, %100 : vector<1x128xf32>
    %115 = arith.subf %86, %114 : vector<1x128xf32>
    %cst_39 = arith.constant dense<0.000000e+00> : vector<1x128xf32>
    %116 = tpu.matmul %115, %1, %cst_39 {dimension_numbers = #tpu.dot_dimension_numbers<[1], [0], [0], [1], [0, 0, 1, 1], [], []>} : vector<1x128xf32>, vector<128x128xf32>, vector<1x128xf32> -> vector<1x128xf32>
    %117 = arith.mulf %115, %116 : vector<1x128xf32>
    %cst_40 = arith.constant dense<0.000000e+00> : vector<1xf32>
    %118 = vector.multi_reduction <add>, %117, %cst_40 [1] : vector<1x128xf32> to vector<1xf32>
    %119 = vector.shape_cast %118 : vector<1xf32> to vector<1x1xf32>
    %cst_41 = arith.constant 0.000000e+00 : f32
    %120 = vector.broadcast %cst_41 : f32 to vector<1x1xf32>
    %121 = arith.cmpf oeq, %90, %120 : vector<1x1xf32>
    %cst_42 = arith.constant 9.99999993E-9 : f32
    %122 = vector.broadcast %cst_42 : f32 to vector<1x1xf32>
    %123 = arith.select %121, %122, %90 : vector<1x1xi1>, vector<1x1xf32>
    %124 = tpu.reciprocal %123 {approx = true} : vector<1x1xf32> -> vector<1x1xf32>
    %125 = arith.mulf %119, %124 : vector<1x1xf32>
    %126 = vector.broadcast %125 : vector<1x1xf32> to vector<1x128xf32>
    %127 = arith.mulf %126, %99 : vector<1x128xf32>
    %128 = arith.addf %116, %127 : vector<1x128xf32>
    %c4_i32 = arith.constant 4 : i32
    %cst_43 = arith.constant dense<0.000000e+00> : vector<1x128xf32>
    %129 = tpu.matmul %128, %3, %cst_43 {dimension_numbers = #tpu.dot_dimension_numbers<[1], [0], [0], [1], [0, 0, 1, 1], [], []>} : vector<1x128xf32>, vector<128x128xf32>, vector<1x128xf32> -> vector<1x128xf32>
    %130 = arith.mulf %128, %129 : vector<1x128xf32>
    %cst_44 = arith.constant dense<0.000000e+00> : vector<1xf32>
    %131 = vector.multi_reduction <add>, %130, %cst_44 [1] : vector<1x128xf32> to vector<1xf32>
    %132 = vector.shape_cast %131 : vector<1xf32> to vector<1x1xf32>
    %cst_45 = arith.constant 0.000000e+00 : f32
    %133 = vector.broadcast %cst_45 : f32 to vector<1x1xf32>
    %134 = arith.cmpf oeq, %132, %133 : vector<1x1xf32>
    %cst_46 = arith.constant 9.99999993E-9 : f32
    %135 = vector.broadcast %cst_46 : f32 to vector<1x1xf32>
    %136 = arith.select %134, %135, %132 : vector<1x1xi1>, vector<1x1xf32>
    %137 = tpu.reciprocal %136 {approx = true} : vector<1x1xf32> -> vector<1x1xf32>
    %138 = arith.mulf %119, %137 : vector<1x1xf32>
    %139 = vector.broadcast %138 : vector<1x1xf32> to vector<1x128xf32>
    %140 = arith.mulf %139, %128 : vector<1x128xf32>
    %141 = arith.addf %112, %140 : vector<1x128xf32>
    %142 = vector.broadcast %138 : vector<1x1xf32> to vector<1x128xf32>
    %143 = arith.mulf %142, %129 : vector<1x128xf32>
    %144 = arith.subf %115, %143 : vector<1x128xf32>
    %cst_47 = arith.constant dense<0.000000e+00> : vector<1x128xf32>
    %145 = tpu.matmul %144, %1, %cst_47 {dimension_numbers = #tpu.dot_dimension_numbers<[1], [0], [0], [1], [0, 0, 1, 1], [], []>} : vector<1x128xf32>, vector<128x128xf32>, vector<1x128xf32> -> vector<1x128xf32>
    %146 = arith.mulf %144, %145 : vector<1x128xf32>
    %cst_48 = arith.constant dense<0.000000e+00> : vector<1xf32>
    %147 = vector.multi_reduction <add>, %146, %cst_48 [1] : vector<1x128xf32> to vector<1xf32>
    %148 = vector.shape_cast %147 : vector<1xf32> to vector<1x1xf32>
    %cst_49 = arith.constant 0.000000e+00 : f32
    %149 = vector.broadcast %cst_49 : f32 to vector<1x1xf32>
    %150 = arith.cmpf oeq, %119, %149 : vector<1x1xf32>
    %cst_50 = arith.constant 9.99999993E-9 : f32
    %151 = vector.broadcast %cst_50 : f32 to vector<1x1xf32>
    %152 = arith.select %150, %151, %119 : vector<1x1xi1>, vector<1x1xf32>
    %153 = tpu.reciprocal %152 {approx = true} : vector<1x1xf32> -> vector<1x1xf32>
    %154 = arith.mulf %148, %153 : vector<1x1xf32>
    %155 = vector.broadcast %154 : vector<1x1xf32> to vector<1x128xf32>
    %156 = arith.mulf %155, %128 : vector<1x128xf32>
    %157 = arith.addf %145, %156 : vector<1x128xf32>
    %c5_i32 = arith.constant 5 : i32
    %cst_51 = arith.constant dense<0.000000e+00> : vector<1x128xf32>
    %158 = tpu.matmul %157, %3, %cst_51 {dimension_numbers = #tpu.dot_dimension_numbers<[1], [0], [0], [1], [0, 0, 1, 1], [], []>} : vector<1x128xf32>, vector<128x128xf32>, vector<1x128xf32> -> vector<1x128xf32>
    %159 = arith.mulf %157, %158 : vector<1x128xf32>
    %cst_52 = arith.constant dense<0.000000e+00> : vector<1xf32>
    %160 = vector.multi_reduction <add>, %159, %cst_52 [1] : vector<1x128xf32> to vector<1xf32>
    %161 = vector.shape_cast %160 : vector<1xf32> to vector<1x1xf32>
    %cst_53 = arith.constant 0.000000e+00 : f32
    %162 = vector.broadcast %cst_53 : f32 to vector<1x1xf32>
    %163 = arith.cmpf oeq, %161, %162 : vector<1x1xf32>
    %cst_54 = arith.constant 9.99999993E-9 : f32
    %164 = vector.broadcast %cst_54 : f32 to vector<1x1xf32>
    %165 = arith.select %163, %164, %161 : vector<1x1xi1>, vector<1x1xf32>
    %166 = tpu.reciprocal %165 {approx = true} : vector<1x1xf32> -> vector<1x1xf32>
    %167 = arith.mulf %148, %166 : vector<1x1xf32>
    %168 = vector.broadcast %167 : vector<1x1xf32> to vector<1x128xf32>
    %169 = arith.mulf %168, %157 : vector<1x128xf32>
    %170 = arith.addf %141, %169 : vector<1x128xf32>
    %171 = vector.broadcast %167 : vector<1x1xf32> to vector<1x128xf32>
    %172 = arith.mulf %171, %158 : vector<1x128xf32>
    %173 = arith.subf %144, %172 : vector<1x128xf32>
    %cst_55 = arith.constant dense<0.000000e+00> : vector<1x128xf32>
    %174 = tpu.matmul %173, %1, %cst_55 {dimension_numbers = #tpu.dot_dimension_numbers<[1], [0], [0], [1], [0, 0, 1, 1], [], []>} : vector<1x128xf32>, vector<128x128xf32>, vector<1x128xf32> -> vector<1x128xf32>
    %175 = arith.mulf %173, %174 : vector<1x128xf32>
    %cst_56 = arith.constant dense<0.000000e+00> : vector<1xf32>
    %176 = vector.multi_reduction <add>, %175, %cst_56 [1] : vector<1x128xf32> to vector<1xf32>
    %177 = vector.shape_cast %176 : vector<1xf32> to vector<1x1xf32>
    %cst_57 = arith.constant 0.000000e+00 : f32
    %178 = vector.broadcast %cst_57 : f32 to vector<1x1xf32>
    %179 = arith.cmpf oeq, %148, %178 : vector<1x1xf32>
    %cst_58 = arith.constant 9.99999993E-9 : f32
    %180 = vector.broadcast %cst_58 : f32 to vector<1x1xf32>
    %181 = arith.select %179, %180, %148 : vector<1x1xi1>, vector<1x1xf32>
    %182 = tpu.reciprocal %181 {approx = true} : vector<1x1xf32> -> vector<1x1xf32>
    %183 = arith.mulf %177, %182 : vector<1x1xf32>
    %184 = vector.broadcast %183 : vector<1x1xf32> to vector<1x128xf32>
    %185 = arith.mulf %184, %157 : vector<1x128xf32>
    %186 = arith.addf %174, %185 : vector<1x128xf32>
    %c6_i32 = arith.constant 6 : i32
    %cst_59 = arith.constant dense<0.000000e+00> : vector<1x128xf32>
    %187 = tpu.matmul %186, %3, %cst_59 {dimension_numbers = #tpu.dot_dimension_numbers<[1], [0], [0], [1], [0, 0, 1, 1], [], []>} : vector<1x128xf32>, vector<128x128xf32>, vector<1x128xf32> -> vector<1x128xf32>
    %188 = arith.mulf %186, %187 : vector<1x128xf32>
    %cst_60 = arith.constant dense<0.000000e+00> : vector<1xf32>
    %189 = vector.multi_reduction <add>, %188, %cst_60 [1] : vector<1x128xf32> to vector<1xf32>
    %190 = vector.shape_cast %189 : vector<1xf32> to vector<1x1xf32>
    %cst_61 = arith.constant 0.000000e+00 : f32
    %191 = vector.broadcast %cst_61 : f32 to vector<1x1xf32>
    %192 = arith.cmpf oeq, %190, %191 : vector<1x1xf32>
    %cst_62 = arith.constant 9.99999993E-9 : f32
    %193 = vector.broadcast %cst_62 : f32 to vector<1x1xf32>
    %194 = arith.select %192, %193, %190 : vector<1x1xi1>, vector<1x1xf32>
    %195 = tpu.reciprocal %194 {approx = true} : vector<1x1xf32> -> vector<1x1xf32>
    %196 = arith.mulf %177, %195 : vector<1x1xf32>
    %197 = vector.broadcast %196 : vector<1x1xf32> to vector<1x128xf32>
    %198 = arith.mulf %197, %186 : vector<1x128xf32>
    %199 = arith.addf %170, %198 : vector<1x128xf32>
    %200 = vector.broadcast %196 : vector<1x1xf32> to vector<1x128xf32>
    %201 = arith.mulf %200, %187 : vector<1x128xf32>
    %202 = arith.subf %173, %201 : vector<1x128xf32>
    %cst_63 = arith.constant dense<0.000000e+00> : vector<1x128xf32>
    %203 = tpu.matmul %202, %1, %cst_63 {dimension_numbers = #tpu.dot_dimension_numbers<[1], [0], [0], [1], [0, 0, 1, 1], [], []>} : vector<1x128xf32>, vector<128x128xf32>, vector<1x128xf32> -> vector<1x128xf32>
    %204 = arith.mulf %202, %203 : vector<1x128xf32>
    %cst_64 = arith.constant dense<0.000000e+00> : vector<1xf32>
    %205 = vector.multi_reduction <add>, %204, %cst_64 [1] : vector<1x128xf32> to vector<1xf32>
    %206 = vector.shape_cast %205 : vector<1xf32> to vector<1x1xf32>
    %cst_65 = arith.constant 0.000000e+00 : f32
    %207 = vector.broadcast %cst_65 : f32 to vector<1x1xf32>
    %208 = arith.cmpf oeq, %177, %207 : vector<1x1xf32>
    %cst_66 = arith.constant 9.99999993E-9 : f32
    %209 = vector.broadcast %cst_66 : f32 to vector<1x1xf32>
    %210 = arith.select %208, %209, %177 : vector<1x1xi1>, vector<1x1xf32>
    %211 = tpu.reciprocal %210 {approx = true} : vector<1x1xf32> -> vector<1x1xf32>
    %212 = arith.mulf %206, %211 : vector<1x1xf32>
    %213 = vector.broadcast %212 : vector<1x1xf32> to vector<1x128xf32>
    %214 = arith.mulf %213, %186 : vector<1x128xf32>
    %215 = arith.addf %203, %214 : vector<1x128xf32>
    %c7_i32 = arith.constant 7 : i32
    %cst_67 = arith.constant dense<0.000000e+00> : vector<1x128xf32>
    %216 = tpu.matmul %215, %3, %cst_67 {dimension_numbers = #tpu.dot_dimension_numbers<[1], [0], [0], [1], [0, 0, 1, 1], [], []>} : vector<1x128xf32>, vector<128x128xf32>, vector<1x128xf32> -> vector<1x128xf32>
    %217 = arith.mulf %215, %216 : vector<1x128xf32>
    %cst_68 = arith.constant dense<0.000000e+00> : vector<1xf32>
    %218 = vector.multi_reduction <add>, %217, %cst_68 [1] : vector<1x128xf32> to vector<1xf32>
    %219 = vector.shape_cast %218 : vector<1xf32> to vector<1x1xf32>
    %cst_69 = arith.constant 0.000000e+00 : f32
    %220 = vector.broadcast %cst_69 : f32 to vector<1x1xf32>
    %221 = arith.cmpf oeq, %219, %220 : vector<1x1xf32>
    %cst_70 = arith.constant 9.99999993E-9 : f32
    %222 = vector.broadcast %cst_70 : f32 to vector<1x1xf32>
    %223 = arith.select %221, %222, %219 : vector<1x1xi1>, vector<1x1xf32>
    %224 = tpu.reciprocal %223 {approx = true} : vector<1x1xf32> -> vector<1x1xf32>
    %225 = arith.mulf %206, %224 : vector<1x1xf32>
    %226 = vector.broadcast %225 : vector<1x1xf32> to vector<1x128xf32>
    %227 = arith.mulf %226, %215 : vector<1x128xf32>
    %228 = arith.addf %199, %227 : vector<1x128xf32>
    %229 = vector.broadcast %225 : vector<1x1xf32> to vector<1x128xf32>
    %230 = arith.mulf %229, %216 : vector<1x128xf32>
    %231 = arith.subf %202, %230 : vector<1x128xf32>
    %cst_71 = arith.constant dense<0.000000e+00> : vector<1x128xf32>
    %232 = tpu.matmul %231, %1, %cst_71 {dimension_numbers = #tpu.dot_dimension_numbers<[1], [0], [0], [1], [0, 0, 1, 1], [], []>} : vector<1x128xf32>, vector<128x128xf32>, vector<1x128xf32> -> vector<1x128xf32>
    %233 = arith.mulf %231, %232 : vector<1x128xf32>
    %cst_72 = arith.constant dense<0.000000e+00> : vector<1xf32>
    %234 = vector.multi_reduction <add>, %233, %cst_72 [1] : vector<1x128xf32> to vector<1xf32>
    %235 = vector.shape_cast %234 : vector<1xf32> to vector<1x1xf32>
    %cst_73 = arith.constant 0.000000e+00 : f32
    %236 = vector.broadcast %cst_73 : f32 to vector<1x1xf32>
    %237 = arith.cmpf oeq, %206, %236 : vector<1x1xf32>
    %cst_74 = arith.constant 9.99999993E-9 : f32
    %238 = vector.broadcast %cst_74 : f32 to vector<1x1xf32>
    %239 = arith.select %237, %238, %206 : vector<1x1xi1>, vector<1x1xf32>
    %240 = tpu.reciprocal %239 {approx = true} : vector<1x1xf32> -> vector<1x1xf32>
    %241 = arith.mulf %235, %240 : vector<1x1xf32>
    %242 = vector.broadcast %241 : vector<1x1xf32> to vector<1x128xf32>
    %243 = arith.mulf %242, %215 : vector<1x128xf32>
    %244 = arith.addf %232, %243 : vector<1x128xf32>
    %c8_i32 = arith.constant 8 : i32
    %cst_75 = arith.constant dense<0.000000e+00> : vector<1x128xf32>
    %245 = tpu.matmul %244, %3, %cst_75 {dimension_numbers = #tpu.dot_dimension_numbers<[1], [0], [0], [1], [0, 0, 1, 1], [], []>} : vector<1x128xf32>, vector<128x128xf32>, vector<1x128xf32> -> vector<1x128xf32>
    %246 = arith.mulf %244, %245 : vector<1x128xf32>
    %cst_76 = arith.constant dense<0.000000e+00> : vector<1xf32>
    %247 = vector.multi_reduction <add>, %246, %cst_76 [1] : vector<1x128xf32> to vector<1xf32>
    %248 = vector.shape_cast %247 : vector<1xf32> to vector<1x1xf32>
    %cst_77 = arith.constant 0.000000e+00 : f32
    %249 = vector.broadcast %cst_77 : f32 to vector<1x1xf32>
    %250 = arith.cmpf oeq, %248, %249 : vector<1x1xf32>
    %cst_78 = arith.constant 9.99999993E-9 : f32
    %251 = vector.broadcast %cst_78 : f32 to vector<1x1xf32>
    %252 = arith.select %250, %251, %248 : vector<1x1xi1>, vector<1x1xf32>
    %253 = tpu.reciprocal %252 {approx = true} : vector<1x1xf32> -> vector<1x1xf32>
    %254 = arith.mulf %235, %253 : vector<1x1xf32>
    %255 = vector.broadcast %254 : vector<1x1xf32> to vector<1x128xf32>
    %256 = arith.mulf %255, %244 : vector<1x128xf32>
    %257 = arith.addf %228, %256 : vector<1x128xf32>
    %258 = vector.broadcast %254 : vector<1x1xf32> to vector<1x128xf32>
    %259 = arith.mulf %258, %245 : vector<1x128xf32>
    %260 = arith.subf %231, %259 : vector<1x128xf32>
    %cst_79 = arith.constant dense<0.000000e+00> : vector<1x128xf32>
    %261 = tpu.matmul %260, %1, %cst_79 {dimension_numbers = #tpu.dot_dimension_numbers<[1], [0], [0], [1], [0, 0, 1, 1], [], []>} : vector<1x128xf32>, vector<128x128xf32>, vector<1x128xf32> -> vector<1x128xf32>
    %262 = arith.mulf %260, %261 : vector<1x128xf32>
    %cst_80 = arith.constant dense<0.000000e+00> : vector<1xf32>
    %263 = vector.multi_reduction <add>, %262, %cst_80 [1] : vector<1x128xf32> to vector<1xf32>
    %264 = vector.shape_cast %263 : vector<1xf32> to vector<1x1xf32>
    %cst_81 = arith.constant 0.000000e+00 : f32
    %265 = vector.broadcast %cst_81 : f32 to vector<1x1xf32>
    %266 = arith.cmpf oeq, %235, %265 : vector<1x1xf32>
    %cst_82 = arith.constant 9.99999993E-9 : f32
    %267 = vector.broadcast %cst_82 : f32 to vector<1x1xf32>
    %268 = arith.select %266, %267, %235 : vector<1x1xi1>, vector<1x1xf32>
    %269 = tpu.reciprocal %268 {approx = true} : vector<1x1xf32> -> vector<1x1xf32>
    %270 = arith.mulf %264, %269 : vector<1x1xf32>
    %271 = vector.broadcast %270 : vector<1x1xf32> to vector<1x128xf32>
    %272 = arith.mulf %271, %244 : vector<1x128xf32>
    %273 = arith.addf %261, %272 : vector<1x128xf32>
    %c9_i32 = arith.constant 9 : i32
    %cst_83 = arith.constant dense<0.000000e+00> : vector<1x128xf32>
    %274 = tpu.matmul %273, %3, %cst_83 {dimension_numbers = #tpu.dot_dimension_numbers<[1], [0], [0], [1], [0, 0, 1, 1], [], []>} : vector<1x128xf32>, vector<128x128xf32>, vector<1x128xf32> -> vector<1x128xf32>
    %275 = arith.mulf %273, %274 : vector<1x128xf32>
    %cst_84 = arith.constant dense<0.000000e+00> : vector<1xf32>
    %276 = vector.multi_reduction <add>, %275, %cst_84 [1] : vector<1x128xf32> to vector<1xf32>
    %277 = vector.shape_cast %276 : vector<1xf32> to vector<1x1xf32>
    %cst_85 = arith.constant 0.000000e+00 : f32
    %278 = vector.broadcast %cst_85 : f32 to vector<1x1xf32>
    %279 = arith.cmpf oeq, %277, %278 : vector<1x1xf32>
    %cst_86 = arith.constant 9.99999993E-9 : f32
    %280 = vector.broadcast %cst_86 : f32 to vector<1x1xf32>
    %281 = arith.select %279, %280, %277 : vector<1x1xi1>, vector<1x1xf32>
    %282 = tpu.reciprocal %281 {approx = true} : vector<1x1xf32> -> vector<1x1xf32>
    %283 = arith.mulf %264, %282 : vector<1x1xf32>
    %284 = vector.broadcast %283 : vector<1x1xf32> to vector<1x128xf32>
    %285 = arith.mulf %284, %273 : vector<1x128xf32>
    %286 = arith.addf %257, %285 : vector<1x128xf32>
    %287 = vector.broadcast %283 : vector<1x1xf32> to vector<1x128xf32>
    %288 = arith.mulf %287, %274 : vector<1x128xf32>
    %289 = arith.subf %260, %288 : vector<1x128xf32>
    %cst_87 = arith.constant dense<0.000000e+00> : vector<1x128xf32>
    %290 = tpu.matmul %289, %1, %cst_87 {dimension_numbers = #tpu.dot_dimension_numbers<[1], [0], [0], [1], [0, 0, 1, 1], [], []>} : vector<1x128xf32>, vector<128x128xf32>, vector<1x128xf32> -> vector<1x128xf32>
    %291 = arith.mulf %289, %290 : vector<1x128xf32>
    %cst_88 = arith.constant dense<0.000000e+00> : vector<1xf32>
    %292 = vector.multi_reduction <add>, %291, %cst_88 [1] : vector<1x128xf32> to vector<1xf32>
    %293 = vector.shape_cast %292 : vector<1xf32> to vector<1x1xf32>
    %cst_89 = arith.constant 0.000000e+00 : f32
    %294 = vector.broadcast %cst_89 : f32 to vector<1x1xf32>
    %295 = arith.cmpf oeq, %264, %294 : vector<1x1xf32>
    %cst_90 = arith.constant 9.99999993E-9 : f32
    %296 = vector.broadcast %cst_90 : f32 to vector<1x1xf32>
    %297 = arith.select %295, %296, %264 : vector<1x1xi1>, vector<1x1xf32>
    %298 = tpu.reciprocal %297 {approx = true} : vector<1x1xf32> -> vector<1x1xf32>
    %299 = arith.mulf %293, %298 : vector<1x1xf32>
    %300 = vector.broadcast %299 : vector<1x1xf32> to vector<1x128xf32>
    %301 = arith.mulf %300, %273 : vector<1x128xf32>
    %302 = arith.addf %290, %301 : vector<1x128xf32>
    %c10_i32 = arith.constant 10 : i32
    %cst_91 = arith.constant dense<0.000000e+00> : vector<1x128xf32>
    %303 = tpu.matmul %302, %3, %cst_91 {dimension_numbers = #tpu.dot_dimension_numbers<[1], [0], [0], [1], [0, 0, 1, 1], [], []>} : vector<1x128xf32>, vector<128x128xf32>, vector<1x128xf32> -> vector<1x128xf32>
    %304 = arith.mulf %302, %303 : vector<1x128xf32>
    %cst_92 = arith.constant dense<0.000000e+00> : vector<1xf32>
    %305 = vector.multi_reduction <add>, %304, %cst_92 [1] : vector<1x128xf32> to vector<1xf32>
    %306 = vector.shape_cast %305 : vector<1xf32> to vector<1x1xf32>
    %cst_93 = arith.constant 0.000000e+00 : f32
    %307 = vector.broadcast %cst_93 : f32 to vector<1x1xf32>
    %308 = arith.cmpf oeq, %306, %307 : vector<1x1xf32>
    %cst_94 = arith.constant 9.99999993E-9 : f32
    %309 = vector.broadcast %cst_94 : f32 to vector<1x1xf32>
    %310 = arith.select %308, %309, %306 : vector<1x1xi1>, vector<1x1xf32>
    %311 = tpu.reciprocal %310 {approx = true} : vector<1x1xf32> -> vector<1x1xf32>
    %312 = arith.mulf %293, %311 : vector<1x1xf32>
    %313 = vector.broadcast %312 : vector<1x1xf32> to vector<1x128xf32>
    %314 = arith.mulf %313, %302 : vector<1x128xf32>
    %315 = arith.addf %286, %314 : vector<1x128xf32>
    %316 = vector.broadcast %312 : vector<1x1xf32> to vector<1x128xf32>
    %317 = arith.mulf %316, %303 : vector<1x128xf32>
    %318 = arith.subf %289, %317 : vector<1x128xf32>
    %cst_95 = arith.constant dense<0.000000e+00> : vector<1x128xf32>
    %319 = tpu.matmul %318, %1, %cst_95 {dimension_numbers = #tpu.dot_dimension_numbers<[1], [0], [0], [1], [0, 0, 1, 1], [], []>} : vector<1x128xf32>, vector<128x128xf32>, vector<1x128xf32> -> vector<1x128xf32>
    %320 = arith.mulf %318, %319 : vector<1x128xf32>
    %cst_96 = arith.constant dense<0.000000e+00> : vector<1xf32>
    %321 = vector.multi_reduction <add>, %320, %cst_96 [1] : vector<1x128xf32> to vector<1xf32>
    %322 = vector.shape_cast %321 : vector<1xf32> to vector<1x1xf32>
    %cst_97 = arith.constant 0.000000e+00 : f32
    %323 = vector.broadcast %cst_97 : f32 to vector<1x1xf32>
    %324 = arith.cmpf oeq, %293, %323 : vector<1x1xf32>
    %cst_98 = arith.constant 9.99999993E-9 : f32
    %325 = vector.broadcast %cst_98 : f32 to vector<1x1xf32>
    %326 = arith.select %324, %325, %293 : vector<1x1xi1>, vector<1x1xf32>
    %327 = tpu.reciprocal %326 {approx = true} : vector<1x1xf32> -> vector<1x1xf32>
    %328 = arith.mulf %322, %327 : vector<1x1xf32>
    %329 = vector.broadcast %328 : vector<1x1xf32> to vector<1x128xf32>
    %330 = arith.mulf %329, %302 : vector<1x128xf32>
    %331 = arith.addf %319, %330 : vector<1x128xf32>
    %c11_i32 = arith.constant 11 : i32
    %cst_99 = arith.constant dense<0.000000e+00> : vector<1x128xf32>
    %332 = tpu.matmul %331, %3, %cst_99 {dimension_numbers = #tpu.dot_dimension_numbers<[1], [0], [0], [1], [0, 0, 1, 1], [], []>} : vector<1x128xf32>, vector<128x128xf32>, vector<1x128xf32> -> vector<1x128xf32>
    %333 = arith.mulf %331, %332 : vector<1x128xf32>
    %cst_100 = arith.constant dense<0.000000e+00> : vector<1xf32>
    %334 = vector.multi_reduction <add>, %333, %cst_100 [1] : vector<1x128xf32> to vector<1xf32>
    %335 = vector.shape_cast %334 : vector<1xf32> to vector<1x1xf32>
    %cst_101 = arith.constant 0.000000e+00 : f32
    %336 = vector.broadcast %cst_101 : f32 to vector<1x1xf32>
    %337 = arith.cmpf oeq, %335, %336 : vector<1x1xf32>
    %cst_102 = arith.constant 9.99999993E-9 : f32
    %338 = vector.broadcast %cst_102 : f32 to vector<1x1xf32>
    %339 = arith.select %337, %338, %335 : vector<1x1xi1>, vector<1x1xf32>
    %340 = tpu.reciprocal %339 {approx = true} : vector<1x1xf32> -> vector<1x1xf32>
    %341 = arith.mulf %322, %340 : vector<1x1xf32>
    %342 = vector.broadcast %341 : vector<1x1xf32> to vector<1x128xf32>
    %343 = arith.mulf %342, %331 : vector<1x128xf32>
    %344 = arith.addf %315, %343 : vector<1x128xf32>
    %345 = vector.broadcast %341 : vector<1x1xf32> to vector<1x128xf32>
    %346 = arith.mulf %345, %332 : vector<1x128xf32>
    %347 = arith.subf %318, %346 : vector<1x128xf32>
    %cst_103 = arith.constant dense<0.000000e+00> : vector<1x128xf32>
    %348 = tpu.matmul %347, %1, %cst_103 {dimension_numbers = #tpu.dot_dimension_numbers<[1], [0], [0], [1], [0, 0, 1, 1], [], []>} : vector<1x128xf32>, vector<128x128xf32>, vector<1x128xf32> -> vector<1x128xf32>
    %349 = arith.mulf %347, %348 : vector<1x128xf32>
    %cst_104 = arith.constant dense<0.000000e+00> : vector<1xf32>
    %350 = vector.multi_reduction <add>, %349, %cst_104 [1] : vector<1x128xf32> to vector<1xf32>
    %351 = vector.shape_cast %350 : vector<1xf32> to vector<1x1xf32>
    %cst_105 = arith.constant 0.000000e+00 : f32
    %352 = vector.broadcast %cst_105 : f32 to vector<1x1xf32>
    %353 = arith.cmpf oeq, %322, %352 : vector<1x1xf32>
    %cst_106 = arith.constant 9.99999993E-9 : f32
    %354 = vector.broadcast %cst_106 : f32 to vector<1x1xf32>
    %355 = arith.select %353, %354, %322 : vector<1x1xi1>, vector<1x1xf32>
    %356 = tpu.reciprocal %355 {approx = true} : vector<1x1xf32> -> vector<1x1xf32>
    %357 = arith.mulf %351, %356 : vector<1x1xf32>
    %358 = vector.broadcast %357 : vector<1x1xf32> to vector<1x128xf32>
    %359 = arith.mulf %358, %331 : vector<1x128xf32>
    %360 = arith.addf %348, %359 : vector<1x128xf32>
    %c12_i32 = arith.constant 12 : i32
    %cst_107 = arith.constant dense<0.000000e+00> : vector<1x128xf32>
    %361 = tpu.matmul %360, %3, %cst_107 {dimension_numbers = #tpu.dot_dimension_numbers<[1], [0], [0], [1], [0, 0, 1, 1], [], []>} : vector<1x128xf32>, vector<128x128xf32>, vector<1x128xf32> -> vector<1x128xf32>
    %362 = arith.mulf %360, %361 : vector<1x128xf32>
    %cst_108 = arith.constant dense<0.000000e+00> : vector<1xf32>
    %363 = vector.multi_reduction <add>, %362, %cst_108 [1] : vector<1x128xf32> to vector<1xf32>
    %364 = vector.shape_cast %363 : vector<1xf32> to vector<1x1xf32>
    %cst_109 = arith.constant 0.000000e+00 : f32
    %365 = vector.broadcast %cst_109 : f32 to vector<1x1xf32>
    %366 = arith.cmpf oeq, %364, %365 : vector<1x1xf32>
    %cst_110 = arith.constant 9.99999993E-9 : f32
    %367 = vector.broadcast %cst_110 : f32 to vector<1x1xf32>
    %368 = arith.select %366, %367, %364 : vector<1x1xi1>, vector<1x1xf32>
    %369 = tpu.reciprocal %368 {approx = true} : vector<1x1xf32> -> vector<1x1xf32>
    %370 = arith.mulf %351, %369 : vector<1x1xf32>
    %371 = vector.broadcast %370 : vector<1x1xf32> to vector<1x128xf32>
    %372 = arith.mulf %371, %360 : vector<1x128xf32>
    %373 = arith.addf %344, %372 : vector<1x128xf32>
    %374 = vector.broadcast %370 : vector<1x1xf32> to vector<1x128xf32>
    %375 = arith.mulf %374, %361 : vector<1x128xf32>
    %376 = arith.subf %347, %375 : vector<1x128xf32>
    %cst_111 = arith.constant dense<0.000000e+00> : vector<1x128xf32>
    %377 = tpu.matmul %376, %1, %cst_111 {dimension_numbers = #tpu.dot_dimension_numbers<[1], [0], [0], [1], [0, 0, 1, 1], [], []>} : vector<1x128xf32>, vector<128x128xf32>, vector<1x128xf32> -> vector<1x128xf32>
    %378 = arith.mulf %376, %377 : vector<1x128xf32>
    %cst_112 = arith.constant dense<0.000000e+00> : vector<1xf32>
    %379 = vector.multi_reduction <add>, %378, %cst_112 [1] : vector<1x128xf32> to vector<1xf32>
    %380 = vector.shape_cast %379 : vector<1xf32> to vector<1x1xf32>
    %cst_113 = arith.constant 0.000000e+00 : f32
    %381 = vector.broadcast %cst_113 : f32 to vector<1x1xf32>
    %382 = arith.cmpf oeq, %351, %381 : vector<1x1xf32>
    %cst_114 = arith.constant 9.99999993E-9 : f32
    %383 = vector.broadcast %cst_114 : f32 to vector<1x1xf32>
    %384 = arith.select %382, %383, %351 : vector<1x1xi1>, vector<1x1xf32>
    %385 = tpu.reciprocal %384 {approx = true} : vector<1x1xf32> -> vector<1x1xf32>
    %386 = arith.mulf %380, %385 : vector<1x1xf32>
    %387 = vector.broadcast %386 : vector<1x1xf32> to vector<1x128xf32>
    %388 = arith.mulf %387, %360 : vector<1x128xf32>
    %389 = arith.addf %377, %388 : vector<1x128xf32>
    %c13_i32 = arith.constant 13 : i32
    %cst_115 = arith.constant dense<0.000000e+00> : vector<1x128xf32>
    %390 = tpu.matmul %389, %3, %cst_115 {dimension_numbers = #tpu.dot_dimension_numbers<[1], [0], [0], [1], [0, 0, 1, 1], [], []>} : vector<1x128xf32>, vector<128x128xf32>, vector<1x128xf32> -> vector<1x128xf32>
    %391 = arith.mulf %389, %390 : vector<1x128xf32>
    %cst_116 = arith.constant dense<0.000000e+00> : vector<1xf32>
    %392 = vector.multi_reduction <add>, %391, %cst_116 [1] : vector<1x128xf32> to vector<1xf32>
    %393 = vector.shape_cast %392 : vector<1xf32> to vector<1x1xf32>
    %cst_117 = arith.constant 0.000000e+00 : f32
    %394 = vector.broadcast %cst_117 : f32 to vector<1x1xf32>
    %395 = arith.cmpf oeq, %393, %394 : vector<1x1xf32>
    %cst_118 = arith.constant 9.99999993E-9 : f32
    %396 = vector.broadcast %cst_118 : f32 to vector<1x1xf32>
    %397 = arith.select %395, %396, %393 : vector<1x1xi1>, vector<1x1xf32>
    %398 = tpu.reciprocal %397 {approx = true} : vector<1x1xf32> -> vector<1x1xf32>
    %399 = arith.mulf %380, %398 : vector<1x1xf32>
    %400 = vector.broadcast %399 : vector<1x1xf32> to vector<1x128xf32>
    %401 = arith.mulf %400, %389 : vector<1x128xf32>
    %402 = arith.addf %373, %401 : vector<1x128xf32>
    %403 = vector.broadcast %399 : vector<1x1xf32> to vector<1x128xf32>
    %404 = arith.mulf %403, %390 : vector<1x128xf32>
    %405 = arith.subf %376, %404 : vector<1x128xf32>
    %cst_119 = arith.constant dense<0.000000e+00> : vector<1x128xf32>
    %406 = tpu.matmul %405, %1, %cst_119 {dimension_numbers = #tpu.dot_dimension_numbers<[1], [0], [0], [1], [0, 0, 1, 1], [], []>} : vector<1x128xf32>, vector<128x128xf32>, vector<1x128xf32> -> vector<1x128xf32>
    %407 = arith.mulf %405, %406 : vector<1x128xf32>
    %cst_120 = arith.constant dense<0.000000e+00> : vector<1xf32>
    %408 = vector.multi_reduction <add>, %407, %cst_120 [1] : vector<1x128xf32> to vector<1xf32>
    %409 = vector.shape_cast %408 : vector<1xf32> to vector<1x1xf32>
    %cst_121 = arith.constant 0.000000e+00 : f32
    %410 = vector.broadcast %cst_121 : f32 to vector<1x1xf32>
    %411 = arith.cmpf oeq, %380, %410 : vector<1x1xf32>
    %cst_122 = arith.constant 9.99999993E-9 : f32
    %412 = vector.broadcast %cst_122 : f32 to vector<1x1xf32>
    %413 = arith.select %411, %412, %380 : vector<1x1xi1>, vector<1x1xf32>
    %414 = tpu.reciprocal %413 {approx = true} : vector<1x1xf32> -> vector<1x1xf32>
    %415 = arith.mulf %409, %414 : vector<1x1xf32>
    %416 = vector.broadcast %415 : vector<1x1xf32> to vector<1x128xf32>
    %417 = arith.mulf %416, %389 : vector<1x128xf32>
    %418 = arith.addf %406, %417 : vector<1x128xf32>
    %c14_i32 = arith.constant 14 : i32
    %cst_123 = arith.constant dense<0.000000e+00> : vector<1x128xf32>
    %419 = tpu.matmul %418, %3, %cst_123 {dimension_numbers = #tpu.dot_dimension_numbers<[1], [0], [0], [1], [0, 0, 1, 1], [], []>} : vector<1x128xf32>, vector<128x128xf32>, vector<1x128xf32> -> vector<1x128xf32>
    %420 = arith.mulf %418, %419 : vector<1x128xf32>
    %cst_124 = arith.constant dense<0.000000e+00> : vector<1xf32>
    %421 = vector.multi_reduction <add>, %420, %cst_124 [1] : vector<1x128xf32> to vector<1xf32>
    %422 = vector.shape_cast %421 : vector<1xf32> to vector<1x1xf32>
    %cst_125 = arith.constant 0.000000e+00 : f32
    %423 = vector.broadcast %cst_125 : f32 to vector<1x1xf32>
    %424 = arith.cmpf oeq, %422, %423 : vector<1x1xf32>
    %cst_126 = arith.constant 9.99999993E-9 : f32
    %425 = vector.broadcast %cst_126 : f32 to vector<1x1xf32>
    %426 = arith.select %424, %425, %422 : vector<1x1xi1>, vector<1x1xf32>
    %427 = tpu.reciprocal %426 {approx = true} : vector<1x1xf32> -> vector<1x1xf32>
    %428 = arith.mulf %409, %427 : vector<1x1xf32>
    %429 = vector.broadcast %428 : vector<1x1xf32> to vector<1x128xf32>
    %430 = arith.mulf %429, %418 : vector<1x128xf32>
    %431 = arith.addf %402, %430 : vector<1x128xf32>
    %432 = vector.broadcast %428 : vector<1x1xf32> to vector<1x128xf32>
    %433 = arith.mulf %432, %419 : vector<1x128xf32>
    %434 = arith.subf %405, %433 : vector<1x128xf32>
    %cst_127 = arith.constant dense<0.000000e+00> : vector<1x128xf32>
    %435 = tpu.matmul %434, %1, %cst_127 {dimension_numbers = #tpu.dot_dimension_numbers<[1], [0], [0], [1], [0, 0, 1, 1], [], []>} : vector<1x128xf32>, vector<128x128xf32>, vector<1x128xf32> -> vector<1x128xf32>
    %436 = arith.mulf %434, %435 : vector<1x128xf32>
    %cst_128 = arith.constant dense<0.000000e+00> : vector<1xf32>
    %437 = vector.multi_reduction <add>, %436, %cst_128 [1] : vector<1x128xf32> to vector<1xf32>
    %438 = vector.shape_cast %437 : vector<1xf32> to vector<1x1xf32>
    %cst_129 = arith.constant 0.000000e+00 : f32
    %439 = vector.broadcast %cst_129 : f32 to vector<1x1xf32>
    %440 = arith.cmpf oeq, %409, %439 : vector<1x1xf32>
    %cst_130 = arith.constant 9.99999993E-9 : f32
    %441 = vector.broadcast %cst_130 : f32 to vector<1x1xf32>
    %442 = arith.select %440, %441, %409 : vector<1x1xi1>, vector<1x1xf32>
    %443 = tpu.reciprocal %442 {approx = true} : vector<1x1xf32> -> vector<1x1xf32>
    %444 = arith.mulf %438, %443 : vector<1x1xf32>
    %445 = vector.broadcast %444 : vector<1x1xf32> to vector<1x128xf32>
    %446 = arith.mulf %445, %418 : vector<1x128xf32>
    %447 = arith.addf %435, %446 : vector<1x128xf32>
    %c15_i32 = arith.constant 15 : i32
    %cst_131 = arith.constant dense<0.000000e+00> : vector<1x128xf32>
    %448 = tpu.matmul %447, %3, %cst_131 {dimension_numbers = #tpu.dot_dimension_numbers<[1], [0], [0], [1], [0, 0, 1, 1], [], []>} : vector<1x128xf32>, vector<128x128xf32>, vector<1x128xf32> -> vector<1x128xf32>
    %449 = arith.mulf %447, %448 : vector<1x128xf32>
    %cst_132 = arith.constant dense<0.000000e+00> : vector<1xf32>
    %450 = vector.multi_reduction <add>, %449, %cst_132 [1] : vector<1x128xf32> to vector<1xf32>
    %451 = vector.shape_cast %450 : vector<1xf32> to vector<1x1xf32>
    %cst_133 = arith.constant 0.000000e+00 : f32
    %452 = vector.broadcast %cst_133 : f32 to vector<1x1xf32>
    %453 = arith.cmpf oeq, %451, %452 : vector<1x1xf32>
    %cst_134 = arith.constant 9.99999993E-9 : f32
    %454 = vector.broadcast %cst_134 : f32 to vector<1x1xf32>
    %455 = arith.select %453, %454, %451 : vector<1x1xi1>, vector<1x1xf32>
    %456 = tpu.reciprocal %455 {approx = true} : vector<1x1xf32> -> vector<1x1xf32>
    %457 = arith.mulf %438, %456 : vector<1x1xf32>
    %458 = vector.broadcast %457 : vector<1x1xf32> to vector<1x128xf32>
    %459 = arith.mulf %458, %447 : vector<1x128xf32>
    %460 = arith.addf %431, %459 : vector<1x128xf32>
    %461 = vector.broadcast %457 : vector<1x1xf32> to vector<1x128xf32>
    %462 = arith.mulf %461, %448 : vector<1x128xf32>
    %463 = arith.subf %434, %462 : vector<1x128xf32>
    %cst_135 = arith.constant dense<0.000000e+00> : vector<1x128xf32>
    %464 = tpu.matmul %463, %1, %cst_135 {dimension_numbers = #tpu.dot_dimension_numbers<[1], [0], [0], [1], [0, 0, 1, 1], [], []>} : vector<1x128xf32>, vector<128x128xf32>, vector<1x128xf32> -> vector<1x128xf32>
    %465 = arith.mulf %463, %464 : vector<1x128xf32>
    %cst_136 = arith.constant dense<0.000000e+00> : vector<1xf32>
    %466 = vector.multi_reduction <add>, %465, %cst_136 [1] : vector<1x128xf32> to vector<1xf32>
    %467 = vector.shape_cast %466 : vector<1xf32> to vector<1x1xf32>
    %cst_137 = arith.constant 0.000000e+00 : f32
    %468 = vector.broadcast %cst_137 : f32 to vector<1x1xf32>
    %469 = arith.cmpf oeq, %438, %468 : vector<1x1xf32>
    %cst_138 = arith.constant 9.99999993E-9 : f32
    %470 = vector.broadcast %cst_138 : f32 to vector<1x1xf32>
    %471 = arith.select %469, %470, %438 : vector<1x1xi1>, vector<1x1xf32>
    %472 = tpu.reciprocal %471 {approx = true} : vector<1x1xf32> -> vector<1x1xf32>
    %473 = arith.mulf %467, %472 : vector<1x1xf32>
    %474 = vector.broadcast %473 : vector<1x1xf32> to vector<1x128xf32>
    %475 = arith.mulf %474, %447 : vector<1x128xf32>
    %476 = arith.addf %464, %475 : vector<1x128xf32>
    %c16_i32 = arith.constant 16 : i32
    %cst_139 = arith.constant dense<0.000000e+00> : vector<1x128xf32>
    %477 = tpu.matmul %476, %3, %cst_139 {dimension_numbers = #tpu.dot_dimension_numbers<[1], [0], [0], [1], [0, 0, 1, 1], [], []>} : vector<1x128xf32>, vector<128x128xf32>, vector<1x128xf32> -> vector<1x128xf32>
    %478 = arith.mulf %476, %477 : vector<1x128xf32>
    %cst_140 = arith.constant dense<0.000000e+00> : vector<1xf32>
    %479 = vector.multi_reduction <add>, %478, %cst_140 [1] : vector<1x128xf32> to vector<1xf32>
    %480 = vector.shape_cast %479 : vector<1xf32> to vector<1x1xf32>
    %cst_141 = arith.constant 0.000000e+00 : f32
    %481 = vector.broadcast %cst_141 : f32 to vector<1x1xf32>
    %482 = arith.cmpf oeq, %480, %481 : vector<1x1xf32>
    %cst_142 = arith.constant 9.99999993E-9 : f32
    %483 = vector.broadcast %cst_142 : f32 to vector<1x1xf32>
    %484 = arith.select %482, %483, %480 : vector<1x1xi1>, vector<1x1xf32>
    %485 = tpu.reciprocal %484 {approx = true} : vector<1x1xf32> -> vector<1x1xf32>
    %486 = arith.mulf %467, %485 : vector<1x1xf32>
    %487 = vector.broadcast %486 : vector<1x1xf32> to vector<1x128xf32>
    %488 = arith.mulf %487, %476 : vector<1x128xf32>
    %489 = arith.addf %460, %488 : vector<1x128xf32>
    %490 = vector.broadcast %486 : vector<1x1xf32> to vector<1x128xf32>
    %491 = arith.mulf %490, %477 : vector<1x128xf32>
    %492 = arith.subf %463, %491 : vector<1x128xf32>
    %cst_143 = arith.constant dense<0.000000e+00> : vector<1x128xf32>
    %493 = tpu.matmul %492, %1, %cst_143 {dimension_numbers = #tpu.dot_dimension_numbers<[1], [0], [0], [1], [0, 0, 1, 1], [], []>} : vector<1x128xf32>, vector<128x128xf32>, vector<1x128xf32> -> vector<1x128xf32>
    %494 = arith.mulf %492, %493 : vector<1x128xf32>
    %cst_144 = arith.constant dense<0.000000e+00> : vector<1xf32>
    %495 = vector.multi_reduction <add>, %494, %cst_144 [1] : vector<1x128xf32> to vector<1xf32>
    %496 = vector.shape_cast %495 : vector<1xf32> to vector<1x1xf32>
    %cst_145 = arith.constant 0.000000e+00 : f32
    %497 = vector.broadcast %cst_145 : f32 to vector<1x1xf32>
    %498 = arith.cmpf oeq, %467, %497 : vector<1x1xf32>
    %cst_146 = arith.constant 9.99999993E-9 : f32
    %499 = vector.broadcast %cst_146 : f32 to vector<1x1xf32>
    %500 = arith.select %498, %499, %467 : vector<1x1xi1>, vector<1x1xf32>
    %501 = tpu.reciprocal %500 {approx = true} : vector<1x1xf32> -> vector<1x1xf32>
    %502 = arith.mulf %496, %501 : vector<1x1xf32>
    %503 = vector.broadcast %502 : vector<1x1xf32> to vector<1x128xf32>
    %504 = arith.mulf %503, %476 : vector<1x128xf32>
    %505 = arith.addf %493, %504 : vector<1x128xf32>
    %c17_i32 = arith.constant 17 : i32
    %cst_147 = arith.constant dense<0.000000e+00> : vector<1x128xf32>
    %506 = tpu.matmul %505, %3, %cst_147 {dimension_numbers = #tpu.dot_dimension_numbers<[1], [0], [0], [1], [0, 0, 1, 1], [], []>} : vector<1x128xf32>, vector<128x128xf32>, vector<1x128xf32> -> vector<1x128xf32>
    %507 = arith.mulf %505, %506 : vector<1x128xf32>
    %cst_148 = arith.constant dense<0.000000e+00> : vector<1xf32>
    %508 = vector.multi_reduction <add>, %507, %cst_148 [1] : vector<1x128xf32> to vector<1xf32>
    %509 = vector.shape_cast %508 : vector<1xf32> to vector<1x1xf32>
    %cst_149 = arith.constant 0.000000e+00 : f32
    %510 = vector.broadcast %cst_149 : f32 to vector<1x1xf32>
    %511 = arith.cmpf oeq, %509, %510 : vector<1x1xf32>
    %cst_150 = arith.constant 9.99999993E-9 : f32
    %512 = vector.broadcast %cst_150 : f32 to vector<1x1xf32>
    %513 = arith.select %511, %512, %509 : vector<1x1xi1>, vector<1x1xf32>
    %514 = tpu.reciprocal %513 {approx = true} : vector<1x1xf32> -> vector<1x1xf32>
    %515 = arith.mulf %496, %514 : vector<1x1xf32>
    %516 = vector.broadcast %515 : vector<1x1xf32> to vector<1x128xf32>
    %517 = arith.mulf %516, %505 : vector<1x128xf32>
    %518 = arith.addf %489, %517 : vector<1x128xf32>
    %519 = vector.broadcast %515 : vector<1x1xf32> to vector<1x128xf32>
    %520 = arith.mulf %519, %506 : vector<1x128xf32>
    %521 = arith.subf %492, %520 : vector<1x128xf32>
    %cst_151 = arith.constant dense<0.000000e+00> : vector<1x128xf32>
    %522 = tpu.matmul %521, %1, %cst_151 {dimension_numbers = #tpu.dot_dimension_numbers<[1], [0], [0], [1], [0, 0, 1, 1], [], []>} : vector<1x128xf32>, vector<128x128xf32>, vector<1x128xf32> -> vector<1x128xf32>
    %523 = arith.mulf %521, %522 : vector<1x128xf32>
    %cst_152 = arith.constant dense<0.000000e+00> : vector<1xf32>
    %524 = vector.multi_reduction <add>, %523, %cst_152 [1] : vector<1x128xf32> to vector<1xf32>
    %525 = vector.shape_cast %524 : vector<1xf32> to vector<1x1xf32>
    %cst_153 = arith.constant 0.000000e+00 : f32
    %526 = vector.broadcast %cst_153 : f32 to vector<1x1xf32>
    %527 = arith.cmpf oeq, %496, %526 : vector<1x1xf32>
    %cst_154 = arith.constant 9.99999993E-9 : f32
    %528 = vector.broadcast %cst_154 : f32 to vector<1x1xf32>
    %529 = arith.select %527, %528, %496 : vector<1x1xi1>, vector<1x1xf32>
    %530 = tpu.reciprocal %529 {approx = true} : vector<1x1xf32> -> vector<1x1xf32>
    %531 = arith.mulf %525, %530 : vector<1x1xf32>
    %532 = vector.broadcast %531 : vector<1x1xf32> to vector<1x128xf32>
    %533 = arith.mulf %532, %505 : vector<1x128xf32>
    %534 = arith.addf %522, %533 : vector<1x128xf32>
    %c18_i32 = arith.constant 18 : i32
    %cst_155 = arith.constant dense<0.000000e+00> : vector<1x128xf32>
    %535 = tpu.matmul %534, %3, %cst_155 {dimension_numbers = #tpu.dot_dimension_numbers<[1], [0], [0], [1], [0, 0, 1, 1], [], []>} : vector<1x128xf32>, vector<128x128xf32>, vector<1x128xf32> -> vector<1x128xf32>
    %536 = arith.mulf %534, %535 : vector<1x128xf32>
    %cst_156 = arith.constant dense<0.000000e+00> : vector<1xf32>
    %537 = vector.multi_reduction <add>, %536, %cst_156 [1] : vector<1x128xf32> to vector<1xf32>
    %538 = vector.shape_cast %537 : vector<1xf32> to vector<1x1xf32>
    %cst_157 = arith.constant 0.000000e+00 : f32
    %539 = vector.broadcast %cst_157 : f32 to vector<1x1xf32>
    %540 = arith.cmpf oeq, %538, %539 : vector<1x1xf32>
    %cst_158 = arith.constant 9.99999993E-9 : f32
    %541 = vector.broadcast %cst_158 : f32 to vector<1x1xf32>
    %542 = arith.select %540, %541, %538 : vector<1x1xi1>, vector<1x1xf32>
    %543 = tpu.reciprocal %542 {approx = true} : vector<1x1xf32> -> vector<1x1xf32>
    %544 = arith.mulf %525, %543 : vector<1x1xf32>
    %545 = vector.broadcast %544 : vector<1x1xf32> to vector<1x128xf32>
    %546 = arith.mulf %545, %534 : vector<1x128xf32>
    %547 = arith.addf %518, %546 : vector<1x128xf32>
    %548 = vector.broadcast %544 : vector<1x1xf32> to vector<1x128xf32>
    %549 = arith.mulf %548, %535 : vector<1x128xf32>
    %550 = arith.subf %521, %549 : vector<1x128xf32>
    %cst_159 = arith.constant dense<0.000000e+00> : vector<1x128xf32>
    %551 = tpu.matmul %550, %1, %cst_159 {dimension_numbers = #tpu.dot_dimension_numbers<[1], [0], [0], [1], [0, 0, 1, 1], [], []>} : vector<1x128xf32>, vector<128x128xf32>, vector<1x128xf32> -> vector<1x128xf32>
    %552 = arith.mulf %550, %551 : vector<1x128xf32>
    %cst_160 = arith.constant dense<0.000000e+00> : vector<1xf32>
    %553 = vector.multi_reduction <add>, %552, %cst_160 [1] : vector<1x128xf32> to vector<1xf32>
    %554 = vector.shape_cast %553 : vector<1xf32> to vector<1x1xf32>
    %cst_161 = arith.constant 0.000000e+00 : f32
    %555 = vector.broadcast %cst_161 : f32 to vector<1x1xf32>
    %556 = arith.cmpf oeq, %525, %555 : vector<1x1xf32>
    %cst_162 = arith.constant 9.99999993E-9 : f32
    %557 = vector.broadcast %cst_162 : f32 to vector<1x1xf32>
    %558 = arith.select %556, %557, %525 : vector<1x1xi1>, vector<1x1xf32>
    %559 = tpu.reciprocal %558 {approx = true} : vector<1x1xf32> -> vector<1x1xf32>
    %560 = arith.mulf %554, %559 : vector<1x1xf32>
    %561 = vector.broadcast %560 : vector<1x1xf32> to vector<1x128xf32>
    %562 = arith.mulf %561, %534 : vector<1x128xf32>
    %563 = arith.addf %551, %562 : vector<1x128xf32>
    %c19_i32 = arith.constant 19 : i32
    %cst_163 = arith.constant dense<0.000000e+00> : vector<1x128xf32>
    %564 = tpu.matmul %563, %3, %cst_163 {dimension_numbers = #tpu.dot_dimension_numbers<[1], [0], [0], [1], [0, 0, 1, 1], [], []>} : vector<1x128xf32>, vector<128x128xf32>, vector<1x128xf32> -> vector<1x128xf32>
    %565 = arith.mulf %563, %564 : vector<1x128xf32>
    %cst_164 = arith.constant dense<0.000000e+00> : vector<1xf32>
    %566 = vector.multi_reduction <add>, %565, %cst_164 [1] : vector<1x128xf32> to vector<1xf32>
    %567 = vector.shape_cast %566 : vector<1xf32> to vector<1x1xf32>
    %cst_165 = arith.constant 0.000000e+00 : f32
    %568 = vector.broadcast %cst_165 : f32 to vector<1x1xf32>
    %569 = arith.cmpf oeq, %567, %568 : vector<1x1xf32>
    %cst_166 = arith.constant 9.99999993E-9 : f32
    %570 = vector.broadcast %cst_166 : f32 to vector<1x1xf32>
    %571 = arith.select %569, %570, %567 : vector<1x1xi1>, vector<1x1xf32>
    %572 = tpu.reciprocal %571 {approx = true} : vector<1x1xf32> -> vector<1x1xf32>
    %573 = arith.mulf %554, %572 : vector<1x1xf32>
    %574 = vector.broadcast %573 : vector<1x1xf32> to vector<1x128xf32>
    %575 = arith.mulf %574, %563 : vector<1x128xf32>
    %576 = arith.addf %547, %575 : vector<1x128xf32>
    %577 = vector.broadcast %573 : vector<1x1xf32> to vector<1x128xf32>
    %578 = arith.mulf %577, %564 : vector<1x128xf32>
    %579 = arith.subf %550, %578 : vector<1x128xf32>
    %cst_167 = arith.constant dense<0.000000e+00> : vector<1x128xf32>
    %580 = tpu.matmul %579, %1, %cst_167 {dimension_numbers = #tpu.dot_dimension_numbers<[1], [0], [0], [1], [0, 0, 1, 1], [], []>} : vector<1x128xf32>, vector<128x128xf32>, vector<1x128xf32> -> vector<1x128xf32>
    %581 = arith.mulf %579, %580 : vector<1x128xf32>
    %cst_168 = arith.constant dense<0.000000e+00> : vector<1xf32>
    %582 = vector.multi_reduction <add>, %581, %cst_168 [1] : vector<1x128xf32> to vector<1xf32>
    %583 = vector.shape_cast %582 : vector<1xf32> to vector<1x1xf32>
    %cst_169 = arith.constant 0.000000e+00 : f32
    %584 = vector.broadcast %cst_169 : f32 to vector<1x1xf32>
    %585 = arith.cmpf oeq, %554, %584 : vector<1x1xf32>
    %cst_170 = arith.constant 9.99999993E-9 : f32
    %586 = vector.broadcast %cst_170 : f32 to vector<1x1xf32>
    %587 = arith.select %585, %586, %554 : vector<1x1xi1>, vector<1x1xf32>
    %588 = tpu.reciprocal %587 {approx = true} : vector<1x1xf32> -> vector<1x1xf32>
    %589 = arith.mulf %583, %588 : vector<1x1xf32>
    %590 = vector.broadcast %589 : vector<1x1xf32> to vector<1x128xf32>
    %591 = arith.mulf %590, %563 : vector<1x128xf32>
    %592 = arith.addf %580, %591 : vector<1x128xf32>
    %cst_171 = arith.constant dense<0.000000e+00> : vector<1x128xf32>
    %593 = tpu.matmul %576, %3, %cst_171 {dimension_numbers = #tpu.dot_dimension_numbers<[1], [0], [0], [1], [0, 0, 1, 1], [], []>} : vector<1x128xf32>, vector<128x128xf32>, vector<1x128xf32> -> vector<1x128xf32>
    %594 = arith.subf %593, %5 : vector<1x128xf32>
    %595 = arith.mulf %594, %594 : vector<1x128xf32>
    %cst_172 = arith.constant dense<0.000000e+00> : vector<1xf32>
    %596 = vector.multi_reduction <add>, %595, %cst_172 [1] : vector<1x128xf32> to vector<1xf32>
    %597 = vector.shape_cast %596 : vector<1xf32> to vector<1x1xf32>
    %598 = math.sqrt %597 : vector<1x1xf32>
    %599 = vector.shape_cast %598 : vector<1x1xf32> to vector<1x1x1xf32>
    %c0_173 = arith.constant 0 : index
    %c0_174 = arith.constant 0 : index
    %c0_175 = arith.constant 0 : index
    %600 = vector.load %arg4[%c0_173, %c0_174, %c0_175] : memref<1x1x1xf32, #tpu.memory_space<vmem>>, vector<1x1x1xf32>
    tpu.vector_store %arg4[%c0_173, %c0_174, %c0_175], %599 {strides = array<i32>} : memref<1x1x1xf32, #tpu.memory_space<vmem>>, vector<1x1x1xf32>,
    return
  }
  func.func @transform_0(%arg0: i32) -> (i32, i32, i32) {
    %c0_i32 = arith.constant 0 : i32
    %c0_i32_0 = arith.constant 0 : i32
    %c0_i32_1 = arith.constant 0 : i32
    return %arg0, %c0_i32, %c0_i32_0 : i32, i32, i32
  }
  func.func @transform_1(%arg0: i32) -> (i32, i32, i32) {
    %c0_i32 = arith.constant 0 : i32
    %c0_i32_0 = arith.constant 0 : i32
    %c0_i32_1 = arith.constant 0 : i32
    return %arg0, %c0_i32, %c0_i32_0 : i32, i32, i32
  }
  func.func @transform_2(%arg0: i32) -> (i32, i32, i32) {
    %c0_i32 = arith.constant 0 : i32
    %c0_i32_0 = arith.constant 0 : i32
    %c0_i32_1 = arith.constant 0 : i32
    return %arg0, %c0_i32, %c0_i32_0 : i32, i32, i32
  }
  func.func @transform_3(%arg0: i32) -> (i32, i32, i32) {
    %c0_i32 = arith.constant 0 : i32
    %c0_i32_0 = arith.constant 0 : i32
    %c0_i32_1 = arith.constant 0 : i32
    return %arg0, %c0_i32, %c0_i32_0 : i32, i32, i32
  }
}

</mosaic_0001>

<bundles_post_ra>
// kernel: cg_loss.1
= control target key start
LH: loop header
LB: loop body
LE: loop exit
PB: predicated region body
PF: predicated region fallthrough
CT: control target
= control target key end

     0   :  { %s7164_s12 = smov 0   ;;  %s8336_s0 = inlined_call_operand.vmem [shape: f32[2,128,128], index: 0, kind: input, shape index: {}]   ;;  %s8337_s1 = inlined_call_operand.vmem [shape: f32[2,128,128], index: 1, kind: input, shape index: {}]   ;;  %s8338_s2 = inlined_call_operand.vmem [shape: f32[2,1,128], index: 2, kind: input, shape index: {}]   ;;  %s8339_s3 = inlined_call_operand.vmem [shape: f32[2,1,1], index: 3, kind: output, shape index: {}]  }
   0x1 LB: > { %s3760_s13 = sadd.s32 4294967295, %s7139_s12   ;;  %p3764_p0 = scmp.ge.s32.totalorder %s7139_s12, 1  ;;  %s7139_s12 = sphi %s7164_s12, %s13_s12  }
   0x2   : > { %p155_p1 = scmp.lt.s32.totalorder %s7139_s12, 3 }
   0x4   : > { %p156_p2 = pnand %p3764_p0, %p155_p1 }
   0x5   : > { %p185_p3 = scmp.lt.s32.totalorder (!%p156_p2), %s3760_s13, 1  ;;  %v7141_v0 = vmov (!%p156_p2), 0.0|0.0   ;;  %vm7142_vm0 = vmmov (!%p156_p2), 0   ;;  %v7143_v1 = vmov (!%p156_p2), 0.0   ;;  %vm446_vm1 = vcmask (!%p156_p2), 1040384  }
   0x6   : > { %159 = sbr.rel (%p156_p2) target bundleno = 15480 (0x3c78), region = 32  ;;  %6009 = vmatprep.subr.bf16.mxu0 (!%p156_p2), %v7141_v0  ;;  %4536 = vmatprep.mubr.msk.f32.mxu0 (!%p156_p2), %vm7142_vm0, %v7143_v1 }
   0x7   : > { %6033 = vmatprep.subr.bf16.mxu1 (!%p156_p2), %v7141_v0  ;;  %4571 = vmatprep.mubr.msk.f32.mxu1 (!%p156_p2), %vm7142_vm0, %v7143_v1 }
   0xd   : > { %s8341_s13 = smov (!%p185_p3, %s3760_s13), 1 }
   0xe   : > { %s3771_s14 = sshll.u32 %s8341_s13, 7  ;;  %s7277_s23 = scalar_lea.vmem %s8338_s2, %s8341_s13 }
   0xf   : > { %s7184_s17 = scalar_lea.vmem %s8336_s0, %s3771_s14  ;;  %s7195_s20 = scalar_lea.vmem %s8337_s1, %s3771_s14  ;;  %v233_v49 = vld [vmem:[%s7277_s23] sm:$0x1] }
  0x10   : > { %v201_v2 = vld [vmem:[%s7184_s17] sm:$0xff]  ;;  %v202_v3 = vld [vmem:[%s7184_s17 + $0x8] sm:$0xff]  ;;  %v203_v4 = vld [vmem:[%s7184_s17 + $0x10] sm:$0xff]  ;;  %s200_s26 = scalar_lea.vmem %s8339_s3, %s8341_s13 }
  0x11   : > { %v7189_v5 = vpack.c.bf16 %v202_v3, %v201_v2  ;;  %v204_v6 = vld [vmem:[%s7184_s17 + $0x18] sm:$0xff]  ;;  %v205_v8 = vld [vmem:[%s7184_s17 + $0x20] sm:$0xff]  ;;  %v206_v9 = vld [vmem:[%s7184_s17 + $0x28] sm:$0xff] }
  0x12   : > { %v7198_v7 = vpack.c.bf16 %v204_v6, %v203_v4  ;;  %v217_v10 = vld [vmem:[%s7195_s20] sm:$0xff]  ;;  %v218_v11 = vld [vmem:[%s7195_s20 + $0x8] sm:$0xff]  ;;  %v219_v13 = vld [vmem:[%s7195_s20 + $0x10] sm:$0xff]  ;;  %v7210_v15 = vpack.c.bf16 %v206_v9, %v205_v8 }
  0x13   : > { %6011 = vmatpush3.bf16.msra.mxu0 %v7189_v5  ;;  %v7205_v12 = vpack.c.bf16 %v218_v11, %v217_v10  ;;  %v220_v14 = vld [vmem:[%s7195_s20 + $0x18] sm:$0xff]  ;;  %v207_v16 = vld [vmem:[%s7184_s17 + $0x30] sm:$0xff]  ;;  %v221_v19 = vld [vmem:[%s7195_s20 + $0x20] sm:$0xff] }
  0x14   : > { %6012 = vmatprep.subr.bf16.mxu0 %v7141_v0  ;;  %v208_v17 = vld [vmem:[%s7184_s17 + $0x38] sm:$0xff]  ;;  %v7216_v18 = vpack.c.bf16 %v220_v14, %v219_v13  ;;  %v222_v20 = vld [vmem:[%s7195_s20 + $0x28] sm:$0xff]  ;;  %v209_v22 = vld [vmem:[%s7184_s17 + $0x40] sm:$0xff] }
  0x15   : > { %6035 = vmatpush3.bf16.msra.mxu1 %v7205_v12  ;;  %v7222_v21 = vpack.c.bf16 %v208_v17, %v207_v16  ;;  %v210_v23 = vld [vmem:[%s7184_s17 + $0x48] sm:$0xff]  ;;  %v7228_v24 = vpack.c.bf16 %v222_v20, %v221_v19  ;;  %v223_v25 = vld [vmem:[%s7195_s20 + $0x30] sm:$0xff]  ;;  %v224_v26 = vld [vmem:[%s7195_s20 + $0x38] sm:$0xff] }
  0x16   : > { %6036 = vmatprep.subr.bf16.mxu1 %v7141_v0  ;;  %v7234_v27 = vpack.c.bf16 %v210_v23, %v209_v22  ;;  %v211_v28 = vld [vmem:[%s7184_s17 + $0x50] sm:$0xff]  ;;  %v212_v29 = vld [vmem:[%s7184_s17 + $0x58] sm:$0xff]  ;;  %v7240_v30 = vpack.c.bf16 %v224_v26, %v223_v25  ;;  %v225_v31 = vld [vmem:[%s7195_s20 + $0x40] sm:$0xff] }
  0x17   : > { %6014 = vmatpush3.bf16.msra.mxu0 %v7198_v7  ;;  %v226_v32 = vld [vmem:[%s7195_s20 + $0x48] sm:$0xff]  ;;  %v7246_v33 = vpack.c.bf16 %v212_v29, %v211_v28  ;;  %v213_v34 = vld [vmem:[%s7184_s17 + $0x60] sm:$0xff]  ;;  %v227_v37 = vld [vmem:[%s7195_s20 + $0x50] sm:$0xff] }
  0x18   : > { %6015 = vmatprep.subr.bf16.mxu0 %v7141_v0  ;;  %v214_v35 = vld [vmem:[%s7184_s17 + $0x68] sm:$0xff]  ;;  %v7252_v36 = vpack.c.bf16 %v226_v32, %v225_v31  ;;  %v228_v38 = vld [vmem:[%s7195_s20 + $0x58] sm:$0xff]  ;;  %v215_v40 = vld [vmem:[%s7184_s17 + $0x70] sm:$0xff] }
  0x19   : > { %6038 = vmatpush3.bf16.msra.mxu1 %v7216_v18  ;;  %v7258_v39 = vpack.c.bf16 %v214_v35, %v213_v34  ;;  %v216_v41 = vld [vmem:[%s7184_s17 + $0x78] sm:$0xff]  ;;  %v7264_v42 = vpack.c.bf16 %v228_v38, %v227_v37  ;;  %v229_v43 = vld [vmem:[%s7195_s20 + $0x60] sm:$0xff]  ;;  %v230_v44 = vld [vmem:[%s7195_s20 + $0x68] sm:$0xff] }
  0x1a   : > { %6039 = vmatprep.subr.bf16.mxu1 %v7141_v0  ;;  %v7270_v45 = vpack.c.bf16 %v216_v41, %v215_v40  ;;  %v7280_v46 = vpack.c.bf16 %v230_v44, %v229_v43  ;;  %v231_v47 = vld [vmem:[%s7195_s20 + $0x70] sm:$0xff]  ;;  %v232_v48 = vld [vmem:[%s7195_s20 + $0x78] sm:$0xff] }
  0x1b   : > { %6017 = vmatpush3.bf16.msra.mxu0 %v7210_v15  ;;  %v7288_v50 = vpack.c.bf16 %v232_v48, %v231_v47 }
  0x1c   : > { %6018 = vmatprep.subr.bf16.mxu0 %v7141_v0 }
  0x1d   : > { %6041 = vmatpush3.bf16.msra.mxu1 %v7228_v24 }
  0x1e   : > { %6042 = vmatprep.subr.bf16.mxu1 %v7141_v0 }
  0x1f   : > { %6020 = vmatpush3.bf16.msra.mxu0 %v7222_v21 }
  0x20   : > { %6021 = vmatprep.subr.bf16.mxu0 %v7141_v0 }
  0x21   : > { %6044 = vmatpush3.bf16.msra.mxu1 %v7240_v30 }
  0x22   : > { %6045 = vmatprep.subr.bf16.mxu1 %v7141_v0 }
  0x23   : > { %6023 = vmatpush3.bf16.msra.mxu0 %v7234_v27 }
  0x24   : > { %6024 = vmatprep.subr.bf16.mxu0 %v7141_v0 }
  0x25   : > { %6047 = vmatpush3.bf16.msra.mxu1 %v7252_v36 }
  0x26   : > { %6048 = vmatprep.subr.bf16.mxu1 %v7141_v0 }
  0x27   : > { %6026 = vmatpush3.bf16.msra.mxu0 %v7246_v33 }
  0x28   : > { %6027 = vmatprep.subr.bf16.mxu0 %v7141_v0 }
  0x29   : > { %6050 = vmatpush3.bf16.msra.mxu1 %v7264_v42 }
  0x2a   : > { %6051 = vmatprep.subr.bf16.mxu1 %v7141_v0 }
  0x2b   : > { %6029 = vmatpush3.bf16.msra.mxu0 %v7258_v39 }
  0x2c   : > { %6030 = vmatprep.subr.bf16.mxu0 %v7141_v0 }
  0x2d   : > { %6053 = vmatpush3.bf16.msra.mxu1 %v7280_v46 }
  0x2e   : > { %6054 = vmatprep.subr.bf16.mxu1 %v7141_v0 }
  0x2f   : > { %6032 = vmatpush3.bf16.msra.mxu0 %v7270_v45 }
  0x30   : > { %6057 = vmatprep.subr.bf16.mxu0 %v7141_v0 }
  0x31   : > { %6056 = vmatpush3.bf16.msra.mxu1 %v7288_v50 }
  0x32   : > { %4537 = vmatmul.mubr.f32.vlgmr.msra.gmra.mrb[0].mxu0 %v233_v49  ;;  %6081 = vmatprep.subr.bf16.mxu1 %v7141_v0 }
  0x33   : > { %6059 = vmatpush3.bf16.msra.mxu0 %v7189_v5  ;;  %4606 = vmatprep.mubr.msk.f32.mxu0 %vm7142_vm0, %v7143_v1 }
  0x34   : > { %6060 = vmatprep.subr.bf16.mxu0 %v7141_v0 }
  0x37   : > { %6062 = vmatpush3.bf16.msra.mxu0 %v7198_v7 }
  0x38   : > { %6063 = vmatprep.subr.bf16.mxu0 %v7141_v0 }
  0x3b   : > { %6065 = vmatpush3.bf16.msra.mxu0 %v7210_v15 }
  0x3c   : > { %6066 = vmatprep.subr.bf16.mxu0 %v7141_v0 }
  0x3f   : > { %6068 = vmatpush3.bf16.msra.mxu0 %v7222_v21 }
  0x40   : > { %6069 = vmatprep.subr.bf16.mxu0 %v7141_v0 }
  0x43   : > { %6071 = vmatpush3.bf16.msra.mxu0 %v7234_v27 }
  0x44   : > { %6072 = vmatprep.subr.bf16.mxu0 %v7141_v0 }
  0x47   : > { %6074 = vmatpush3.bf16.msra.mxu0 %v7246_v33 }
  0x48   : > { %6075 = vmatprep.subr.bf16.mxu0 %v7141_v0 }
  0x4b   : > { %6077 = vmatpush3.bf16.msra.mxu0 %v7258_v39 }
  0x4c   : > { %6078 = vmatprep.subr.bf16.mxu0 %v7141_v0 }
  0x4f   : > { %6080 = vmatpush3.bf16.msra.mxu0 %v7270_v45 }
  0x50   : > { %6105 = vmatprep.subr.bf16.mxu0 %v7141_v0 }
 0x105   : > { %v7312_v51 = vpop.f32.mrb[0].mxu0 }
 0x106   : > { %v4538_v52 = vpop.f32.mrb[1].mxu0  ;;  %4572 = vmatmul.mubr.f32.vlgmr.msra.gmra.mrb[0].mxu1 %v7312_v51 }
 0x107   : > { %6083 = vmatpush3.bf16.msra.mxu1 %v7205_v12  ;;  %4641 = vmatprep.mubr.msk.f32.mxu1 %vm7142_vm0, %v7143_v1 }
 0x108   : > { %6084 = vmatprep.subr.bf16.mxu1 %v7141_v0 }
 0x10b   : > { %6086 = vmatpush3.bf16.msra.mxu1 %v7216_v18 }
 0x10c   : > { %6087 = vmatprep.subr.bf16.mxu1 %v7141_v0 }
 0x10f   : > { %6089 = vmatpush3.bf16.msra.mxu1 %v7228_v24 }
 0x110   : > { %6090 = vmatprep.subr.bf16.mxu1 %v7141_v0 }
 0x113   : > { %6092 = vmatpush3.bf16.msra.mxu1 %v7240_v30 }
 0x114   : > { %6093 = vmatprep.subr.bf16.mxu1 %v7141_v0 }
 0x117   : > { %6095 = vmatpush3.bf16.msra.mxu1 %v7252_v36 }
 0x118   : > { %6096 = vmatprep.subr.bf16.mxu1 %v7141_v0 }
 0x11b   : > { %6098 = vmatpush3.bf16.msra.mxu1 %v7264_v42 }
 0x11c   : > { %6099 = vmatprep.subr.bf16.mxu1 %v7141_v0 }
 0x11f   : > { %6101 = vmatpush3.bf16.msra.mxu1 %v7280_v46 }
 0x120   : > { %6102 = vmatprep.subr.bf16.mxu1 %v7141_v0 }
 0x123   : > { %6104 = vmatpush3.bf16.msra.mxu1 %v7288_v50 }
 0x124   : > { %6129 = vmatprep.subr.bf16.mxu1 %v7141_v0 }
 0x1d9   : > { %v370_v53 = vpop.f32.mrb[0].mxu1 }
 0x1da   : > { %v374_v54 = vsub.f32 %v233_v49, %v370_v53  ;;  %v4573_v55 = vpop.f32.mrb[1].mxu1 }
 0x1dc   : > { %4607 = vmatmul.mubr.f32.vlgmr.msra.gmra.mrb[2].mxu0 %v374_v54 }
 0x1dd   : > { %6107 = vmatpush3.bf16.msra.mxu0 %v7189_v5  ;;  %4676 = vmatprep.mubr.msk.f32.mxu0 %vm7142_vm0, %v7143_v1 }
 0x1de   : > { %6108 = vmatprep.subr.bf16.mxu0 %v7141_v0 }
 0x1e1   : > { %6110 = vmatpush3.bf16.msra.mxu0 %v7198_v7 }
 0x1e2   : > { %6111 = vmatprep.subr.bf16.mxu0 %v7141_v0 }
 0x1e5   : > { %6113 = vmatpush3.bf16.msra.mxu0 %v7210_v15 }
 0x1e6   : > { %6114 = vmatprep.subr.bf16.mxu0 %v7141_v0 }
 0x1e9   : > { %6116 = vmatpush3.bf16.msra.mxu0 %v7222_v21 }
 0x1ea   : > { %6117 = vmatprep.subr.bf16.mxu0 %v7141_v0 }
 0x1ed   : > { %6119 = vmatpush3.bf16.msra.mxu0 %v7234_v27 }
 0x1ee   : > { %6120 = vmatprep.subr.bf16.mxu0 %v7141_v0 }
 0x1f1   : > { %6122 = vmatpush3.bf16.msra.mxu0 %v7246_v33 }
 0x1f2   : > { %6123 = vmatprep.subr.bf16.mxu0 %v7141_v0 }
 0x1f5   : > { %6125 = vmatpush3.bf16.msra.mxu0 %v7258_v39 }
 0x1f6   : > { %6126 = vmatprep.subr.bf16.mxu0 %v7141_v0 }
 0x1f9   : > { %6128 = vmatpush3.bf16.msra.mxu0 %v7270_v45 }
 0x1fa   : > { %6153 = vmatprep.subr.bf16.mxu0 %v7141_v0 }
 0x2af   : > { %v7351_v56 = vpop.f32.mrb[2].mxu0 }
 0x2b0   : > { %v4608_v57 = vpop.f32.mrb[3].mxu0  ;;  %4642 = vmatmul.mubr.f32.vlgmr.msra.gmra.mrb[2].mxu1 %v7351_v56  ;;  %v445_v62 = vmul.f32 %v7351_v56, %v374_v54 }
 0x2b1   : > { %6131 = vmatpush3.bf16.msra.mxu1 %v7205_v12  ;;  %4711 = vmatprep.mubr.msk.f32.mxu1 %vm7142_vm0, %v7143_v1 }
 0x2b2   : > { %6132 = vmatprep.subr.bf16.mxu1 %v7141_v0  ;;  %v447_v63 = vsel %vm446_vm1, %v445_v62, 0.0 }
 0x2b5   : > { %6134 = vmatpush3.bf16.msra.mxu1 %v7216_v18 }
 0x2b6   : > { %6135 = vmatprep.subr.bf16.mxu1 %v7141_v0 }
 0x2b9   : > { %6137 = vmatpush3.bf16.msra.mxu1 %v7228_v24 }
 0x2ba   : > { %6138 = vmatprep.subr.bf16.mxu1 %v7141_v0 }
 0x2bd   : > { %6140 = vmatpush3.bf16.msra.mxu1 %v7240_v30 }
 0x2be   : > { %6141 = vmatprep.subr.bf16.mxu1 %v7141_v0 }
 0x2c1   : > { %6143 = vmatpush3.bf16.msra.mxu1 %v7252_v36 }
 0x2c2   : > { %6144 = vmatprep.subr.bf16.mxu1 %v7141_v0 }
 0x2c5   : > { %6146 = vmatpush3.bf16.msra.mxu1 %v7264_v42 }
 0x2c6   : > { %6147 = vmatprep.subr.bf16.mxu1 %v7141_v0 }
 0x2c9   : > { %6149 = vmatpush3.bf16.msra.mxu1 %v7280_v46 }
 0x2ca   : > { %6150 = vmatprep.subr.bf16.mxu1 %v7141_v0 }
 0x2cd   : > { %6152 = vmatpush3.bf16.msra.mxu1 %v7288_v50 }
 0x2ce   : > { %6177 = vmatprep.subr.bf16.mxu1 %v7141_v0 }
 0x383   : > { %v516_v58 = vpop.f32.mrb[2].mxu1 }
 0x384   : > { %v4643_v59 = vpop.f32.mrb[3].mxu1  ;;  %v520_v60 = vmul.f32 %v516_v58, %v7351_v56 }
 0x386   : > { %v521_v61 = vsel %vm446_vm1, %v520_v60, 0.0 }
 0x387   : > { %522 = vadd.xlane.f32.xlu0 %v521_v61 }
 0x38b   : > { %448 = vadd.xlane.f32.xlu0 %v447_v63 }
 0x414   : > { %v523_v2 = vpop.xlane.xlu0 %522 }
 0x415   : > { %vm524_vm2 = vcmp.eq.f32.partialorder %v523_v2, 0.0 }
 0x416   : > { %v525_v3 = vsel %vm524_vm2, 1e-08, %v523_v2 }
 0x417   : > { %7052 = vrcp.f32 %v525_v3 }
 0x418   : > { %v449_v6 = vpop.xlane.xlu0 %448 }
 0x419   : > { %vm606_vm3 = vcmp.eq.f32.partialorder %v449_v6, 0.0 }
 0x41a   : > { %v607_v20 = vsel %vm606_vm3, 1e-08, %v449_v6 }
 0x41b   : > { %7054 = vrcp.f32 %v607_v20 }
 0x421   : > { %v7053_v4 = vpop.eup %7052 }
 0x422   : > { %v527_v8 = vmul.f32 %v7053_v4, %v449_v6 }
 0x424   : > { %v528_v9 = vmul.f32 %v527_v8, %v7351_v56  ;;  %v530_v10 = vmul.f32 %v527_v8, %v516_v58 }
 0x425   : > { %v7055_v22 = vpop.eup %7054 }
 0x426   : > { %v7378_v11 = vadd.f32 %v528_v9, %v7312_v51  ;;  %v7380_v13 = vsub.f32 %v374_v54, %v530_v10 }
 0x428   : > { %4677 = vmatmul.mubr.f32.vlgmr.msra.gmra.mrb[4].mxu0 %v7380_v13 }
 0x429   : > { %6155 = vmatpush3.bf16.msra.mxu0 %v7189_v5  ;;  %4746 = vmatprep.mubr.msk.f32.mxu0 %vm7142_vm0, %v7143_v1 }
 0x42a   : > { %6156 = vmatprep.subr.bf16.mxu0 %v7141_v0 }
 0x42d   : > { %6158 = vmatpush3.bf16.msra.mxu0 %v7198_v7 }
 0x42e   : > { %6159 = vmatprep.subr.bf16.mxu0 %v7141_v0 }
 0x431   : > { %6161 = vmatpush3.bf16.msra.mxu0 %v7210_v15 }
 0x432   : > { %6162 = vmatprep.subr.bf16.mxu0 %v7141_v0 }
 0x435   : > { %6164 = vmatpush3.bf16.msra.mxu0 %v7222_v21 }
 0x436   : > { %6165 = vmatprep.subr.bf16.mxu0 %v7141_v0 }
 0x439   : > { %6167 = vmatpush3.bf16.msra.mxu0 %v7234_v27 }
 0x43a   : > { %6168 = vmatprep.subr.bf16.mxu0 %v7141_v0 }
 0x43d   : > { %6170 = vmatpush3.bf16.msra.mxu0 %v7246_v33 }
 0x43e   : > { %6171 = vmatprep.subr.bf16.mxu0 %v7141_v0 }
 0x441   : > { %6173 = vmatpush3.bf16.msra.mxu0 %v7258_v39 }
 0x442   : > { %6174 = vmatprep.subr.bf16.mxu0 %v7141_v0 }
 0x445   : > { %6176 = vmatpush3.bf16.msra.mxu0 %v7270_v45 }
 0x446   : > { %6201 = vmatprep.subr.bf16.mxu0 %v7141_v0 }
 0x4fb   : > { %v598_v14 = vpop.f32.mrb[4].mxu0 }
 0x4fc   : > { %v4678_v16 = vpop.f32.mrb[5].mxu0  ;;  %v602_v17 = vmul.f32 %v598_v14, %v7380_v13 }
 0x4fe   : > { %v603_v19 = vsel %vm446_vm1, %v602_v17, 0.0 }
 0x4ff   : > { %604 = vadd.xlane.f32.xlu1 %v603_v19 }
 0x58c   : > { %v605_v23 = vpop.xlane.xlu1 %604 }
 0x58d   : > { %v609_v25 = vmul.f32 %v7055_v22, %v605_v23  ;;  %vm768_vm5 = vcmp.eq.f32.partialorder %v605_v23, 0.0 }
 0x58e   : > { %v769_v53 = vsel %vm768_vm5, 1e-08, %v605_v23 }
 0x58f   : > { %v610_v26 = vmul.f32 %v609_v25, %v7351_v56 }
 0x591   : > { %v7404_v28 = vadd.f32 %v610_v26, %v598_v14 }
 0x593   : > { %4712 = vmatmul.mubr.f32.vlgmr.msra.gmra.mrb[4].mxu1 %v7404_v28 }
 0x594   : > { %6179 = vmatpush3.bf16.msra.mxu1 %v7205_v12  ;;  %4781 = vmatprep.mubr.msk.f32.mxu1 %vm7142_vm0, %v7143_v1 }
 0x595   : > { %6180 = vmatprep.subr.bf16.mxu1 %v7141_v0 }
 0x598   : > { %6182 = vmatpush3.bf16.msra.mxu1 %v7216_v18 }
 0x599   : > { %6183 = vmatprep.subr.bf16.mxu1 %v7141_v0 }
 0x59c   : > { %6185 = vmatpush3.bf16.msra.mxu1 %v7228_v24 }
 0x59d   : > { %6186 = vmatprep.subr.bf16.mxu1 %v7141_v0 }
 0x5a0   : > { %6188 = vmatpush3.bf16.msra.mxu1 %v7240_v30 }
 0x5a1   : > { %6189 = vmatprep.subr.bf16.mxu1 %v7141_v0 }
 0x5a4   : > { %6191 = vmatpush3.bf16.msra.mxu1 %v7252_v36 }
 0x5a5   : > { %6192 = vmatprep.subr.bf16.mxu1 %v7141_v0 }
 0x5a8   : > { %6194 = vmatpush3.bf16.msra.mxu1 %v7264_v42 }
 0x5a9   : > { %6195 = vmatprep.subr.bf16.mxu1 %v7141_v0 }
 0x5ac   : > { %6197 = vmatpush3.bf16.msra.mxu1 %v7280_v46 }
 0x5ad   : > { %6198 = vmatprep.subr.bf16.mxu1 %v7141_v0 }
 0x5b0   : > { %6200 = vmatpush3.bf16.msra.mxu1 %v7288_v50 }
 0x5b1   : > { %6225 = vmatprep.subr.bf16.mxu1 %v7141_v0 }
 0x666   : > { %v678_v29 = vpop.f32.mrb[4].mxu1 }
 0x667   : > { %v682_v31 = vmul.f32 %v678_v29, %v7404_v28  ;;  %v4713_v32 = vpop.f32.mrb[5].mxu1 }
 0x669   : > { %v683_v34 = vsel %vm446_vm1, %v682_v31, 0.0 }
 0x66a   : > { %684 = vadd.xlane.f32.xlu1 %v683_v34 }
 0x6f7   : > { %v685_v35 = vpop.xlane.xlu1 %684 }
 0x6f8   : > { %vm686_vm4 = vcmp.eq.f32.partialorder %v685_v35, 0.0 }
 0x6f9   : > { %v687_v37 = vsel %vm686_vm4, 1e-08, %v685_v35 }
 0x6fa   : > { %7056 = vrcp.f32 %v687_v37 }
 0x6fb   : > { %7058 = vrcp.f32 %v769_v53 }
 0x704   : > { %v7057_v38 = vpop.eup %7056 }
 0x705   : > { %v689_v40 = vmul.f32 %v7057_v38, %v605_v23  ;;  %v7059_v54 = vpop.eup %7058 }
 0x707   : > { %v690_v41 = vmul.f32 %v689_v40, %v7404_v28  ;;  %v692_v43 = vmul.f32 %v689_v40, %v678_v29 }
 0x709   : > { %v7429_v44 = vadd.f32 %v690_v41, %v7378_v11  ;;  %v7432_v47 = vsub.f32 %v7380_v13, %v692_v43 }
 0x70b   : > { %4747 = vmatmul.mubr.f32.vlgmr.msra.gmra.mrb[6].mxu0 %v7432_v47 }
 0x70c   : > { %6203 = vmatpush3.bf16.msra.mxu0 %v7189_v5  ;;  %4816 = vmatprep.mubr.msk.f32.mxu0 %vm7142_vm0, %v7143_v1 }
 0x70d   : > { %6204 = vmatprep.subr.bf16.mxu0 %v7141_v0 }
 0x710   : > { %6206 = vmatpush3.bf16.msra.mxu0 %v7198_v7 }
 0x711   : > { %6207 = vmatprep.subr.bf16.mxu0 %v7141_v0 }
 0x714   : > { %6209 = vmatpush3.bf16.msra.mxu0 %v7210_v15 }
 0x715   : > { %6210 = vmatprep.subr.bf16.mxu0 %v7141_v0 }
 0x718   : > { %6212 = vmatpush3.bf16.msra.mxu0 %v7222_v21 }
 0x719   : > { %6213 = vmatprep.subr.bf16.mxu0 %v7141_v0 }
 0x71c   : > { %6215 = vmatpush3.bf16.msra.mxu0 %v7234_v27 }
 0x71d   : > { %6216 = vmatprep.subr.bf16.mxu0 %v7141_v0 }
 0x720   : > { %6218 = vmatpush3.bf16.msra.mxu0 %v7246_v33 }
 0x721   : > { %6219 = vmatprep.subr.bf16.mxu0 %v7141_v0 }
 0x724   : > { %6221 = vmatpush3.bf16.msra.mxu0 %v7258_v39 }
 0x725   : > { %6222 = vmatprep.subr.bf16.mxu0 %v7141_v0 }
 0x728   : > { %6224 = vmatpush3.bf16.msra.mxu0 %v7270_v45 }
 0x729   : > { %6249 = vmatprep.subr.bf16.mxu0 %v7141_v0 }
 0x7de   : > { %v760_v48 = vpop.f32.mrb[6].mxu0 }
 0x7df   : > { %v764_v49 = vmul.f32 %v760_v48, %v7432_v47  ;;  %v4748_v51 = vpop.f32.mrb[7].mxu0 }
 0x7e1   : > { %v765_v52 = vsel %vm446_vm1, %v764_v49, 0.0 }
 0x7e2   : > { %766 = vadd.xlane.f32.xlu0 %v765_v52 }
 0x86f   : > { %v767_v55 = vpop.xlane.xlu0 %766 }
 0x870   : > { %v771_v56 = vmul.f32 %v7059_v54, %v767_v55  ;;  %vm930_vm7 = vcmp.eq.f32.partialorder %v767_v55, 0.0 }
 0x871   : > { %v931_v17 = vsel %vm930_vm7, 1e-08, %v767_v55 }
 0x872   : > { %v772_v57 = vmul.f32 %v771_v56, %v7404_v28 }
 0x874   : > { %v7456_v58 = vadd.f32 %v772_v57, %v760_v48 }
 0x876   : > { %4782 = vmatmul.mubr.f32.vlgmr.msra.gmra.mrb[6].mxu1 %v7456_v58 }
 0x877   : > { %6227 = vmatpush3.bf16.msra.mxu1 %v7205_v12  ;;  %4851 = vmatprep.mubr.msk.f32.mxu1 %vm7142_vm0, %v7143_v1 }
 0x878   : > { %6228 = vmatprep.subr.bf16.mxu1 %v7141_v0 }
 0x87b   : > { %6230 = vmatpush3.bf16.msra.mxu1 %v7216_v18 }
 0x87c   : > { %6231 = vmatprep.subr.bf16.mxu1 %v7141_v0 }
 0x87f   : > { %6233 = vmatpush3.bf16.msra.mxu1 %v7228_v24 }
 0x880   : > { %6234 = vmatprep.subr.bf16.mxu1 %v7141_v0 }
 0x883   : > { %6236 = vmatpush3.bf16.msra.mxu1 %v7240_v30 }
 0x884   : > { %6237 = vmatprep.subr.bf16.mxu1 %v7141_v0 }
 0x887   : > { %6239 = vmatpush3.bf16.msra.mxu1 %v7252_v36 }
 0x888   : > { %6240 = vmatprep.subr.bf16.mxu1 %v7141_v0 }
 0x88b   : > { %6242 = vmatpush3.bf16.msra.mxu1 %v7264_v42 }
 0x88c   : > { %6243 = vmatprep.subr.bf16.mxu1 %v7141_v0 }
 0x88f   : > { %6245 = vmatpush3.bf16.msra.mxu1 %v7280_v46 }
 0x890   : > { %6246 = vmatprep.subr.bf16.mxu1 %v7141_v0 }
 0x893   : > { %6248 = vmatpush3.bf16.msra.mxu1 %v7288_v50 }
 0x894   : > { %6273 = vmatprep.subr.bf16.mxu1 %v7141_v0 }
 0x949   : > { %v840_v59 = vpop.f32.mrb[6].mxu1 }
 0x94a   : > { %v844_v60 = vmul.f32 %v840_v59, %v7456_v58  ;;  %v4783_v61 = vpop.f32.mrb[7].mxu1 }
 0x94c   : > { %v845_v62 = vsel %vm446_vm1, %v844_v60, 0.0 }
 0x94d   : > { %846 = vadd.xlane.f32.xlu1 %v845_v62 }
 0x9da   : > { %v847_v63 = vpop.xlane.xlu1 %846 }
 0x9db   : > { %vm848_vm6 = vcmp.eq.f32.partialorder %v847_v63, 0.0 }
 0x9dc   : > { %v849_v2 = vsel %vm848_vm6, 1e-08, %v847_v63 }
 0x9dd   : > { %7060 = vrcp.f32 %v849_v2 }
 0x9de   : > { %7062 = vrcp.f32 %v931_v17 }
 0x9e7   : > { %v7061_v3 = vpop.eup %7060 }
 0x9e8   : > { %v851_v4 = vmul.f32 %v7061_v3, %v767_v55  ;;  %v7063_v19 = vpop.eup %7062 }
 0x9ea   : > { %v852_v6 = vmul.f32 %v851_v4, %v7456_v58  ;;  %v854_v8 = vmul.f32 %v851_v4, %v840_v59 }
 0x9ec   : > { %v7481_v9 = vadd.f32 %v852_v6, %v7429_v44  ;;  %v7484_v10 = vsub.f32 %v7432_v47, %v854_v8 }
 0x9ee   : > { %4817 = vmatmul.mubr.f32.vlgmr.msra.gmra.mrb[8].mxu0 %v7484_v10 }
 0x9ef   : > { %6251 = vmatpush3.bf16.msra.mxu0 %v7189_v5  ;;  %4886 = vmatprep.mubr.msk.f32.mxu0 %vm7142_vm0, %v7143_v1 }
 0x9f0   : > { %6252 = vmatprep.subr.bf16.mxu0 %v7141_v0 }
 0x9f3   : > { %6254 = vmatpush3.bf16.msra.mxu0 %v7198_v7 }
 0x9f4   : > { %6255 = vmatprep.subr.bf16.mxu0 %v7141_v0 }
 0x9f7   : > { %6257 = vmatpush3.bf16.msra.mxu0 %v7210_v15 }
 0x9f8   : > { %6258 = vmatprep.subr.bf16.mxu0 %v7141_v0 }
 0x9fb   : > { %6260 = vmatpush3.bf16.msra.mxu0 %v7222_v21 }
 0x9fc   : > { %6261 = vmatprep.subr.bf16.mxu0 %v7141_v0 }
 0x9ff   : > { %6263 = vmatpush3.bf16.msra.mxu0 %v7234_v27 }
 0xa00   : > { %6264 = vmatprep.subr.bf16.mxu0 %v7141_v0 }
 0xa03   : > { %6266 = vmatpush3.bf16.msra.mxu0 %v7246_v33 }
 0xa04   : > { %6267 = vmatprep.subr.bf16.mxu0 %v7141_v0 }
 0xa07   : > { %6269 = vmatpush3.bf16.msra.mxu0 %v7258_v39 }
 0xa08   : > { %6270 = vmatprep.subr.bf16.mxu0 %v7141_v0 }
 0xa0b   : > { %6272 = vmatpush3.bf16.msra.mxu0 %v7270_v45 }
 0xa0c   : > { %6297 = vmatprep.subr.bf16.mxu0 %v7141_v0 }
 0xac1   : > { %v922_v11 = vpop.f32.mrb[8].mxu0 }
 0xac2   : > { %v926_v13 = vmul.f32 %v922_v11, %v7484_v10  ;;  %v4818_v14 = vpop.f32.mrb[9].mxu0 }
 0xac4   : > { %v927_v16 = vsel %vm446_vm1, %v926_v13, 0.0 }
 0xac5   : > { %928 = vadd.xlane.f32.xlu0 %v927_v16 }
 0xb52   : > { %v929_v20 = vpop.xlane.xlu0 %928 }
 0xb53   : > { %v933_v22 = vmul.f32 %v7063_v19, %v929_v20  ;;  %vm1092_vm9 = vcmp.eq.f32.partialorder %v929_v20, 0.0 }
 0xb54   : > { %v1093_v51 = vsel %vm1092_vm9, 1e-08, %v929_v20 }
 0xb55   : > { %v934_v23 = vmul.f32 %v933_v22, %v7456_v58 }
 0xb57   : > { %v7508_v25 = vadd.f32 %v934_v23, %v922_v11 }
 0xb59   : > { %4852 = vmatmul.mubr.f32.vlgmr.msra.gmra.mrb[8].mxu1 %v7508_v25 }
 0xb5a   : > { %6275 = vmatpush3.bf16.msra.mxu1 %v7205_v12  ;;  %4921 = vmatprep.mubr.msk.f32.mxu1 %vm7142_vm0, %v7143_v1 }
 0xb5b   : > { %6276 = vmatprep.subr.bf16.mxu1 %v7141_v0 }
 0xb5e   : > { %6278 = vmatpush3.bf16.msra.mxu1 %v7216_v18 }
 0xb5f   : > { %6279 = vmatprep.subr.bf16.mxu1 %v7141_v0 }
 0xb62   : > { %6281 = vmatpush3.bf16.msra.mxu1 %v7228_v24 }
 0xb63   : > { %6282 = vmatprep.subr.bf16.mxu1 %v7141_v0 }
 0xb66   : > { %6284 = vmatpush3.bf16.msra.mxu1 %v7240_v30 }
 0xb67   : > { %6285 = vmatprep.subr.bf16.mxu1 %v7141_v0 }
 0xb6a   : > { %6287 = vmatpush3.bf16.msra.mxu1 %v7252_v36 }
 0xb6b   : > { %6288 = vmatprep.subr.bf16.mxu1 %v7141_v0 }
 0xb6e   : > { %6290 = vmatpush3.bf16.msra.mxu1 %v7264_v42 }
 0xb6f   : > { %6291 = vmatprep.subr.bf16.mxu1 %v7141_v0 }
 0xb72   : > { %6293 = vmatpush3.bf16.msra.mxu1 %v7280_v46 }
 0xb73   : > { %6294 = vmatprep.subr.bf16.mxu1 %v7141_v0 }
 0xb76   : > { %6296 = vmatpush3.bf16.msra.mxu1 %v7288_v50 }
 0xb77   : > { %6321 = vmatprep.subr.bf16.mxu1 %v7141_v0 }
 0xc2c   : > { %v1002_v26 = vpop.f32.mrb[8].mxu1 }
 0xc2d   : > { %v1006_v28 = vmul.f32 %v1002_v26, %v7508_v25  ;;  %v4853_v29 = vpop.f32.mrb[9].mxu1 }
 0xc2f   : > { %v1007_v31 = vsel %vm446_vm1, %v1006_v28, 0.0 }
 0xc30   : > { %1008 = vadd.xlane.f32.xlu1 %v1007_v31 }
 0xcbd   : > { %v1009_v32 = vpop.xlane.xlu1 %1008 }
 0xcbe   : > { %vm1010_vm8 = vcmp.eq.f32.partialorder %v1009_v32, 0.0 }
 0xcbf   : > { %v1011_v34 = vsel %vm1010_vm8, 1e-08, %v1009_v32 }
 0xcc0   : > { %7064 = vrcp.f32 %v1011_v34 }
 0xcc1   : > { %7066 = vrcp.f32 %v1093_v51 }
 0xcca   : > { %v7065_v35 = vpop.eup %7064 }
 0xccb   : > { %v1013_v37 = vmul.f32 %v7065_v35, %v929_v20  ;;  %v7067_v52 = vpop.eup %7066 }
 0xccd   : > { %v1014_v38 = vmul.f32 %v1013_v37, %v7508_v25  ;;  %v1016_v40 = vmul.f32 %v1013_v37, %v1002_v26 }
 0xccf   : > { %v7533_v41 = vadd.f32 %v1014_v38, %v7481_v9  ;;  %v7536_v43 = vsub.f32 %v7484_v10, %v1016_v40 }
 0xcd1   : > { %4887 = vmatmul.mubr.f32.vlgmr.msra.gmra.mrb[10].mxu0 %v7536_v43 }
 0xcd2   : > { %6299 = vmatpush3.bf16.msra.mxu0 %v7189_v5  ;;  %4956 = vmatprep.mubr.msk.f32.mxu0 %vm7142_vm0, %v7143_v1 }
 0xcd3   : > { %6300 = vmatprep.subr.bf16.mxu0 %v7141_v0 }
 0xcd6   : > { %6302 = vmatpush3.bf16.msra.mxu0 %v7198_v7 }
 0xcd7   : > { %6303 = vmatprep.subr.bf16.mxu0 %v7141_v0 }
 0xcda   : > { %6305 = vmatpush3.bf16.msra.mxu0 %v7210_v15 }
 0xcdb   : > { %6306 = vmatprep.subr.bf16.mxu0 %v7141_v0 }
 0xcde   : > { %6308 = vmatpush3.bf16.msra.mxu0 %v7222_v21 }
 0xcdf   : > { %6309 = vmatprep.subr.bf16.mxu0 %v7141_v0 }
 0xce2   : > { %6311 = vmatpush3.bf16.msra.mxu0 %v7234_v27 }
 0xce3   : > { %6312 = vmatprep.subr.bf16.mxu0 %v7141_v0 }
 0xce6   : > { %6314 = vmatpush3.bf16.msra.mxu0 %v7246_v33 }
 0xce7   : > { %6315 = vmatprep.subr.bf16.mxu0 %v7141_v0 }
 0xcea   : > { %6317 = vmatpush3.bf16.msra.mxu0 %v7258_v39 }
 0xceb   : > { %6318 = vmatprep.subr.bf16.mxu0 %v7141_v0 }
 0xcee   : > { %6320 = vmatpush3.bf16.msra.mxu0 %v7270_v45 }
 0xcef   : > { %6345 = vmatprep.subr.bf16.mxu0 %v7141_v0 }
 0xda4   : > { %v1084_v44 = vpop.f32.mrb[10].mxu0 }
 0xda5   : > { %v1088_v47 = vmul.f32 %v1084_v44, %v7536_v43  ;;  %v4888_v48 = vpop.f32.mrb[11].mxu0 }
 0xda7   : > { %v1089_v49 = vsel %vm446_vm1, %v1088_v47, 0.0 }
 0xda8   : > { %1090 = vadd.xlane.f32.xlu0 %v1089_v49 }
 0xe35   : > { %v1091_v53 = vpop.xlane.xlu0 %1090 }
 0xe36   : > { %v1095_v54 = vmul.f32 %v7067_v52, %v1091_v53  ;;  %vm1254_vm11 = vcmp.eq.f32.partialorder %v1091_v53, 0.0 }
 0xe37   : > { %v1255_v14 = vsel %vm1254_vm11, 1e-08, %v1091_v53 }
 0xe38   : > { %v1096_v55 = vmul.f32 %v1095_v54, %v7508_v25 }
 0xe3a   : > { %v7560_v56 = vadd.f32 %v1096_v55, %v1084_v44 }
 0xe3c   : > { %4922 = vmatmul.mubr.f32.vlgmr.msra.gmra.mrb[10].mxu1 %v7560_v56 }
 0xe3d   : > { %6323 = vmatpush3.bf16.msra.mxu1 %v7205_v12  ;;  %4991 = vmatprep.mubr.msk.f32.mxu1 %vm7142_vm0, %v7143_v1 }
 0xe3e   : > { %6324 = vmatprep.subr.bf16.mxu1 %v7141_v0 }
 0xe41   : > { %6326 = vmatpush3.bf16.msra.mxu1 %v7216_v18 }
 0xe42   : > { %6327 = vmatprep.subr.bf16.mxu1 %v7141_v0 }
 0xe45   : > { %6329 = vmatpush3.bf16.msra.mxu1 %v7228_v24 }
 0xe46   : > { %6330 = vmatprep.subr.bf16.mxu1 %v7141_v0 }
 0xe49   : > { %6332 = vmatpush3.bf16.msra.mxu1 %v7240_v30 }
 0xe4a   : > { %6333 = vmatprep.subr.bf16.mxu1 %v7141_v0 }
 0xe4d   : > { %6335 = vmatpush3.bf16.msra.mxu1 %v7252_v36 }
 0xe4e   : > { %6336 = vmatprep.subr.bf16.mxu1 %v7141_v0 }
 0xe51   : > { %6338 = vmatpush3.bf16.msra.mxu1 %v7264_v42 }
 0xe52   : > { %6339 = vmatprep.subr.bf16.mxu1 %v7141_v0 }
 0xe55   : > { %6341 = vmatpush3.bf16.msra.mxu1 %v7280_v46 }
 0xe56   : > { %6342 = vmatprep.subr.bf16.mxu1 %v7141_v0 }
 0xe59   : > { %6344 = vmatpush3.bf16.msra.mxu1 %v7288_v50 }
 0xe5a   : > { %6369 = vmatprep.subr.bf16.mxu1 %v7141_v0 }
 0xf0f   : > { %v1164_v57 = vpop.f32.mrb[10].mxu1 }
 0xf10   : > { %v1168_v58 = vmul.f32 %v1164_v57, %v7560_v56  ;;  %v4923_v59 = vpop.f32.mrb[11].mxu1 }
 0xf12   : > { %v1169_v60 = vsel %vm446_vm1, %v1168_v58, 0.0 }
 0xf13   : > { %1170 = vadd.xlane.f32.xlu1 %v1169_v60 }
 0xfa0   : > { %v1171_v61 = vpop.xlane.xlu1 %1170 }
 0xfa1   : > { %vm1172_vm10 = vcmp.eq.f32.partialorder %v1171_v61, 0.0 }
 0xfa2   : > { %v1173_v62 = vsel %vm1172_vm10, 1e-08, %v1171_v61 }
 0xfa3   : > { %7068 = vrcp.f32 %v1173_v62 }
 0xfa4   : > { %7070 = vrcp.f32 %v1255_v14 }
 0xfad   : > { %v7069_v63 = vpop.eup %7068 }
 0xfae   : > { %v1175_v2 = vmul.f32 %v7069_v63, %v1091_v53  ;;  %v7071_v16 = vpop.eup %7070 }
 0xfb0   : > { %v1176_v3 = vmul.f32 %v1175_v2, %v7560_v56  ;;  %v1178_v4 = vmul.f32 %v1175_v2, %v1164_v57 }
 0xfb2   : > { %v7585_v6 = vadd.f32 %v1176_v3, %v7533_v41  ;;  %v7588_v8 = vsub.f32 %v7536_v43, %v1178_v4 }
 0xfb4   : > { %4957 = vmatmul.mubr.f32.vlgmr.msra.gmra.mrb[12].mxu0 %v7588_v8 }
 0xfb5   : > { %6347 = vmatpush3.bf16.msra.mxu0 %v7189_v5  ;;  %5026 = vmatprep.mubr.msk.f32.mxu0 %vm7142_vm0, %v7143_v1 }
 0xfb6   : > { %6348 = vmatprep.subr.bf16.mxu0 %v7141_v0 }
 0xfb9   : > { %6350 = vmatpush3.bf16.msra.mxu0 %v7198_v7 }
 0xfba   : > { %6351 = vmatprep.subr.bf16.mxu0 %v7141_v0 }
 0xfbd   : > { %6353 = vmatpush3.bf16.msra.mxu0 %v7210_v15 }
 0xfbe   : > { %6354 = vmatprep.subr.bf16.mxu0 %v7141_v0 }
 0xfc1   : > { %6356 = vmatpush3.bf16.msra.mxu0 %v7222_v21 }
 0xfc2   : > { %6357 = vmatprep.subr.bf16.mxu0 %v7141_v0 }
 0xfc5   : > { %6359 = vmatpush3.bf16.msra.mxu0 %v7234_v27 }
 0xfc6   : > { %6360 = vmatprep.subr.bf16.mxu0 %v7141_v0 }
 0xfc9   : > { %6362 = vmatpush3.bf16.msra.mxu0 %v7246_v33 }
 0xfca   : > { %6363 = vmatprep.subr.bf16.mxu0 %v7141_v0 }
 0xfcd   : > { %6365 = vmatpush3.bf16.msra.mxu0 %v7258_v39 }
 0xfce   : > { %6366 = vmatprep.subr.bf16.mxu0 %v7141_v0 }
 0xfd1   : > { %6368 = vmatpush3.bf16.msra.mxu0 %v7270_v45 }
 0xfd2   : > { %6393 = vmatprep.subr.bf16.mxu0 %v7141_v0 }
0x1087   : > { %v1246_v9 = vpop.f32.mrb[12].mxu0 }
0x1088   : > { %v1250_v10 = vmul.f32 %v1246_v9, %v7588_v8  ;;  %v4958_v11 = vpop.f32.mrb[13].mxu0 }
0x108a   : > { %v1251_v13 = vsel %vm446_vm1, %v1250_v10, 0.0 }
0x108b   : > { %1252 = vadd.xlane.f32.xlu0 %v1251_v13 }
0x1118   : > { %v1253_v17 = vpop.xlane.xlu0 %1252 }
0x1119   : > { %v1257_v19 = vmul.f32 %v7071_v16, %v1253_v17  ;;  %vm1416_vm13 = vcmp.eq.f32.partialorder %v1253_v17, 0.0 }
0x111a   : > { %v1417_v48 = vsel %vm1416_vm13, 1e-08, %v1253_v17 }
0x111b   : > { %v1258_v20 = vmul.f32 %v1257_v19, %v7560_v56 }
0x111d   : > { %v7612_v22 = vadd.f32 %v1258_v20, %v1246_v9 }
0x111f   : > { %4992 = vmatmul.mubr.f32.vlgmr.msra.gmra.mrb[12].mxu1 %v7612_v22 }
0x1120   : > { %6371 = vmatpush3.bf16.msra.mxu1 %v7205_v12  ;;  %5061 = vmatprep.mubr.msk.f32.mxu1 %vm7142_vm0, %v7143_v1 }
0x1121   : > { %6372 = vmatprep.subr.bf16.mxu1 %v7141_v0 }
0x1124   : > { %6374 = vmatpush3.bf16.msra.mxu1 %v7216_v18 }
0x1125   : > { %6375 = vmatprep.subr.bf16.mxu1 %v7141_v0 }
0x1128   : > { %6377 = vmatpush3.bf16.msra.mxu1 %v7228_v24 }
0x1129   : > { %6378 = vmatprep.subr.bf16.mxu1 %v7141_v0 }
0x112c   : > { %6380 = vmatpush3.bf16.msra.mxu1 %v7240_v30 }
0x112d   : > { %6381 = vmatprep.subr.bf16.mxu1 %v7141_v0 }
0x1130   : > { %6383 = vmatpush3.bf16.msra.mxu1 %v7252_v36 }
0x1131   : > { %6384 = vmatprep.subr.bf16.mxu1 %v7141_v0 }
0x1134   : > { %6386 = vmatpush3.bf16.msra.mxu1 %v7264_v42 }
0x1135   : > { %6387 = vmatprep.subr.bf16.mxu1 %v7141_v0 }
0x1138   : > { %6389 = vmatpush3.bf16.msra.mxu1 %v7280_v46 }
0x1139   : > { %6390 = vmatprep.subr.bf16.mxu1 %v7141_v0 }
0x113c   : > { %6392 = vmatpush3.bf16.msra.mxu1 %v7288_v50 }
0x113d   : > { %6417 = vmatprep.subr.bf16.mxu1 %v7141_v0 }
0x11f2   : > { %v1326_v23 = vpop.f32.mrb[12].mxu1 }
0x11f3   : > { %v1330_v25 = vmul.f32 %v1326_v23, %v7612_v22  ;;  %v4993_v26 = vpop.f32.mrb[13].mxu1 }
0x11f5   : > { %v1331_v28 = vsel %vm446_vm1, %v1330_v25, 0.0 }
0x11f6   : > { %1332 = vadd.xlane.f32.xlu1 %v1331_v28 }
0x1283   : > { %v1333_v29 = vpop.xlane.xlu1 %1332 }
0x1284   : > { %vm1334_vm12 = vcmp.eq.f32.partialorder %v1333_v29, 0.0 }
0x1285   : > { %v1335_v31 = vsel %vm1334_vm12, 1e-08, %v1333_v29 }
0x1286   : > { %7072 = vrcp.f32 %v1335_v31 }
0x1287   : > { %7074 = vrcp.f32 %v1417_v48 }
0x1290   : > { %v7073_v32 = vpop.eup %7072 }
0x1291   : > { %v1337_v34 = vmul.f32 %v7073_v32, %v1253_v17  ;;  %v7075_v49 = vpop.eup %7074 }
0x1293   : > { %v1338_v35 = vmul.f32 %v1337_v34, %v7612_v22  ;;  %v1340_v37 = vmul.f32 %v1337_v34, %v1326_v23 }
0x1295   : > { %v7637_v38 = vadd.f32 %v1338_v35, %v7585_v6  ;;  %v7640_v40 = vsub.f32 %v7588_v8, %v1340_v37 }
0x1297   : > { %5027 = vmatmul.mubr.f32.vlgmr.msra.gmra.mrb[14].mxu0 %v7640_v40 }
0x1298   : > { %6395 = vmatpush3.bf16.msra.mxu0 %v7189_v5  ;;  %5096 = vmatprep.mubr.msk.f32.mxu0 %vm7142_vm0, %v7143_v1 }
0x1299   : > { %6396 = vmatprep.subr.bf16.mxu0 %v7141_v0 }
0x129c   : > { %6398 = vmatpush3.bf16.msra.mxu0 %v7198_v7 }
0x129d   : > { %6399 = vmatprep.subr.bf16.mxu0 %v7141_v0 }
0x12a0   : > { %6401 = vmatpush3.bf16.msra.mxu0 %v7210_v15 }
0x12a1   : > { %6402 = vmatprep.subr.bf16.mxu0 %v7141_v0 }
0x12a4   : > { %6404 = vmatpush3.bf16.msra.mxu0 %v7222_v21 }
0x12a5   : > { %6405 = vmatprep.subr.bf16.mxu0 %v7141_v0 }
0x12a8   : > { %6407 = vmatpush3.bf16.msra.mxu0 %v7234_v27 }
0x12a9   : > { %6408 = vmatprep.subr.bf16.mxu0 %v7141_v0 }
0x12ac   : > { %6410 = vmatpush3.bf16.msra.mxu0 %v7246_v33 }
0x12ad   : > { %6411 = vmatprep.subr.bf16.mxu0 %v7141_v0 }
0x12b0   : > { %6413 = vmatpush3.bf16.msra.mxu0 %v7258_v39 }
0x12b1   : > { %6414 = vmatprep.subr.bf16.mxu0 %v7141_v0 }
0x12b4   : > { %6416 = vmatpush3.bf16.msra.mxu0 %v7270_v45 }
0x12b5   : > { %6441 = vmatprep.subr.bf16.mxu0 %v7141_v0 }
0x136a   : > { %v1408_v41 = vpop.f32.mrb[14].mxu0 }
0x136b   : > { %v1412_v43 = vmul.f32 %v1408_v41, %v7640_v40  ;;  %v5028_v44 = vpop.f32.mrb[15].mxu0 }
0x136d   : > { %v1413_v47 = vsel %vm446_vm1, %v1412_v43, 0.0 }
0x136e   : > { %1414 = vadd.xlane.f32.xlu0 %v1413_v47 }
0x13fb   : > { %v1415_v51 = vpop.xlane.xlu0 %1414 }
0x13fc   : > { %v1419_v52 = vmul.f32 %v7075_v49, %v1415_v51  ;;  %vm1578_vm15 = vcmp.eq.f32.partialorder %v1415_v51, 0.0 }
0x13fd   : > { %v1579_v11 = vsel %vm1578_vm15, 1e-08, %v1415_v51 }
0x13fe   : > { %v1420_v53 = vmul.f32 %v1419_v52, %v7612_v22 }
0x1400   : > { %v7664_v54 = vadd.f32 %v1420_v53, %v1408_v41 }
0x1402   : > { %5062 = vmatmul.mubr.f32.vlgmr.msra.gmra.mrb[14].mxu1 %v7664_v54 }
0x1403   : > { %6419 = vmatpush3.bf16.msra.mxu1 %v7205_v12  ;;  %5131 = vmatprep.mubr.msk.f32.mxu1 %vm7142_vm0, %v7143_v1 }
0x1404   : > { %6420 = vmatprep.subr.bf16.mxu1 %v7141_v0 }
0x1407   : > { %6422 = vmatpush3.bf16.msra.mxu1 %v7216_v18 }
0x1408   : > { %6423 = vmatprep.subr.bf16.mxu1 %v7141_v0 }
0x140b   : > { %6425 = vmatpush3.bf16.msra.mxu1 %v7228_v24 }
0x140c   : > { %6426 = vmatprep.subr.bf16.mxu1 %v7141_v0 }
0x140f   : > { %6428 = vmatpush3.bf16.msra.mxu1 %v7240_v30 }
0x1410   : > { %6429 = vmatprep.subr.bf16.mxu1 %v7141_v0 }
0x1413   : > { %6431 = vmatpush3.bf16.msra.mxu1 %v7252_v36 }
0x1414   : > { %6432 = vmatprep.subr.bf16.mxu1 %v7141_v0 }
0x1417   : > { %6434 = vmatpush3.bf16.msra.mxu1 %v7264_v42 }
0x1418   : > { %6435 = vmatprep.subr.bf16.mxu1 %v7141_v0 }
0x141b   : > { %6437 = vmatpush3.bf16.msra.mxu1 %v7280_v46 }
0x141c   : > { %6438 = vmatprep.subr.bf16.mxu1 %v7141_v0 }
0x141f   : > { %6440 = vmatpush3.bf16.msra.mxu1 %v7288_v50 }
0x1420   : > { %6465 = vmatprep.subr.bf16.mxu1 %v7141_v0 }
0x14d5   : > { %v1488_v55 = vpop.f32.mrb[14].mxu1 }
0x14d6   : > { %v1492_v56 = vmul.f32 %v1488_v55, %v7664_v54  ;;  %v5063_v57 = vpop.f32.mrb[15].mxu1 }
0x14d8   : > { %v1493_v58 = vsel %vm446_vm1, %v1492_v56, 0.0 }
0x14d9   : > { %1494 = vadd.xlane.f32.xlu1 %v1493_v58 }
0x1566   : > { %v1495_v59 = vpop.xlane.xlu1 %1494 }
0x1567   : > { %vm1496_vm14 = vcmp.eq.f32.partialorder %v1495_v59, 0.0 }
0x1568   : > { %v1497_v60 = vsel %vm1496_vm14, 1e-08, %v1495_v59 }
0x1569   : > { %7076 = vrcp.f32 %v1497_v60 }
0x156a   : > { %7078 = vrcp.f32 %v1579_v11 }
0x1573   : > { %v7077_v61 = vpop.eup %7076 }
0x1574   : > { %v1499_v62 = vmul.f32 %v7077_v61, %v1415_v51  ;;  %v7079_v13 = vpop.eup %7078 }
0x1576   : > { %v1500_v63 = vmul.f32 %v1499_v62, %v7664_v54  ;;  %v1502_v2 = vmul.f32 %v1499_v62, %v1488_v55 }
0x1578   : > { %v7689_v3 = vadd.f32 %v1500_v63, %v7637_v38  ;;  %v7692_v4 = vsub.f32 %v7640_v40, %v1502_v2 }
0x157a   : > { %5097 = vmatmul.mubr.f32.vlgmr.msra.gmra.mrb[16].mxu0 %v7692_v4 }
0x157b   : > { %6443 = vmatpush3.bf16.msra.mxu0 %v7189_v5  ;;  %5166 = vmatprep.mubr.msk.f32.mxu0 %vm7142_vm0, %v7143_v1 }
0x157c   : > { %6444 = vmatprep.subr.bf16.mxu0 %v7141_v0 }
0x157f   : > { %6446 = vmatpush3.bf16.msra.mxu0 %v7198_v7 }
0x1580   : > { %6447 = vmatprep.subr.bf16.mxu0 %v7141_v0 }
0x1583   : > { %6449 = vmatpush3.bf16.msra.mxu0 %v7210_v15 }
0x1584   : > { %6450 = vmatprep.subr.bf16.mxu0 %v7141_v0 }
0x1587   : > { %6452 = vmatpush3.bf16.msra.mxu0 %v7222_v21 }
0x1588   : > { %6453 = vmatprep.subr.bf16.mxu0 %v7141_v0 }
0x158b   : > { %6455 = vmatpush3.bf16.msra.mxu0 %v7234_v27 }
0x158c   : > { %6456 = vmatprep.subr.bf16.mxu0 %v7141_v0 }
0x158f   : > { %6458 = vmatpush3.bf16.msra.mxu0 %v7246_v33 }
0x1590   : > { %6459 = vmatprep.subr.bf16.mxu0 %v7141_v0 }
0x1593   : > { %6461 = vmatpush3.bf16.msra.mxu0 %v7258_v39 }
0x1594   : > { %6462 = vmatprep.subr.bf16.mxu0 %v7141_v0 }
0x1597   : > { %6464 = vmatpush3.bf16.msra.mxu0 %v7270_v45 }
0x1598   : > { %6489 = vmatprep.subr.bf16.mxu0 %v7141_v0 }
0x164d   : > { %v1570_v6 = vpop.f32.mrb[16].mxu0 }
0x164e   : > { %v1574_v8 = vmul.f32 %v1570_v6, %v7692_v4  ;;  %v5098_v9 = vpop.f32.mrb[17].mxu0 }
0x1650   : > { %v1575_v10 = vsel %vm446_vm1, %v1574_v8, 0.0 }
0x1651   : > { %1576 = vadd.xlane.f32.xlu0 %v1575_v10 }
0x16de   : > { %v1577_v14 = vpop.xlane.xlu0 %1576 }
0x16df   : > { %v1581_v16 = vmul.f32 %v7079_v13, %v1577_v14  ;;  %vm1740_vm3 = vcmp.eq.f32.partialorder %v1577_v14, 0.0 }
0x16e0   : > { %v1741_v44 = vsel %vm1740_vm3, 1e-08, %v1577_v14 }
0x16e1   : > { %v1582_v17 = vmul.f32 %v1581_v16, %v7664_v54 }
0x16e3   : > { %v7716_v19 = vadd.f32 %v1582_v17, %v1570_v6 }
0x16e5   : > { %5132 = vmatmul.mubr.f32.vlgmr.msra.gmra.mrb[16].mxu1 %v7716_v19 }
0x16e6   : > { %6467 = vmatpush3.bf16.msra.mxu1 %v7205_v12  ;;  %5201 = vmatprep.mubr.msk.f32.mxu1 %vm7142_vm0, %v7143_v1 }
0x16e7   : > { %6468 = vmatprep.subr.bf16.mxu1 %v7141_v0 }
0x16ea   : > { %6470 = vmatpush3.bf16.msra.mxu1 %v7216_v18 }
0x16eb   : > { %6471 = vmatprep.subr.bf16.mxu1 %v7141_v0 }
0x16ee   : > { %6473 = vmatpush3.bf16.msra.mxu1 %v7228_v24 }
0x16ef   : > { %6474 = vmatprep.subr.bf16.mxu1 %v7141_v0 }
0x16f2   : > { %6476 = vmatpush3.bf16.msra.mxu1 %v7240_v30 }
0x16f3   : > { %6477 = vmatprep.subr.bf16.mxu1 %v7141_v0 }
0x16f6   : > { %6479 = vmatpush3.bf16.msra.mxu1 %v7252_v36 }
0x16f7   : > { %6480 = vmatprep.subr.bf16.mxu1 %v7141_v0 }
0x16fa   : > { %6482 = vmatpush3.bf16.msra.mxu1 %v7264_v42 }
0x16fb   : > { %6483 = vmatprep.subr.bf16.mxu1 %v7141_v0 }
0x16fe   : > { %6485 = vmatpush3.bf16.msra.mxu1 %v7280_v46 }
0x16ff   : > { %6486 = vmatprep.subr.bf16.mxu1 %v7141_v0 }
0x1702   : > { %6488 = vmatpush3.bf16.msra.mxu1 %v7288_v50 }
0x1703   : > { %6513 = vmatprep.subr.bf16.mxu1 %v7141_v0 }
0x17b8   : > { %v1650_v20 = vpop.f32.mrb[16].mxu1 }
0x17b9   : > { %v1654_v22 = vmul.f32 %v1650_v20, %v7716_v19  ;;  %v5133_v23 = vpop.f32.mrb[17].mxu1 }
0x17bb   : > { %v1655_v25 = vsel %vm446_vm1, %v1654_v22, 0.0 }
0x17bc   : > { %1656 = vadd.xlane.f32.xlu1 %v1655_v25 }
0x1849   : > { %v1657_v26 = vpop.xlane.xlu1 %1656 }
0x184a   : > { %vm1658_vm2 = vcmp.eq.f32.partialorder %v1657_v26, 0.0 }
0x184b   : > { %v1659_v28 = vsel %vm1658_vm2, 1e-08, %v1657_v26 }
0x184c   : > { %7080 = vrcp.f32 %v1659_v28 }
0x184d   : > { %7082 = vrcp.f32 %v1741_v44 }
0x1856   : > { %v7081_v29 = vpop.eup %7080 }
0x1857   : > { %v1661_v31 = vmul.f32 %v7081_v29, %v1577_v14  ;;  %v7083_v47 = vpop.eup %7082 }
0x1859   : > { %v1662_v32 = vmul.f32 %v1661_v31, %v7716_v19  ;;  %v1664_v34 = vmul.f32 %v1661_v31, %v1650_v20 }
0x185b   : > { %v7741_v35 = vadd.f32 %v1662_v32, %v7689_v3  ;;  %v7744_v37 = vsub.f32 %v7692_v4, %v1664_v34 }
0x185d   : > { %5167 = vmatmul.mubr.f32.vlgmr.msra.gmra.mrb[18].mxu0 %v7744_v37 }
0x185e   : > { %6491 = vmatpush3.bf16.msra.mxu0 %v7189_v5  ;;  %5236 = vmatprep.mubr.msk.f32.mxu0 %vm7142_vm0, %v7143_v1 }
0x185f   : > { %6492 = vmatprep.subr.bf16.mxu0 %v7141_v0 }
0x1862   : > { %6494 = vmatpush3.bf16.msra.mxu0 %v7198_v7 }
0x1863   : > { %6495 = vmatprep.subr.bf16.mxu0 %v7141_v0 }
0x1866   : > { %6497 = vmatpush3.bf16.msra.mxu0 %v7210_v15 }
0x1867   : > { %6498 = vmatprep.subr.bf16.mxu0 %v7141_v0 }
0x186a   : > { %6500 = vmatpush3.bf16.msra.mxu0 %v7222_v21 }
0x186b   : > { %6501 = vmatprep.subr.bf16.mxu0 %v7141_v0 }
0x186e   : > { %6503 = vmatpush3.bf16.msra.mxu0 %v7234_v27 }
0x186f   : > { %6504 = vmatprep.subr.bf16.mxu0 %v7141_v0 }
0x1872   : > { %6506 = vmatpush3.bf16.msra.mxu0 %v7246_v33 }
0x1873   : > { %6507 = vmatprep.subr.bf16.mxu0 %v7141_v0 }
0x1876   : > { %6509 = vmatpush3.bf16.msra.mxu0 %v7258_v39 }
0x1877   : > { %6510 = vmatprep.subr.bf16.mxu0 %v7141_v0 }
0x187a   : > { %6512 = vmatpush3.bf16.msra.mxu0 %v7270_v45 }
0x187b   : > { %6537 = vmatprep.subr.bf16.mxu0 %v7141_v0 }
0x1930   : > { %v1732_v38 = vpop.f32.mrb[18].mxu0 }
0x1931   : > { %v1736_v40 = vmul.f32 %v1732_v38, %v7744_v37  ;;  %v5168_v41 = vpop.f32.mrb[19].mxu0 }
0x1933   : > { %v1737_v43 = vsel %vm446_vm1, %v1736_v40, 0.0 }
0x1934   : > { %1738 = vadd.xlane.f32.xlu0 %v1737_v43 }
0x19c1   : > { %v1739_v48 = vpop.xlane.xlu0 %1738 }
0x19c2   : > { %v1743_v49 = vmul.f32 %v7083_v47, %v1739_v48  ;;  %vm1902_vm5 = vcmp.eq.f32.partialorder %v1739_v48, 0.0 }
0x19c3   : > { %v1903_v9 = vsel %vm1902_vm5, 1e-08, %v1739_v48 }
0x19c4   : > { %v1744_v51 = vmul.f32 %v1743_v49, %v7716_v19 }
0x19c6   : > { %v7768_v52 = vadd.f32 %v1744_v51, %v1732_v38 }
0x19c8   : > { %5202 = vmatmul.mubr.f32.vlgmr.msra.gmra.mrb[18].mxu1 %v7768_v52 }
0x19c9   : > { %6515 = vmatpush3.bf16.msra.mxu1 %v7205_v12  ;;  %5271 = vmatprep.mubr.msk.f32.mxu1 %vm7142_vm0, %v7143_v1 }
0x19ca   : > { %6516 = vmatprep.subr.bf16.mxu1 %v7141_v0 }
0x19cd   : > { %6518 = vmatpush3.bf16.msra.mxu1 %v7216_v18 }
0x19ce   : > { %6519 = vmatprep.subr.bf16.mxu1 %v7141_v0 }
0x19d1   : > { %6521 = vmatpush3.bf16.msra.mxu1 %v7228_v24 }
0x19d2   : > { %6522 = vmatprep.subr.bf16.mxu1 %v7141_v0 }
0x19d5   : > { %6524 = vmatpush3.bf16.msra.mxu1 %v7240_v30 }
0x19d6   : > { %6525 = vmatprep.subr.bf16.mxu1 %v7141_v0 }
0x19d9   : > { %6527 = vmatpush3.bf16.msra.mxu1 %v7252_v36 }
0x19da   : > { %6528 = vmatprep.subr.bf16.mxu1 %v7141_v0 }
0x19dd   : > { %6530 = vmatpush3.bf16.msra.mxu1 %v7264_v42 }
0x19de   : > { %6531 = vmatprep.subr.bf16.mxu1 %v7141_v0 }
0x19e1   : > { %6533 = vmatpush3.bf16.msra.mxu1 %v7280_v46 }
0x19e2   : > { %6534 = vmatprep.subr.bf16.mxu1 %v7141_v0 }
0x19e5   : > { %6536 = vmatpush3.bf16.msra.mxu1 %v7288_v50 }
0x19e6   : > { %6561 = vmatprep.subr.bf16.mxu1 %v7141_v0 }
0x1a9b   : > { %v1812_v53 = vpop.f32.mrb[18].mxu1 }
0x1a9c   : > { %v1816_v54 = vmul.f32 %v1812_v53, %v7768_v52  ;;  %v5203_v55 = vpop.f32.mrb[19].mxu1 }
0x1a9e   : > { %v1817_v56 = vsel %vm446_vm1, %v1816_v54, 0.0 }
0x1a9f   : > { %1818 = vadd.xlane.f32.xlu1 %v1817_v56 }
0x1b2c   : > { %v1819_v57 = vpop.xlane.xlu1 %1818 }
0x1b2d   : > { %vm1820_vm4 = vcmp.eq.f32.partialorder %v1819_v57, 0.0 }
0x1b2e   : > { %v1821_v58 = vsel %vm1820_vm4, 1e-08, %v1819_v57 }
0x1b2f   : > { %7084 = vrcp.f32 %v1821_v58 }
0x1b30   : > { %7086 = vrcp.f32 %v1903_v9 }
0x1b39   : > { %v7085_v59 = vpop.eup %7084 }
0x1b3a   : > { %v1823_v60 = vmul.f32 %v7085_v59, %v1739_v48  ;;  %v7087_v10 = vpop.eup %7086 }
0x1b3c   : > { %v1824_v61 = vmul.f32 %v1823_v60, %v7768_v52  ;;  %v1826_v62 = vmul.f32 %v1823_v60, %v1812_v53 }
0x1b3e   : > { %v7793_v63 = vadd.f32 %v1824_v61, %v7741_v35  ;;  %v7796_v2 = vsub.f32 %v7744_v37, %v1826_v62 }
0x1b40   : > { %5237 = vmatmul.mubr.f32.vlgmr.msra.gmra.mrb[20].mxu0 %v7796_v2 }
0x1b41   : > { %6539 = vmatpush3.bf16.msra.mxu0 %v7189_v5  ;;  %5306 = vmatprep.mubr.msk.f32.mxu0 %vm7142_vm0, %v7143_v1 }
0x1b42   : > { %6540 = vmatprep.subr.bf16.mxu0 %v7141_v0 }
0x1b45   : > { %6542 = vmatpush3.bf16.msra.mxu0 %v7198_v7 }
0x1b46   : > { %6543 = vmatprep.subr.bf16.mxu0 %v7141_v0 }
0x1b49   : > { %6545 = vmatpush3.bf16.msra.mxu0 %v7210_v15 }
0x1b4a   : > { %6546 = vmatprep.subr.bf16.mxu0 %v7141_v0 }
0x1b4d   : > { %6548 = vmatpush3.bf16.msra.mxu0 %v7222_v21 }
0x1b4e   : > { %6549 = vmatprep.subr.bf16.mxu0 %v7141_v0 }
0x1b51   : > { %6551 = vmatpush3.bf16.msra.mxu0 %v7234_v27 }
0x1b52   : > { %6552 = vmatprep.subr.bf16.mxu0 %v7141_v0 }
0x1b55   : > { %6554 = vmatpush3.bf16.msra.mxu0 %v7246_v33 }
0x1b56   : > { %6555 = vmatprep.subr.bf16.mxu0 %v7141_v0 }
0x1b59   : > { %6557 = vmatpush3.bf16.msra.mxu0 %v7258_v39 }
0x1b5a   : > { %6558 = vmatprep.subr.bf16.mxu0 %v7141_v0 }
0x1b5d   : > { %6560 = vmatpush3.bf16.msra.mxu0 %v7270_v45 }
0x1b5e   : > { %6585 = vmatprep.subr.bf16.mxu0 %v7141_v0 }
0x1c13   : > { %v1894_v3 = vpop.f32.mrb[20].mxu0 }
0x1c14   : > { %v1898_v4 = vmul.f32 %v1894_v3, %v7796_v2  ;;  %v5238_v6 = vpop.f32.mrb[21].mxu0 }
0x1c16   : > { %v1899_v8 = vsel %vm446_vm1, %v1898_v4, 0.0 }
0x1c17   : > { %1900 = vadd.xlane.f32.xlu0 %v1899_v8 }
0x1ca4   : > { %v1901_v11 = vpop.xlane.xlu0 %1900 }
0x1ca5   : > { %v1905_v13 = vmul.f32 %v7087_v10, %v1901_v11  ;;  %vm2064_vm7 = vcmp.eq.f32.partialorder %v1901_v11, 0.0 }
0x1ca6   : > { %v2065_v41 = vsel %vm2064_vm7, 1e-08, %v1901_v11 }
0x1ca7   : > { %v1906_v14 = vmul.f32 %v1905_v13, %v7768_v52 }
0x1ca9   : > { %v7820_v16 = vadd.f32 %v1906_v14, %v1894_v3 }
0x1cab   : > { %5272 = vmatmul.mubr.f32.vlgmr.msra.gmra.mrb[20].mxu1 %v7820_v16 }
0x1cac   : > { %6563 = vmatpush3.bf16.msra.mxu1 %v7205_v12  ;;  %5341 = vmatprep.mubr.msk.f32.mxu1 %vm7142_vm0, %v7143_v1 }
0x1cad   : > { %6564 = vmatprep.subr.bf16.mxu1 %v7141_v0 }
0x1cb0   : > { %6566 = vmatpush3.bf16.msra.mxu1 %v7216_v18 }
0x1cb1   : > { %6567 = vmatprep.subr.bf16.mxu1 %v7141_v0 }
0x1cb4   : > { %6569 = vmatpush3.bf16.msra.mxu1 %v7228_v24 }
0x1cb5   : > { %6570 = vmatprep.subr.bf16.mxu1 %v7141_v0 }
0x1cb8   : > { %6572 = vmatpush3.bf16.msra.mxu1 %v7240_v30 }
0x1cb9   : > { %6573 = vmatprep.subr.bf16.mxu1 %v7141_v0 }
0x1cbc   : > { %6575 = vmatpush3.bf16.msra.mxu1 %v7252_v36 }
0x1cbd   : > { %6576 = vmatprep.subr.bf16.mxu1 %v7141_v0 }
0x1cc0   : > { %6578 = vmatpush3.bf16.msra.mxu1 %v7264_v42 }
0x1cc1   : > { %6579 = vmatprep.subr.bf16.mxu1 %v7141_v0 }
0x1cc4   : > { %6581 = vmatpush3.bf16.msra.mxu1 %v7280_v46 }
0x1cc5   : > { %6582 = vmatprep.subr.bf16.mxu1 %v7141_v0 }
0x1cc8   : > { %6584 = vmatpush3.bf16.msra.mxu1 %v7288_v50 }
0x1cc9   : > { %6609 = vmatprep.subr.bf16.mxu1 %v7141_v0 }
0x1d7e   : > { %v1974_v17 = vpop.f32.mrb[20].mxu1 }
0x1d7f   : > { %v1978_v19 = vmul.f32 %v1974_v17, %v7820_v16  ;;  %v5273_v20 = vpop.f32.mrb[21].mxu1 }
0x1d81   : > { %v1979_v22 = vsel %vm446_vm1, %v1978_v19, 0.0 }
0x1d82   : > { %1980 = vadd.xlane.f32.xlu1 %v1979_v22 }
0x1e0f   : > { %v1981_v23 = vpop.xlane.xlu1 %1980 }
0x1e10   : > { %vm1982_vm6 = vcmp.eq.f32.partialorder %v1981_v23, 0.0 }
0x1e11   : > { %v1983_v25 = vsel %vm1982_vm6, 1e-08, %v1981_v23 }
0x1e12   : > { %7088 = vrcp.f32 %v1983_v25 }
0x1e13   : > { %7090 = vrcp.f32 %v2065_v41 }
0x1e1c   : > { %v7089_v26 = vpop.eup %7088 }
0x1e1d   : > { %v1985_v28 = vmul.f32 %v7089_v26, %v1901_v11  ;;  %v7091_v43 = vpop.eup %7090 }
0x1e1f   : > { %v1986_v29 = vmul.f32 %v1985_v28, %v7820_v16  ;;  %v1988_v31 = vmul.f32 %v1985_v28, %v1974_v17 }
0x1e21   : > { %v7845_v32 = vadd.f32 %v1986_v29, %v7793_v63  ;;  %v7848_v34 = vsub.f32 %v7796_v2, %v1988_v31 }
0x1e23   : > { %5307 = vmatmul.mubr.f32.vlgmr.msra.gmra.mrb[22].mxu0 %v7848_v34 }
0x1e24   : > { %6587 = vmatpush3.bf16.msra.mxu0 %v7189_v5  ;;  %5376 = vmatprep.mubr.msk.f32.mxu0 %vm7142_vm0, %v7143_v1 }
0x1e25   : > { %6588 = vmatprep.subr.bf16.mxu0 %v7141_v0 }
0x1e28   : > { %6590 = vmatpush3.bf16.msra.mxu0 %v7198_v7 }
0x1e29   : > { %6591 = vmatprep.subr.bf16.mxu0 %v7141_v0 }
0x1e2c   : > { %6593 = vmatpush3.bf16.msra.mxu0 %v7210_v15 }
0x1e2d   : > { %6594 = vmatprep.subr.bf16.mxu0 %v7141_v0 }
0x1e30   : > { %6596 = vmatpush3.bf16.msra.mxu0 %v7222_v21 }
0x1e31   : > { %6597 = vmatprep.subr.bf16.mxu0 %v7141_v0 }
0x1e34   : > { %6599 = vmatpush3.bf16.msra.mxu0 %v7234_v27 }
0x1e35   : > { %6600 = vmatprep.subr.bf16.mxu0 %v7141_v0 }
0x1e38   : > { %6602 = vmatpush3.bf16.msra.mxu0 %v7246_v33 }
0x1e39   : > { %6603 = vmatprep.subr.bf16.mxu0 %v7141_v0 }
0x1e3c   : > { %6605 = vmatpush3.bf16.msra.mxu0 %v7258_v39 }
0x1e3d   : > { %6606 = vmatprep.subr.bf16.mxu0 %v7141_v0 }
0x1e40   : > { %6608 = vmatpush3.bf16.msra.mxu0 %v7270_v45 }
0x1e41   : > { %6633 = vmatprep.subr.bf16.mxu0 %v7141_v0 }
0x1ef6   : > { %v2056_v35 = vpop.f32.mrb[22].mxu0 }
0x1ef7   : > { %v2060_v37 = vmul.f32 %v2056_v35, %v7848_v34  ;;  %v5308_v38 = vpop.f32.mrb[23].mxu0 }
0x1ef9   : > { %v2061_v40 = vsel %vm446_vm1, %v2060_v37, 0.0 }
0x1efa   : > { %2062 = vadd.xlane.f32.xlu0 %v2061_v40 }
0x1f87   : > { %v2063_v44 = vpop.xlane.xlu0 %2062 }
0x1f88   : > { %v2067_v47 = vmul.f32 %v7091_v43, %v2063_v44  ;;  %vm2226_vm9 = vcmp.eq.f32.partialorder %v2063_v44, 0.0 }
0x1f89   : > { %v2227_v6 = vsel %vm2226_vm9, 1e-08, %v2063_v44 }
0x1f8a   : > { %v2068_v48 = vmul.f32 %v2067_v47, %v7820_v16 }
0x1f8c   : > { %v7872_v49 = vadd.f32 %v2068_v48, %v2056_v35 }
0x1f8e   : > { %5342 = vmatmul.mubr.f32.vlgmr.msra.gmra.mrb[22].mxu1 %v7872_v49 }
0x1f8f   : > { %6611 = vmatpush3.bf16.msra.mxu1 %v7205_v12  ;;  %5411 = vmatprep.mubr.msk.f32.mxu1 %vm7142_vm0, %v7143_v1 }
0x1f90   : > { %6612 = vmatprep.subr.bf16.mxu1 %v7141_v0 }
0x1f93   : > { %6614 = vmatpush3.bf16.msra.mxu1 %v7216_v18 }
0x1f94   : > { %6615 = vmatprep.subr.bf16.mxu1 %v7141_v0 }
0x1f97   : > { %6617 = vmatpush3.bf16.msra.mxu1 %v7228_v24 }
0x1f98   : > { %6618 = vmatprep.subr.bf16.mxu1 %v7141_v0 }
0x1f9b   : > { %6620 = vmatpush3.bf16.msra.mxu1 %v7240_v30 }
0x1f9c   : > { %6621 = vmatprep.subr.bf16.mxu1 %v7141_v0 }
0x1f9f   : > { %6623 = vmatpush3.bf16.msra.mxu1 %v7252_v36 }
0x1fa0   : > { %6624 = vmatprep.subr.bf16.mxu1 %v7141_v0 }
0x1fa3   : > { %6626 = vmatpush3.bf16.msra.mxu1 %v7264_v42 }
0x1fa4   : > { %6627 = vmatprep.subr.bf16.mxu1 %v7141_v0 }
0x1fa7   : > { %6629 = vmatpush3.bf16.msra.mxu1 %v7280_v46 }
0x1fa8   : > { %6630 = vmatprep.subr.bf16.mxu1 %v7141_v0 }
0x1fab   : > { %6632 = vmatpush3.bf16.msra.mxu1 %v7288_v50 }
0x1fac   : > { %6657 = vmatprep.subr.bf16.mxu1 %v7141_v0 }
0x2061   : > { %v2136_v51 = vpop.f32.mrb[22].mxu1 }
0x2062   : > { %v2140_v52 = vmul.f32 %v2136_v51, %v7872_v49  ;;  %v5343_v53 = vpop.f32.mrb[23].mxu1 }
0x2064   : > { %v2141_v54 = vsel %vm446_vm1, %v2140_v52, 0.0 }
0x2065   : > { %2142 = vadd.xlane.f32.xlu1 %v2141_v54 }
0x20f2   : > { %v2143_v55 = vpop.xlane.xlu1 %2142 }
0x20f3   : > { %vm2144_vm8 = vcmp.eq.f32.partialorder %v2143_v55, 0.0 }
0x20f4   : > { %v2145_v56 = vsel %vm2144_vm8, 1e-08, %v2143_v55 }
0x20f5   : > { %7092 = vrcp.f32 %v2145_v56 }
0x20f6   : > { %7094 = vrcp.f32 %v2227_v6 }
0x20ff   : > { %v7093_v57 = vpop.eup %7092 }
0x2100   : > { %v2147_v58 = vmul.f32 %v7093_v57, %v2063_v44  ;;  %v7095_v8 = vpop.eup %7094 }
0x2102   : > { %v2148_v59 = vmul.f32 %v2147_v58, %v7872_v49  ;;  %v2150_v60 = vmul.f32 %v2147_v58, %v2136_v51 }
0x2104   : > { %v7897_v61 = vadd.f32 %v2148_v59, %v7845_v32  ;;  %v7900_v62 = vsub.f32 %v7848_v34, %v2150_v60 }
0x2106   : > { %5377 = vmatmul.mubr.f32.vlgmr.msra.gmra.mrb[24].mxu0 %v7900_v62 }
0x2107   : > { %6635 = vmatpush3.bf16.msra.mxu0 %v7189_v5  ;;  %5446 = vmatprep.mubr.msk.f32.mxu0 %vm7142_vm0, %v7143_v1 }
0x2108   : > { %6636 = vmatprep.subr.bf16.mxu0 %v7141_v0 }
0x210b   : > { %6638 = vmatpush3.bf16.msra.mxu0 %v7198_v7 }
0x210c   : > { %6639 = vmatprep.subr.bf16.mxu0 %v7141_v0 }
0x210f   : > { %6641 = vmatpush3.bf16.msra.mxu0 %v7210_v15 }
0x2110   : > { %6642 = vmatprep.subr.bf16.mxu0 %v7141_v0 }
0x2113   : > { %6644 = vmatpush3.bf16.msra.mxu0 %v7222_v21 }
0x2114   : > { %6645 = vmatprep.subr.bf16.mxu0 %v7141_v0 }
0x2117   : > { %6647 = vmatpush3.bf16.msra.mxu0 %v7234_v27 }
0x2118   : > { %6648 = vmatprep.subr.bf16.mxu0 %v7141_v0 }
0x211b   : > { %6650 = vmatpush3.bf16.msra.mxu0 %v7246_v33 }
0x211c   : > { %6651 = vmatprep.subr.bf16.mxu0 %v7141_v0 }
0x211f   : > { %6653 = vmatpush3.bf16.msra.mxu0 %v7258_v39 }
0x2120   : > { %6654 = vmatprep.subr.bf16.mxu0 %v7141_v0 }
0x2123   : > { %6656 = vmatpush3.bf16.msra.mxu0 %v7270_v45 }
0x2124   : > { %6681 = vmatprep.subr.bf16.mxu0 %v7141_v0 }
0x21d9   : > { %v2218_v63 = vpop.f32.mrb[24].mxu0 }
0x21da   : > { %v2222_v2 = vmul.f32 %v2218_v63, %v7900_v62  ;;  %v5378_v3 = vpop.f32.mrb[25].mxu0 }
0x21dc   : > { %v2223_v4 = vsel %vm446_vm1, %v2222_v2, 0.0 }
0x21dd   : > { %2224 = vadd.xlane.f32.xlu0 %v2223_v4 }
0x226a   : > { %v2225_v9 = vpop.xlane.xlu0 %2224 }
0x226b   : > { %v2229_v10 = vmul.f32 %v7095_v8, %v2225_v9  ;;  %vm2388_vm11 = vcmp.eq.f32.partialorder %v2225_v9, 0.0 }
0x226c   : > { %v2389_v38 = vsel %vm2388_vm11, 1e-08, %v2225_v9 }
0x226d   : > { %v2230_v11 = vmul.f32 %v2229_v10, %v7872_v49 }
0x226f   : > { %v7924_v13 = vadd.f32 %v2230_v11, %v2218_v63 }
0x2271   : > { %5412 = vmatmul.mubr.f32.vlgmr.msra.gmra.mrb[24].mxu1 %v7924_v13 }
0x2272   : > { %6659 = vmatpush3.bf16.msra.mxu1 %v7205_v12  ;;  %5481 = vmatprep.mubr.msk.f32.mxu1 %vm7142_vm0, %v7143_v1 }
0x2273   : > { %6660 = vmatprep.subr.bf16.mxu1 %v7141_v0 }
0x2276   : > { %6662 = vmatpush3.bf16.msra.mxu1 %v7216_v18 }
0x2277   : > { %6663 = vmatprep.subr.bf16.mxu1 %v7141_v0 }
0x227a   : > { %6665 = vmatpush3.bf16.msra.mxu1 %v7228_v24 }
0x227b   : > { %6666 = vmatprep.subr.bf16.mxu1 %v7141_v0 }
0x227e   : > { %6668 = vmatpush3.bf16.msra.mxu1 %v7240_v30 }
0x227f   : > { %6669 = vmatprep.subr.bf16.mxu1 %v7141_v0 }
0x2282   : > { %6671 = vmatpush3.bf16.msra.mxu1 %v7252_v36 }
0x2283   : > { %6672 = vmatprep.subr.bf16.mxu1 %v7141_v0 }
0x2286   : > { %6674 = vmatpush3.bf16.msra.mxu1 %v7264_v42 }
0x2287   : > { %6675 = vmatprep.subr.bf16.mxu1 %v7141_v0 }
0x228a   : > { %6677 = vmatpush3.bf16.msra.mxu1 %v7280_v46 }
0x228b   : > { %6678 = vmatprep.subr.bf16.mxu1 %v7141_v0 }
0x228e   : > { %6680 = vmatpush3.bf16.msra.mxu1 %v7288_v50 }
0x228f   : > { %6705 = vmatprep.subr.bf16.mxu1 %v7141_v0 }
0x2344   : > { %v2298_v14 = vpop.f32.mrb[24].mxu1 }
0x2345   : > { %v2302_v16 = vmul.f32 %v2298_v14, %v7924_v13  ;;  %v5413_v17 = vpop.f32.mrb[25].mxu1 }
0x2347   : > { %v2303_v19 = vsel %vm446_vm1, %v2302_v16, 0.0 }
0x2348   : > { %2304 = vadd.xlane.f32.xlu1 %v2303_v19 }
0x23d5   : > { %v2305_v20 = vpop.xlane.xlu1 %2304 }
0x23d6   : > { %vm2306_vm10 = vcmp.eq.f32.partialorder %v2305_v20, 0.0 }
0x23d7   : > { %v2307_v22 = vsel %vm2306_vm10, 1e-08, %v2305_v20 }
0x23d8   : > { %7096 = vrcp.f32 %v2307_v22 }
0x23d9   : > { %7098 = vrcp.f32 %v2389_v38 }
0x23e2   : > { %v7097_v23 = vpop.eup %7096 }
0x23e3   : > { %v2309_v25 = vmul.f32 %v7097_v23, %v2225_v9  ;;  %v7099_v40 = vpop.eup %7098 }
0x23e5   : > { %v2310_v26 = vmul.f32 %v2309_v25, %v7924_v13  ;;  %v2312_v28 = vmul.f32 %v2309_v25, %v2298_v14 }
0x23e7   : > { %v7949_v29 = vadd.f32 %v2310_v26, %v7897_v61  ;;  %v7952_v31 = vsub.f32 %v7900_v62, %v2312_v28 }
0x23e9   : > { %5447 = vmatmul.mubr.f32.vlgmr.msra.gmra.mrb[26].mxu0 %v7952_v31 }
0x23ea   : > { %6683 = vmatpush3.bf16.msra.mxu0 %v7189_v5  ;;  %5516 = vmatprep.mubr.msk.f32.mxu0 %vm7142_vm0, %v7143_v1 }
0x23eb   : > { %6684 = vmatprep.subr.bf16.mxu0 %v7141_v0 }
0x23ee   : > { %6686 = vmatpush3.bf16.msra.mxu0 %v7198_v7 }
0x23ef   : > { %6687 = vmatprep.subr.bf16.mxu0 %v7141_v0 }
0x23f2   : > { %6689 = vmatpush3.bf16.msra.mxu0 %v7210_v15 }
0x23f3   : > { %6690 = vmatprep.subr.bf16.mxu0 %v7141_v0 }
0x23f6   : > { %6692 = vmatpush3.bf16.msra.mxu0 %v7222_v21 }
0x23f7   : > { %6693 = vmatprep.subr.bf16.mxu0 %v7141_v0 }
0x23fa   : > { %6695 = vmatpush3.bf16.msra.mxu0 %v7234_v27 }
0x23fb   : > { %6696 = vmatprep.subr.bf16.mxu0 %v7141_v0 }
0x23fe   : > { %6698 = vmatpush3.bf16.msra.mxu0 %v7246_v33 }
0x23ff   : > { %6699 = vmatprep.subr.bf16.mxu0 %v7141_v0 }
0x2402   : > { %6701 = vmatpush3.bf16.msra.mxu0 %v7258_v39 }
0x2403   : > { %6702 = vmatprep.subr.bf16.mxu0 %v7141_v0 }
0x2406   : > { %6704 = vmatpush3.bf16.msra.mxu0 %v7270_v45 }
0x2407   : > { %6729 = vmatprep.subr.bf16.mxu0 %v7141_v0 }
0x24bc   : > { %v2380_v32 = vpop.f32.mrb[26].mxu0 }
0x24bd   : > { %v2384_v34 = vmul.f32 %v2380_v32, %v7952_v31  ;;  %v5448_v35 = vpop.f32.mrb[27].mxu0 }
0x24bf   : > { %v2385_v37 = vsel %vm446_vm1, %v2384_v34, 0.0 }
0x24c0   : > { %2386 = vadd.xlane.f32.xlu0 %v2385_v37 }
0x254d   : > { %v2387_v41 = vpop.xlane.xlu0 %2386 }
0x254e   : > { %v2391_v43 = vmul.f32 %v7099_v40, %v2387_v41  ;;  %vm2550_vm13 = vcmp.eq.f32.partialorder %v2387_v41, 0.0 }
0x254f   : > { %v2551_v3 = vsel %vm2550_vm13, 1e-08, %v2387_v41 }
0x2550   : > { %v2392_v44 = vmul.f32 %v2391_v43, %v7924_v13 }
0x2552   : > { %v7976_v47 = vadd.f32 %v2392_v44, %v2380_v32 }
0x2554   : > { %5482 = vmatmul.mubr.f32.vlgmr.msra.gmra.mrb[26].mxu1 %v7976_v47 }
0x2555   : > { %6707 = vmatpush3.bf16.msra.mxu1 %v7205_v12  ;;  %5551 = vmatprep.mubr.msk.f32.mxu1 %vm7142_vm0, %v7143_v1 }
0x2556   : > { %6708 = vmatprep.subr.bf16.mxu1 %v7141_v0 }
0x2559   : > { %6710 = vmatpush3.bf16.msra.mxu1 %v7216_v18 }
0x255a   : > { %6711 = vmatprep.subr.bf16.mxu1 %v7141_v0 }
0x255d   : > { %6713 = vmatpush3.bf16.msra.mxu1 %v7228_v24 }
0x255e   : > { %6714 = vmatprep.subr.bf16.mxu1 %v7141_v0 }
0x2561   : > { %6716 = vmatpush3.bf16.msra.mxu1 %v7240_v30 }
0x2562   : > { %6717 = vmatprep.subr.bf16.mxu1 %v7141_v0 }
0x2565   : > { %6719 = vmatpush3.bf16.msra.mxu1 %v7252_v36 }
0x2566   : > { %6720 = vmatprep.subr.bf16.mxu1 %v7141_v0 }
0x2569   : > { %6722 = vmatpush3.bf16.msra.mxu1 %v7264_v42 }
0x256a   : > { %6723 = vmatprep.subr.bf16.mxu1 %v7141_v0 }
0x256d   : > { %6725 = vmatpush3.bf16.msra.mxu1 %v7280_v46 }
0x256e   : > { %6726 = vmatprep.subr.bf16.mxu1 %v7141_v0 }
0x2571   : > { %6728 = vmatpush3.bf16.msra.mxu1 %v7288_v50 }
0x2572   : > { %6753 = vmatprep.subr.bf16.mxu1 %v7141_v0 }
0x2627   : > { %v2460_v48 = vpop.f32.mrb[26].mxu1 }
0x2628   : > { %v2464_v49 = vmul.f32 %v2460_v48, %v7976_v47  ;;  %v5483_v51 = vpop.f32.mrb[27].mxu1 }
0x262a   : > { %v2465_v52 = vsel %vm446_vm1, %v2464_v49, 0.0 }
0x262b   : > { %2466 = vadd.xlane.f32.xlu1 %v2465_v52 }
0x26b8   : > { %v2467_v53 = vpop.xlane.xlu1 %2466 }
0x26b9   : > { %vm2468_vm12 = vcmp.eq.f32.partialorder %v2467_v53, 0.0 }
0x26ba   : > { %v2469_v54 = vsel %vm2468_vm12, 1e-08, %v2467_v53  ;;  %vm3690_vm12 = vcmask 0  }
0x26bb   : > { %7100 = vrcp.f32 %v2469_v54 }
0x26bc   : > { %7102 = vrcp.f32 %v2551_v3 }
0x26c5   : > { %v7101_v55 = vpop.eup %7100 }
0x26c6   : > { %v2471_v56 = vmul.f32 %v7101_v55, %v2387_v41  ;;  %v7103_v4 = vpop.eup %7102 }
0x26c8   : > { %v2472_v57 = vmul.f32 %v2471_v56, %v7976_v47  ;;  %v2474_v58 = vmul.f32 %v2471_v56, %v2460_v48 }
0x26ca   : > { %v8001_v59 = vadd.f32 %v2472_v57, %v7949_v29  ;;  %v8004_v60 = vsub.f32 %v7952_v31, %v2474_v58 }
0x26cc   : > { %5517 = vmatmul.mubr.f32.vlgmr.msra.gmra.mrb[28].mxu0 %v8004_v60 }
0x26cd   : > { %6731 = vmatpush3.bf16.msra.mxu0 %v7189_v5  ;;  %5586 = vmatprep.mubr.msk.f32.mxu0 %vm7142_vm0, %v7143_v1 }
0x26ce   : > { %6732 = vmatprep.subr.bf16.mxu0 %v7141_v0 }
0x26d1   : > { %6734 = vmatpush3.bf16.msra.mxu0 %v7198_v7 }
0x26d2   : > { %6735 = vmatprep.subr.bf16.mxu0 %v7141_v0 }
0x26d5   : > { %6737 = vmatpush3.bf16.msra.mxu0 %v7210_v15 }
0x26d6   : > { %6738 = vmatprep.subr.bf16.mxu0 %v7141_v0 }
0x26d9   : > { %6740 = vmatpush3.bf16.msra.mxu0 %v7222_v21 }
0x26da   : > { %6741 = vmatprep.subr.bf16.mxu0 %v7141_v0 }
0x26dd   : > { %6743 = vmatpush3.bf16.msra.mxu0 %v7234_v27 }
0x26de   : > { %6744 = vmatprep.subr.bf16.mxu0 %v7141_v0 }
0x26e1   : > { %6746 = vmatpush3.bf16.msra.mxu0 %v7246_v33 }
0x26e2   : > { %6747 = vmatprep.subr.bf16.mxu0 %v7141_v0 }
0x26e5   : > { %6749 = vmatpush3.bf16.msra.mxu0 %v7258_v39 }
0x26e6   : > { %6750 = vmatprep.subr.bf16.mxu0 %v7141_v0 }
0x26e9   : > { %6752 = vmatpush3.bf16.msra.mxu0 %v7270_v45 }
0x26ea   : > { %6777 = vmatprep.subr.bf16.mxu0 %v7141_v0 }
0x279f   : > { %v2542_v61 = vpop.f32.mrb[28].mxu0 }
0x27a0   : > { %v2546_v62 = vmul.f32 %v2542_v61, %v8004_v60  ;;  %v5518_v63 = vpop.f32.mrb[29].mxu0 }
0x27a2   : > { %v2547_v2 = vsel %vm446_vm1, %v2546_v62, 0.0 }
0x27a3   : > { %2548 = vadd.xlane.f32.xlu0 %v2547_v2 }
0x2830   : > { %v2549_v6 = vpop.xlane.xlu0 %2548 }
0x2831   : > { %v2553_v8 = vmul.f32 %v7103_v4, %v2549_v6  ;;  %vm2712_vm15 = vcmp.eq.f32.partialorder %v2549_v6, 0.0 }
0x2832   : > { %v2713_v35 = vsel %vm2712_vm15, 1e-08, %v2549_v6 }
0x2833   : > { %v2554_v9 = vmul.f32 %v2553_v8, %v7976_v47 }
0x2835   : > { %v8028_v10 = vadd.f32 %v2554_v9, %v2542_v61 }
0x2837   : > { %5552 = vmatmul.mubr.f32.vlgmr.msra.gmra.mrb[28].mxu1 %v8028_v10 }
0x2838   : > { %6755 = vmatpush3.bf16.msra.mxu1 %v7205_v12  ;;  %5621 = vmatprep.mubr.msk.f32.mxu1 %vm7142_vm0, %v7143_v1 }
0x2839   : > { %6756 = vmatprep.subr.bf16.mxu1 %v7141_v0 }
0x283c   : > { %6758 = vmatpush3.bf16.msra.mxu1 %v7216_v18 }
0x283d   : > { %6759 = vmatprep.subr.bf16.mxu1 %v7141_v0 }
0x2840   : > { %6761 = vmatpush3.bf16.msra.mxu1 %v7228_v24 }
0x2841   : > { %6762 = vmatprep.subr.bf16.mxu1 %v7141_v0 }
0x2844   : > { %6764 = vmatpush3.bf16.msra.mxu1 %v7240_v30 }
0x2845   : > { %6765 = vmatprep.subr.bf16.mxu1 %v7141_v0 }
0x2848   : > { %6767 = vmatpush3.bf16.msra.mxu1 %v7252_v36 }
0x2849   : > { %6768 = vmatprep.subr.bf16.mxu1 %v7141_v0 }
0x284c   : > { %6770 = vmatpush3.bf16.msra.mxu1 %v7264_v42 }
0x284d   : > { %6771 = vmatprep.subr.bf16.mxu1 %v7141_v0 }
0x2850   : > { %6773 = vmatpush3.bf16.msra.mxu1 %v7280_v46 }
0x2851   : > { %6774 = vmatprep.subr.bf16.mxu1 %v7141_v0 }
0x2854   : > { %6776 = vmatpush3.bf16.msra.mxu1 %v7288_v50 }
0x2855   : > { %6801 = vmatprep.subr.bf16.mxu1 %v7141_v0 }
0x290a   : > { %v2622_v11 = vpop.f32.mrb[28].mxu1 }
0x290b   : > { %v2626_v13 = vmul.f32 %v2622_v11, %v8028_v10  ;;  %v5553_v14 = vpop.f32.mrb[29].mxu1 }
0x290d   : > { %v2627_v16 = vsel %vm446_vm1, %v2626_v13, 0.0 }
0x290e   : > { %2628 = vadd.xlane.f32.xlu1 %v2627_v16 }
0x299b   : > { %v2629_v17 = vpop.xlane.xlu1 %2628 }
0x299c   : > { %vm2630_vm14 = vcmp.eq.f32.partialorder %v2629_v17, 0.0 }
0x299d   : > { %v2631_v19 = vsel %vm2630_vm14, 1e-08, %v2629_v17 }
0x299e   : > { %7104 = vrcp.f32 %v2631_v19 }
0x299f   : > { %7106 = vrcp.f32 %v2713_v35 }
0x29a8   : > { %v7105_v20 = vpop.eup %7104 }
0x29a9   : > { %v2633_v22 = vmul.f32 %v7105_v20, %v2549_v6  ;;  %v7107_v37 = vpop.eup %7106 }
0x29ab   : > { %v2634_v23 = vmul.f32 %v2633_v22, %v8028_v10  ;;  %v2636_v25 = vmul.f32 %v2633_v22, %v2622_v11 }
0x29ad   : > { %v8053_v26 = vadd.f32 %v2634_v23, %v8001_v59  ;;  %v8056_v28 = vsub.f32 %v8004_v60, %v2636_v25 }
0x29af   : > { %5587 = vmatmul.mubr.f32.vlgmr.msra.gmra.mrb[30].mxu0 %v8056_v28 }
0x29b0   : > { %6779 = vmatpush3.bf16.msra.mxu0 %v7189_v5  ;;  %5656 = vmatprep.mubr.msk.f32.mxu0 %vm7142_vm0, %v7143_v1 }
0x29b1   : > { %6780 = vmatprep.subr.bf16.mxu0 %v7141_v0 }
0x29b4   : > { %6782 = vmatpush3.bf16.msra.mxu0 %v7198_v7 }
0x29b5   : > { %6783 = vmatprep.subr.bf16.mxu0 %v7141_v0 }
0x29b8   : > { %6785 = vmatpush3.bf16.msra.mxu0 %v7210_v15 }
0x29b9   : > { %6786 = vmatprep.subr.bf16.mxu0 %v7141_v0 }
0x29bc   : > { %6788 = vmatpush3.bf16.msra.mxu0 %v7222_v21 }
0x29bd   : > { %6789 = vmatprep.subr.bf16.mxu0 %v7141_v0 }
0x29c0   : > { %6791 = vmatpush3.bf16.msra.mxu0 %v7234_v27 }
0x29c1   : > { %6792 = vmatprep.subr.bf16.mxu0 %v7141_v0 }
0x29c4   : > { %6794 = vmatpush3.bf16.msra.mxu0 %v7246_v33 }
0x29c5   : > { %6795 = vmatprep.subr.bf16.mxu0 %v7141_v0 }
0x29c8   : > { %6797 = vmatpush3.bf16.msra.mxu0 %v7258_v39 }
0x29c9   : > { %6798 = vmatprep.subr.bf16.mxu0 %v7141_v0 }
0x29cc   : > { %6800 = vmatpush3.bf16.msra.mxu0 %v7270_v45 }
0x29cd   : > { %6825 = vmatprep.subr.bf16.mxu0 %v7141_v0 }
0x2a82   : > { %v2704_v29 = vpop.f32.mrb[30].mxu0 }
0x2a83   : > { %v2708_v31 = vmul.f32 %v2704_v29, %v8056_v28  ;;  %v5588_v32 = vpop.f32.mrb[31].mxu0 }
0x2a85   : > { %v2709_v34 = vsel %vm446_vm1, %v2708_v31, 0.0 }
0x2a86   : > { %2710 = vadd.xlane.f32.xlu0 %v2709_v34 }
0x2b13   : > { %v2711_v38 = vpop.xlane.xlu0 %2710 }
0x2b14   : > { %v2715_v40 = vmul.f32 %v7107_v37, %v2711_v38  ;;  %vm2874_vm3 = vcmp.eq.f32.partialorder %v2711_v38, 0.0 }
0x2b15   : > { %v2875_v63 = vsel %vm2874_vm3, 1e-08, %v2711_v38 }
0x2b16   : > { %v2716_v41 = vmul.f32 %v2715_v40, %v8028_v10 }
0x2b18   : > { %v8080_v43 = vadd.f32 %v2716_v41, %v2704_v29 }
0x2b1a   : > { %5622 = vmatmul.mubr.f32.vlgmr.msra.gmra.mrb[30].mxu1 %v8080_v43 }
0x2b1b   : > { %6803 = vmatpush3.bf16.msra.mxu1 %v7205_v12  ;;  %5691 = vmatprep.mubr.msk.f32.mxu1 %vm7142_vm0, %v7143_v1 }
0x2b1c   : > { %6804 = vmatprep.subr.bf16.mxu1 %v7141_v0 }
0x2b1f   : > { %6806 = vmatpush3.bf16.msra.mxu1 %v7216_v18 }
0x2b20   : > { %6807 = vmatprep.subr.bf16.mxu1 %v7141_v0 }
0x2b23   : > { %6809 = vmatpush3.bf16.msra.mxu1 %v7228_v24 }
0x2b24   : > { %6810 = vmatprep.subr.bf16.mxu1 %v7141_v0 }
0x2b27   : > { %6812 = vmatpush3.bf16.msra.mxu1 %v7240_v30 }
0x2b28   : > { %6813 = vmatprep.subr.bf16.mxu1 %v7141_v0 }
0x2b2b   : > { %6815 = vmatpush3.bf16.msra.mxu1 %v7252_v36 }
0x2b2c   : > { %6816 = vmatprep.subr.bf16.mxu1 %v7141_v0 }
0x2b2f   : > { %6818 = vmatpush3.bf16.msra.mxu1 %v7264_v42 }
0x2b30   : > { %6819 = vmatprep.subr.bf16.mxu1 %v7141_v0 }
0x2b33   : > { %6821 = vmatpush3.bf16.msra.mxu1 %v7280_v46 }
0x2b34   : > { %6822 = vmatprep.subr.bf16.mxu1 %v7141_v0 }
0x2b37   : > { %6824 = vmatpush3.bf16.msra.mxu1 %v7288_v50 }
0x2b38   : > { %6849 = vmatprep.subr.bf16.mxu1 %v7141_v0 }
0x2bed   : > { %v2784_v44 = vpop.f32.mrb[30].mxu1 }
0x2bee   : > { %v2788_v47 = vmul.f32 %v2784_v44, %v8080_v43  ;;  %v5623_v48 = vpop.f32.mrb[31].mxu1 }
0x2bf0   : > { %v2789_v49 = vsel %vm446_vm1, %v2788_v47, 0.0 }
0x2bf1   : > { %2790 = vadd.xlane.f32.xlu1 %v2789_v49 }
0x2c7e   : > { %v2791_v51 = vpop.xlane.xlu1 %2790 }
0x2c7f   : > { %vm2792_vm2 = vcmp.eq.f32.partialorder %v2791_v51, 0.0 }
0x2c80   : > { %v2793_v52 = vsel %vm2792_vm2, 1e-08, %v2791_v51 }
0x2c81   : > { %7108 = vrcp.f32 %v2793_v52 }
0x2c82   : > { %7110 = vrcp.f32 %v2875_v63 }
0x2c8b   : > { %v7109_v53 = vpop.eup %7108 }
0x2c8c   : > { %v2795_v54 = vmul.f32 %v7109_v53, %v2711_v38  ;;  %v7111_v2 = vpop.eup %7110 }
0x2c8e   : > { %v2796_v55 = vmul.f32 %v2795_v54, %v8080_v43  ;;  %v2798_v56 = vmul.f32 %v2795_v54, %v2784_v44 }
0x2c90   : > { %v8105_v57 = vadd.f32 %v2796_v55, %v8053_v26  ;;  %v8108_v58 = vsub.f32 %v8056_v28, %v2798_v56 }
0x2c92   : > { %5657 = vmatmul.mubr.f32.vlgmr.msra.gmra.mrb[32].mxu0 %v8108_v58 }
0x2c93   : > { %6827 = vmatpush3.bf16.msra.mxu0 %v7189_v5  ;;  %5726 = vmatprep.mubr.msk.f32.mxu0 %vm7142_vm0, %v7143_v1 }
0x2c94   : > { %6828 = vmatprep.subr.bf16.mxu0 %v7141_v0 }
0x2c97   : > { %6830 = vmatpush3.bf16.msra.mxu0 %v7198_v7 }
0x2c98   : > { %6831 = vmatprep.subr.bf16.mxu0 %v7141_v0 }
0x2c9b   : > { %6833 = vmatpush3.bf16.msra.mxu0 %v7210_v15 }
0x2c9c   : > { %6834 = vmatprep.subr.bf16.mxu0 %v7141_v0 }
0x2c9f   : > { %6836 = vmatpush3.bf16.msra.mxu0 %v7222_v21 }
0x2ca0   : > { %6837 = vmatprep.subr.bf16.mxu0 %v7141_v0 }
0x2ca3   : > { %6839 = vmatpush3.bf16.msra.mxu0 %v7234_v27 }
0x2ca4   : > { %6840 = vmatprep.subr.bf16.mxu0 %v7141_v0 }
0x2ca7   : > { %6842 = vmatpush3.bf16.msra.mxu0 %v7246_v33 }
0x2ca8   : > { %6843 = vmatprep.subr.bf16.mxu0 %v7141_v0 }
0x2cab   : > { %6845 = vmatpush3.bf16.msra.mxu0 %v7258_v39 }
0x2cac   : > { %6846 = vmatprep.subr.bf16.mxu0 %v7141_v0 }
0x2caf   : > { %6848 = vmatpush3.bf16.msra.mxu0 %v7270_v45 }
0x2cb0   : > { %6873 = vmatprep.subr.bf16.mxu0 %v7141_v0 }
0x2d65   : > { %v2866_v59 = vpop.f32.mrb[32].mxu0 }
0x2d66   : > { %v2870_v60 = vmul.f32 %v2866_v59, %v8108_v58  ;;  %v5658_v61 = vpop.f32.mrb[33].mxu0 }
0x2d68   : > { %v2871_v62 = vsel %vm446_vm1, %v2870_v60, 0.0 }
0x2d69   : > { %2872 = vadd.xlane.f32.xlu0 %v2871_v62 }
0x2df6   : > { %v2873_v3 = vpop.xlane.xlu0 %2872 }
0x2df7   : > { %v2877_v4 = vmul.f32 %v7111_v2, %v2873_v3  ;;  %vm3036_vm5 = vcmp.eq.f32.partialorder %v2873_v3, 0.0 }
0x2df8   : > { %v3037_v32 = vsel %vm3036_vm5, 1e-08, %v2873_v3 }
0x2df9   : > { %v2878_v6 = vmul.f32 %v2877_v4, %v8080_v43 }
0x2dfb   : > { %v8132_v8 = vadd.f32 %v2878_v6, %v2866_v59 }
0x2dfd   : > { %5692 = vmatmul.mubr.f32.vlgmr.msra.gmra.mrb[32].mxu1 %v8132_v8 }
0x2dfe   : > { %6851 = vmatpush3.bf16.msra.mxu1 %v7205_v12  ;;  %5761 = vmatprep.mubr.msk.f32.mxu1 %vm7142_vm0, %v7143_v1 }
0x2dff   : > { %6852 = vmatprep.subr.bf16.mxu1 %v7141_v0 }
0x2e02   : > { %6854 = vmatpush3.bf16.msra.mxu1 %v7216_v18 }
0x2e03   : > { %6855 = vmatprep.subr.bf16.mxu1 %v7141_v0 }
0x2e06   : > { %6857 = vmatpush3.bf16.msra.mxu1 %v7228_v24 }
0x2e07   : > { %6858 = vmatprep.subr.bf16.mxu1 %v7141_v0 }
0x2e0a   : > { %6860 = vmatpush3.bf16.msra.mxu1 %v7240_v30 }
0x2e0b   : > { %6861 = vmatprep.subr.bf16.mxu1 %v7141_v0 }
0x2e0e   : > { %6863 = vmatpush3.bf16.msra.mxu1 %v7252_v36 }
0x2e0f   : > { %6864 = vmatprep.subr.bf16.mxu1 %v7141_v0 }
0x2e12   : > { %6866 = vmatpush3.bf16.msra.mxu1 %v7264_v42 }
0x2e13   : > { %6867 = vmatprep.subr.bf16.mxu1 %v7141_v0 }
0x2e16   : > { %6869 = vmatpush3.bf16.msra.mxu1 %v7280_v46 }
0x2e17   : > { %6870 = vmatprep.subr.bf16.mxu1 %v7141_v0 }
0x2e1a   : > { %6872 = vmatpush3.bf16.msra.mxu1 %v7288_v50 }
0x2e1b   : > { %6897 = vmatprep.subr.bf16.mxu1 %v7141_v0 }
0x2ed0   : > { %v2946_v9 = vpop.f32.mrb[32].mxu1 }
0x2ed1   : > { %v2950_v10 = vmul.f32 %v2946_v9, %v8132_v8  ;;  %v5693_v11 = vpop.f32.mrb[33].mxu1 }
0x2ed3   : > { %v2951_v13 = vsel %vm446_vm1, %v2950_v10, 0.0 }
0x2ed4   : > { %2952 = vadd.xlane.f32.xlu1 %v2951_v13 }
0x2f61   : > { %v2953_v14 = vpop.xlane.xlu1 %2952 }
0x2f62   : > { %vm2954_vm4 = vcmp.eq.f32.partialorder %v2953_v14, 0.0 }
0x2f63   : > { %v2955_v16 = vsel %vm2954_vm4, 1e-08, %v2953_v14 }
0x2f64   : > { %7112 = vrcp.f32 %v2955_v16 }
0x2f65   : > { %7114 = vrcp.f32 %v3037_v32 }
0x2f6e   : > { %v7113_v17 = vpop.eup %7112 }
0x2f6f   : > { %v2957_v19 = vmul.f32 %v7113_v17, %v2873_v3  ;;  %v7115_v34 = vpop.eup %7114 }
0x2f71   : > { %v2958_v20 = vmul.f32 %v2957_v19, %v8132_v8  ;;  %v2960_v22 = vmul.f32 %v2957_v19, %v2946_v9 }
0x2f73   : > { %v8157_v23 = vsub.f32 %v8108_v58, %v2960_v22  ;;  %v8160_v25 = vadd.f32 %v2958_v20, %v8105_v57 }
0x2f75   : > { %5727 = vmatmul.mubr.f32.vlgmr.msra.gmra.mrb[34].mxu0 %v8157_v23 }
0x2f76   : > { %6875 = vmatpush3.bf16.msra.mxu0 %v7189_v5  ;;  %5796 = vmatprep.mubr.msk.f32.mxu0 %vm7142_vm0, %v7143_v1 }
0x2f77   : > { %6876 = vmatprep.subr.bf16.mxu0 %v7141_v0 }
0x2f7a   : > { %6878 = vmatpush3.bf16.msra.mxu0 %v7198_v7 }
0x2f7b   : > { %6879 = vmatprep.subr.bf16.mxu0 %v7141_v0 }
0x2f7e   : > { %6881 = vmatpush3.bf16.msra.mxu0 %v7210_v15 }
0x2f7f   : > { %6882 = vmatprep.subr.bf16.mxu0 %v7141_v0 }
0x2f82   : > { %6884 = vmatpush3.bf16.msra.mxu0 %v7222_v21 }
0x2f83   : > { %6885 = vmatprep.subr.bf16.mxu0 %v7141_v0 }
0x2f86   : > { %6887 = vmatpush3.bf16.msra.mxu0 %v7234_v27 }
0x2f87   : > { %6888 = vmatprep.subr.bf16.mxu0 %v7141_v0 }
0x2f8a   : > { %6890 = vmatpush3.bf16.msra.mxu0 %v7246_v33 }
0x2f8b   : > { %6891 = vmatprep.subr.bf16.mxu0 %v7141_v0 }
0x2f8e   : > { %6893 = vmatpush3.bf16.msra.mxu0 %v7258_v39 }
0x2f8f   : > { %6894 = vmatprep.subr.bf16.mxu0 %v7141_v0 }
0x2f92   : > { %6896 = vmatpush3.bf16.msra.mxu0 %v7270_v45 }
0x2f93   : > { %6921 = vmatprep.subr.bf16.mxu0 %v7141_v0 }
0x3048   : > { %v3028_v26 = vpop.f32.mrb[34].mxu0 }
0x3049   : > { %v3032_v28 = vmul.f32 %v3028_v26, %v8157_v23  ;;  %v5728_v29 = vpop.f32.mrb[35].mxu0 }
0x304b   : > { %v3033_v31 = vsel %vm446_vm1, %v3032_v28, 0.0 }
0x304c   : > { %3034 = vadd.xlane.f32.xlu0 %v3033_v31 }
0x30d9   : > { %v3035_v35 = vpop.xlane.xlu0 %3034 }
0x30da   : > { %v3039_v37 = vmul.f32 %v7115_v34, %v3035_v35  ;;  %vm3198_vm7 = vcmp.eq.f32.partialorder %v3035_v35, 0.0 }
0x30db   : > { %v3199_v61 = vsel %vm3198_vm7, 1e-08, %v3035_v35 }
0x30dc   : > { %v3040_v38 = vmul.f32 %v3039_v37, %v8132_v8 }
0x30de   : > { %v8184_v40 = vadd.f32 %v3040_v38, %v3028_v26 }
0x30e0   : > { %5762 = vmatmul.mubr.f32.vlgmr.msra.gmra.mrb[34].mxu1 %v8184_v40 }
0x30e1   : > { %6899 = vmatpush3.bf16.msra.mxu1 %v7205_v12  ;;  %5831 = vmatprep.mubr.msk.f32.mxu1 %vm7142_vm0, %v7143_v1 }
0x30e2   : > { %6900 = vmatprep.subr.bf16.mxu1 %v7141_v0 }
0x30e5   : > { %6902 = vmatpush3.bf16.msra.mxu1 %v7216_v18 }
0x30e6   : > { %6903 = vmatprep.subr.bf16.mxu1 %v7141_v0 }
0x30e9   : > { %6905 = vmatpush3.bf16.msra.mxu1 %v7228_v24 }
0x30ea   : > { %6906 = vmatprep.subr.bf16.mxu1 %v7141_v0 }
0x30ed   : > { %6908 = vmatpush3.bf16.msra.mxu1 %v7240_v30 }
0x30ee   : > { %6909 = vmatprep.subr.bf16.mxu1 %v7141_v0 }
0x30f1   : > { %6911 = vmatpush3.bf16.msra.mxu1 %v7252_v36 }
0x30f2   : > { %6912 = vmatprep.subr.bf16.mxu1 %v7141_v0 }
0x30f5   : > { %6914 = vmatpush3.bf16.msra.mxu1 %v7264_v42 }
0x30f6   : > { %6915 = vmatprep.subr.bf16.mxu1 %v7141_v0 }
0x30f9   : > { %6917 = vmatpush3.bf16.msra.mxu1 %v7280_v46 }
0x30fa   : > { %6918 = vmatprep.subr.bf16.mxu1 %v7141_v0 }
0x30fd   : > { %6920 = vmatpush3.bf16.msra.mxu1 %v7288_v50 }
0x30fe   : > { %6945 = vmatprep.subr.bf16.mxu1 %v7141_v0 }
0x31b3   : > { %v3108_v41 = vpop.f32.mrb[34].mxu1 }
0x31b4   : > { %v3112_v43 = vmul.f32 %v3108_v41, %v8184_v40  ;;  %v5763_v44 = vpop.f32.mrb[35].mxu1 }
0x31b6   : > { %v3113_v47 = vsel %vm446_vm1, %v3112_v43, 0.0 }
0x31b7   : > { %3114 = vadd.xlane.f32.xlu1 %v3113_v47 }
0x3244   : > { %v3115_v48 = vpop.xlane.xlu1 %3114 }
0x3245   : > { %vm3116_vm6 = vcmp.eq.f32.partialorder %v3115_v48, 0.0 }
0x3246   : > { %v3117_v49 = vsel %vm3116_vm6, 1e-08, %v3115_v48 }
0x3247   : > { %7116 = vrcp.f32 %v3117_v49 }
0x3248   : > { %7118 = vrcp.f32 %v3199_v61 }
0x3251   : > { %v7117_v51 = vpop.eup %7116 }
0x3252   : > { %v3119_v52 = vmul.f32 %v7117_v51, %v3035_v35  ;;  %v7119_v62 = vpop.eup %7118 }
0x3254   : > { %v3120_v53 = vmul.f32 %v3119_v52, %v8184_v40  ;;  %v3122_v54 = vmul.f32 %v3119_v52, %v3108_v41 }
0x3256   : > { %v8209_v55 = vsub.f32 %v8157_v23, %v3122_v54  ;;  %v8212_v56 = vadd.f32 %v3120_v53, %v8160_v25 }
0x3258   : > { %5797 = vmatmul.mubr.f32.vlgmr.msra.gmra.mrb[36].mxu0 %v8209_v55 }
0x3259   : > { %6923 = vmatpush3.bf16.msra.mxu0 %v7189_v5  ;;  %5866 = vmatprep.mubr.msk.f32.mxu0 %vm7142_vm0, %v7143_v1 }
0x325a   : > { %6924 = vmatprep.subr.bf16.mxu0 %v7141_v0 }
0x325d   : > { %6926 = vmatpush3.bf16.msra.mxu0 %v7198_v7 }
0x325e   : > { %6927 = vmatprep.subr.bf16.mxu0 %v7141_v0 }
0x3261   : > { %6929 = vmatpush3.bf16.msra.mxu0 %v7210_v15 }
0x3262   : > { %6930 = vmatprep.subr.bf16.mxu0 %v7141_v0 }
0x3265   : > { %6932 = vmatpush3.bf16.msra.mxu0 %v7222_v21 }
0x3266   : > { %6933 = vmatprep.subr.bf16.mxu0 %v7141_v0 }
0x3269   : > { %6935 = vmatpush3.bf16.msra.mxu0 %v7234_v27 }
0x326a   : > { %6936 = vmatprep.subr.bf16.mxu0 %v7141_v0 }
0x326d   : > { %6938 = vmatpush3.bf16.msra.mxu0 %v7246_v33 }
0x326e   : > { %6939 = vmatprep.subr.bf16.mxu0 %v7141_v0 }
0x3271   : > { %6941 = vmatpush3.bf16.msra.mxu0 %v7258_v39 }
0x3272   : > { %6942 = vmatprep.subr.bf16.mxu0 %v7141_v0 }
0x3275   : > { %6944 = vmatpush3.bf16.msra.mxu0 %v7270_v45 }
0x3276   : > { %6969 = vmatprep.subr.bf16.mxu0 %v7141_v0 }
0x332b   : > { %v3190_v57 = vpop.f32.mrb[36].mxu0 }
0x332c   : > { %v3194_v58 = vmul.f32 %v3190_v57, %v8209_v55  ;;  %v5798_v59 = vpop.f32.mrb[37].mxu0 }
0x332e   : > { %v3195_v60 = vsel %vm446_vm1, %v3194_v58, 0.0  ;;  %v7132_v58 = vld [vmem:[%s7277_s23] sm:$0x1] }
0x332f   : > { %3196 = vadd.xlane.f32.xlu0 %v3195_v60 }
0x33bc   : > { %v3197_v63 = vpop.xlane.xlu0 %3196 }
0x33bd   : > { %v3201_v2 = vmul.f32 %v7119_v62, %v3197_v63  ;;  %vm3360_vm9 = vcmp.eq.f32.partialorder %v3197_v63, 0.0 }
0x33bf   : > { %v3202_v3 = vmul.f32 %v3201_v2, %v8184_v40 }
0x33c1   : > { %v8236_v4 = vadd.f32 %v3202_v3, %v3190_v57 }
0x33c3   : > { %5832 = vmatmul.mubr.f32.vlgmr.msra.gmra.mrb[36].mxu1 %v8236_v4 }
0x33c4   : > { %6947 = vmatpush3.bf16.msra.mxu1 %v7205_v12  ;;  %5901 = vmatprep.mubr.msk.f32.mxu1 %vm7142_vm0, %v7143_v1 }
0x33c5   : > { %6948 = vmatprep.subr.bf16.mxu1 %v7141_v0 }
0x33c8   : > { %6950 = vmatpush3.bf16.msra.mxu1 %v7216_v18 }
0x33c9   : > { %6951 = vmatprep.subr.bf16.mxu1 %v7141_v0 }
0x33cc   : > { %6953 = vmatpush3.bf16.msra.mxu1 %v7228_v24 }
0x33cd   : > { %6954 = vmatprep.subr.bf16.mxu1 %v7141_v0 }
0x33d0   : > { %6956 = vmatpush3.bf16.msra.mxu1 %v7240_v30 }
0x33d1   : > { %6957 = vmatprep.subr.bf16.mxu1 %v7141_v0 }
0x33d4   : > { %6959 = vmatpush3.bf16.msra.mxu1 %v7252_v36 }
0x33d5   : > { %6960 = vmatprep.subr.bf16.mxu1 %v7141_v0 }
0x33d8   : > { %6962 = vmatpush3.bf16.msra.mxu1 %v7264_v42 }
0x33d9   : > { %6963 = vmatprep.subr.bf16.mxu1 %v7141_v0 }
0x33dc   : > { %6965 = vmatpush3.bf16.msra.mxu1 %v7280_v46 }
0x33dd   : > { %6966 = vmatprep.subr.bf16.mxu1 %v7141_v0 }
0x33e0   : > { %6968 = vmatpush3.bf16.msra.mxu1 %v7288_v50 }
0x33e1   : > { %6993 = vmatprep.subr.bf16.mxu1 %v7141_v0 }
0x3496   : > { %v3270_v6 = vpop.f32.mrb[36].mxu1 }
0x3497   : > { %v3274_v8 = vmul.f32 %v3270_v6, %v8236_v4  ;;  %v5833_v9 = vpop.f32.mrb[37].mxu1 }
0x3499   : > { %v3275_v10 = vsel %vm446_vm1, %v3274_v8, 0.0 }
0x349a   : > { %3276 = vadd.xlane.f32.xlu1 %v3275_v10 }
0x3527   : > { %v3277_v11 = vpop.xlane.xlu1 %3276 }
0x3528   : > { %vm3278_vm8 = vcmp.eq.f32.partialorder %v3277_v11, 0.0 }
0x3529   : > { %v3279_v13 = vsel %vm3278_vm8, 1e-08, %v3277_v11 }
0x352a   : > { %7120 = vrcp.f32 %v3279_v13 }
0x3534   : > { %v7121_v14 = vpop.eup %7120 }
0x3535   : > { %v3281_v16 = vmul.f32 %v7121_v14, %v3197_v63 }
0x3537   : > { %v3284_v17 = vmul.f32 %v3281_v16, %v3270_v6  ;;  %v3282_v19 = vmul.f32 %v3281_v16, %v8236_v4 }
0x3539   : > { %v8261_v20 = vsub.f32 %v8209_v55, %v3284_v17  ;;  %v8264_v22 = vadd.f32 %v3282_v19, %v8212_v56 }
0x353b   : > { %5867 = vmatmul.mubr.f32.vlgmr.msra.gmra.mrb[38].mxu0 %v8261_v20 }
0x353c   : > { %6971 = vmatpush3.bf16.msra.mxu0 %v7189_v5  ;;  %5936 = vmatprep.mubr.msk.f32.mxu0 %vm7142_vm0, %v7143_v1 }
0x353d   : > { %6972 = vmatprep.subr.bf16.mxu0 %v7141_v0 }
0x3540   : > { %6974 = vmatpush3.bf16.msra.mxu0 %v7198_v7 }
0x3541   : > { %6975 = vmatprep.subr.bf16.mxu0 %v7141_v0 }
0x3544   : > { %6977 = vmatpush3.bf16.msra.mxu0 %v7210_v15 }
0x3545   : > { %6978 = vmatprep.subr.bf16.mxu0 %v7141_v0 }
0x3548   : > { %6980 = vmatpush3.bf16.msra.mxu0 %v7222_v21 }
0x3549   : > { %6981 = vmatprep.subr.bf16.mxu0 %v7141_v0 }
0x354c   : > { %6983 = vmatpush3.bf16.msra.mxu0 %v7234_v27  ;;  %v3361_v27 = vsel %vm3360_vm9, 1e-08, %v3197_v63 }
0x354d   : > { %6984 = vmatprep.subr.bf16.mxu0 %v7141_v0  ;;  %7122 = vrcp.f32 %v3361_v27 }
0x3550   : > { %6986 = vmatpush3.bf16.msra.mxu0 %v7246_v33 }
0x3551   : > { %6987 = vmatprep.subr.bf16.mxu0 %v7141_v0 }
0x3554   : > { %6989 = vmatpush3.bf16.msra.mxu0 %v7258_v39 }
0x3555   : > { %6990 = vmatprep.subr.bf16.mxu0 %v7141_v0 }
0x3557   : > { %v7123_v33 = vpop.eup %7122 }
0x3558   : > { %6992 = vmatpush3.bf16.msra.mxu0 %v7270_v45 }
0x3559   : > { %7017 = vmatprep.subr.bf16.mxu0 %v7141_v0 }
0x360e   : > { %v3352_v5 = vpop.f32.mrb[38].mxu0 }
0x360f   : > { %v3356_v7 = vmul.f32 %v3352_v5, %v8261_v20  ;;  %v5868_v15 = vpop.f32.mrb[39].mxu0 }
0x3611   : > { %v3357_v21 = vsel %vm446_vm1, %v3356_v7, 0.0 }
0x3612   : > { %3358 = vadd.xlane.f32.xlu0 %v3357_v21 }
0x369f   : > { %v3359_v23 = vpop.xlane.xlu0 %3358 }
0x36a0   : > { %v3363_v25 = vmul.f32 %v7123_v33, %v3359_v23 }
0x36a2   : > { %v3364_v39 = vmul.f32 %v3363_v25, %v8236_v4 }
0x36a4   : > { %v3365_v26 = vadd.f32 %v3364_v39, %v3352_v5 }
0x36a6   : > { %5902 = vmatmul.mubr.f32.vlgmr.msra.gmra.mrb[38].mxu1 %v3365_v26 }
0x36a7   : > { %6995 = vmatpush3.bf16.msra.mxu1 %v7205_v12  ;;  %5971 = vmatprep.mubr.msk.f32.mxu1 %vm7142_vm0, %v7143_v1 }
0x36a8   : > { %6996 = vmatprep.subr.bf16.mxu1 %v7141_v0 }
0x36ab   : > { %6998 = vmatpush3.bf16.msra.mxu1 %v7216_v18 }
0x36ac   : > { %6999 = vmatprep.subr.bf16.mxu1 %v7141_v0 }
0x36af   : > { %7001 = vmatpush3.bf16.msra.mxu1 %v7228_v24 }
0x36b0   : > { %7002 = vmatprep.subr.bf16.mxu1 %v7141_v0 }
0x36b3   : > { %7004 = vmatpush3.bf16.msra.mxu1 %v7240_v30 }
0x36b4   : > { %7005 = vmatprep.subr.bf16.mxu1 %v7141_v0 }
0x36b7   : > { %7007 = vmatpush3.bf16.msra.mxu1 %v7252_v36 }
0x36b8   : > { %7008 = vmatprep.subr.bf16.mxu1 %v7141_v0 }
0x36bb   : > { %7010 = vmatpush3.bf16.msra.mxu1 %v7264_v42 }
0x36bc   : > { %7011 = vmatprep.subr.bf16.mxu1 %v7141_v0 }
0x36bf   : > { %7013 = vmatpush3.bf16.msra.mxu1 %v7280_v46 }
0x36c0   : > { %7014 = vmatprep.subr.bf16.mxu1 %v7141_v0 }
0x36c3   : > { %7016 = vmatpush3.bf16.msra.mxu1 %v7288_v50 }
0x3779   : > { %v3432_v45 = vpop.f32.mrb[38].mxu1 }
0x377a   : > { %v3436_v28 = vmul.f32 %v3432_v45, %v3365_v26  ;;  %v5903_v29 = vpop.f32.mrb[39].mxu1 }
0x377c   : > { %v3437_v31 = vsel %vm446_vm1, %v3436_v28, 0.0 }
0x377d   : > { %3438 = vadd.xlane.f32.xlu1 %v3437_v31 }
0x380a   : > { %v3439_v32 = vpop.xlane.xlu1 %3438 }
0x380b   : > { %vm3440_vm10 = vcmp.eq.f32.partialorder %v3439_v32, 0.0 }
0x380c   : > { %v3441_v34 = vsel %vm3440_vm10, 1e-08, %v3439_v32 }
0x380d   : > { %7124 = vrcp.f32 %v3441_v34 }
0x3817   : > { %v7125_v35 = vpop.eup %7124 }
0x3818   : > { %v3443_v37 = vmul.f32 %v7125_v35, %v3359_v23 }
0x381a   : > { %v3446_v38 = vmul.f32 %v3443_v37, %v3432_v45  ;;  %v3444_v40 = vmul.f32 %v3443_v37, %v3365_v26 }
0x381c   : > { %v3447_v41 = vsub.f32 %v8261_v20, %v3446_v38  ;;  %v3445_v43 = vadd.f32 %v3444_v40, %v8264_v22 }
0x381e   : > { %5937 = vmatmul.mubr.f32.vlgmr.msra.gmra.mrb[40].mxu0 %v3447_v41 }
0x381f   : > { %7019 = vmatpush3.bf16.msra.mxu0 %v7205_v12  ;;  %6006 = vmatprep.mubr.msk.f32.mxu0 %vm7142_vm0, %v7143_v1  ;;  %vm3522_vm0 = vcmp.eq.f32.partialorder %v3359_v23, 0.0 }
0x3820   : > { %7020 = vmatprep.subr.bf16.mxu0 %v7141_v0 }
0x3823   : > { %7022 = vmatpush3.bf16.msra.mxu0 %v7216_v18 }
0x3824   : > { %7023 = vmatprep.subr.bf16.mxu0 %v7141_v0 }
0x3827   : > { %7025 = vmatpush3.bf16.msra.mxu0 %v7228_v24 }
0x3828   : > { %7026 = vmatprep.subr.bf16.mxu0 %v7141_v0 }
0x382b   : > { %7028 = vmatpush3.bf16.msra.mxu0 %v7240_v30  ;;  %v3523_v30 = vsel %vm3522_vm0, 1e-08, %v3359_v23 }
0x382c   : > { %7029 = vmatprep.subr.bf16.mxu0 %v7141_v0  ;;  %7126 = vrcp.f32 %v3523_v30 }
0x382f   : > { %7031 = vmatpush3.bf16.msra.mxu0 %v7252_v36 }
0x3830   : > { %7032 = vmatprep.subr.bf16.mxu0 %v7141_v0 }
0x3833   : > { %7034 = vmatpush3.bf16.msra.mxu0 %v7264_v42 }
0x3834   : > { %7035 = vmatprep.subr.bf16.mxu0 %v7141_v0 }
0x3836   : > { %v7127_v36 = vpop.eup %7126 }
0x3837   : > { %7037 = vmatpush3.bf16.msra.mxu0 %v7280_v46 }
0x3838   : > { %7038 = vmatprep.subr.bf16.mxu0 %v7141_v0 }
0x383b   : > { %7040 = vmatpush3.bf16.msra.mxu0 %v7288_v50 }
0x38f1   : > { %v3514_v1 = vpop.f32.mrb[40].mxu0 }
0x38f2   : > { %v3518_v12 = vmul.f32 %v3514_v1, %v3447_v41  ;;  %v5938_v18 = vpop.f32.mrb[41].mxu0 }
0x38f4   : > { %v3519_v24 = vsel %vm446_vm1, %v3518_v12, 0.0 }
0x38f5   : > { %3520 = vadd.xlane.f32.xlu0 %v3519_v24 }
0x3982   : > { %v3521_v44 = vpop.xlane.xlu0 %3520 }
0x3983   : > { %v3525_v42 = vmul.f32 %v7127_v36, %v3521_v44 }
0x3985   : > { %v3526_v47 = vmul.f32 %v3525_v42, %v3365_v26 }
0x3987   : > { %v3527_v48 = vadd.f32 %v3526_v47, %v3514_v1 }
0x3989   : > { %5972 = vmatmul.mubr.f32.vlgmr.msra.gmra.mrb[40].mxu1 %v3527_v48 }
0x3a5c   : > { %v3594_v46 = vpop.f32.mrb[40].mxu1 }
0x3a5d   : > { %v3598_v0 = vmul.f32 %v3594_v46, %v3527_v48  ;;  %v5973_v49 = vpop.f32.mrb[41].mxu1 }
0x3a5f   : > { %v3599_v50 = vsel %vm446_vm1, %v3598_v0, 0.0 }
0x3a60   : > { %3600 = vadd.xlane.f32.xlu1 %v3599_v50 }
0x3aed   : > { %v3601_v51 = vpop.xlane.xlu1 %3600 }
0x3aee   : > { %vm3602_vm11 = vcmp.eq.f32.partialorder %v3601_v51, 0.0 }
0x3aef   : > { %v3603_v52 = vsel %vm3602_vm11, 1e-08, %v3601_v51 }
0x3af0   : > { %7128 = vrcp.f32 %v3603_v52 }
0x3afa   : > { %v7129_v53 = vpop.eup %7128 }
0x3afb   : > { %v3605_v54 = vmul.f32 %v7129_v53, %v3521_v44 }
0x3afd   : > { %v3606_v55 = vmul.f32 %v3605_v54, %v3527_v48 }
0x3aff   : > { %v3607_v56 = vadd.f32 %v3606_v55, %v3445_v43 }
0x3b01   : > { %6007 = vmatmul.mubr.f32.vlgmr.msra.gmra.mrb[42].mxu0 %v3607_v56 }
0x3bd4   : > { %v3674_v57 = vpop.f32.mrb[42].mxu0 }
0x3bd5   : > { %v3678_v59 = vsub.f32 %v3674_v57, %v7132_v58  ;;  %v6008_v60 = vpop.f32.mrb[43].mxu0 }
0x3bd7   : > { %v3679_v61 = vmul.f32 %v3678_v59, %v3678_v59 }
0x3bd9   : > { %v3680_v62 = vsel %vm446_vm1, %v3679_v61, 0.0 }
0x3bda   : > { %3681 = vadd.xlane.f32.xlu0 %v3680_v62 }
0x3c67   : > { %v3682_v63 = vpop.xlane.xlu0 %3681 }
0x3c68   : > { %7130 = vrsqrt.f32 %v3682_v63  ;;  %vm3685_vm13 = vcmp.eq.f32.partialorder %v3682_v63, inf  ;;  %v3688_v4 = vand.u32 2147483648, %v3682_v63  ;;  %vm3687_vm14 = vcmp.eq.f32.partialorder %v3682_v63, 0.0 }
0x3c72   : > { %v7131_v2 = vpop.eup %7130 }
0x3c73   : > { %v3684_v3 = vmul.f32 %v7131_v2, %v3682_v63 }
0x3c75   : > { %v3686_v6 = vsel %vm3685_vm13, %v3682_v63, %v3684_v3 }
0x3c76   : > { %v3689_v8 = vsel %vm3687_vm14, %v3688_v4, %v3686_v6 }
0x3c77   : > { %3691 = vst.msk [vmem:[%s200_s26] sm:$0x1] %vm3690_vm12, %v3689_v8 }
0x3c78 PF: > { %s13_s12 = sadd.s32 1, %s7139_s12  }
0x3c79   : > { %p10_p4 = scmp.ge.s32.totalorder %s13_s12, 4  }
0x3c7b   :  { %12 = sbr.rel (!%p10_p4) target bundleno = 1 (0x1), region = 68 }

</bundles_post_ra>
